<compile_context>
chip_gen: v7x
topology: tpu7x:2x2x1
jax: 0.10.0
libtpu: 0.0.40
codegen_flags: <defaults>
</compile_context>

<pallas_src>
import functools

import jax
import jax.numpy as jnp
from jax.experimental import pallas as pl
from jax.experimental.pallas import tpu as pltpu

_VMEM_LIMIT = 32 * 1024 * 1024  # safe on v7x (64 MiB physical/TC); fine on v5e/v6e.
_ROW_TILE_CAP = 512             # big enough to amortize weight streaming on v5e/v6e,
                                # small enough to keep v7x VMEM comfortable.


# ----------------------------------------------------------------------------
# tiling helpers
# ----------------------------------------------------------------------------
def _row_tile(m, cap=_ROW_TILE_CAP):
    """Sublane (M) tile: full dim when small (always legal), else a fixed capped tile;
    ragged boundary blocks are handled by Pallas (no full-M VMEM cliff)."""
    return m if m <= cap else cap


def _col_tile(n, pref=256):
    """Lane (N) tile: multiples of 128 keep stores lane-dense; else full dim."""
    if n % pref == 0:
        return pref
    if n % 128 == 0:
        return 128
    return n


def _gelu_tanh(x):
    # TODO(synk): timm uses exact erf GELU; tanh approximation (very close) lowers cleanly.
    return 0.5 * x * (1.0 + jnp.tanh(0.7978845608028654 * (x + 0.044715 * x * x * x)))


def _layernorm_f32(x_f32, g_ref, b_ref, eps):
    mu = jnp.mean(x_f32, axis=-1, keepdims=True)
    xc = x_f32 - mu
    var = jnp.mean(xc * xc, axis=-1, keepdims=True)
    return xc * jax.lax.rsqrt(var + eps) * g_ref[...] + b_ref[...]


# ----------------------------------------------------------------------------
# Matmul + bias (+ optional GELU, + optional fused residual add) on the MXU
# ----------------------------------------------------------------------------
def _mm_bias_kernel(x_ref, w_ref, b_ref, o_ref, *, activation):
    acc = jnp.dot(x_ref[...], w_ref[...], preferred_element_type=jnp.float32) + b_ref[...]
    if activation == "gelu":
        acc = _gelu_tanh(acc)
    o_ref[...] = acc.astype(o_ref.dtype)


def _mm_bias_res_kernel(x_ref, w_ref, b_ref, r_ref, o_ref, *, activation):
    acc = jnp.dot(x_ref[...], w_ref[...], preferred_element_type=jnp.float32) + b_ref[...]
    if activation == "gelu":
        acc = _gelu_tanh(acc)
    acc = acc + r_ref[...].astype(jnp.float32)   # fused residual add
    o_ref[...] = acc.astype(o_ref.dtype)


def matmul_bias(x, w, b, *, activation=None, residual=None, out_dtype=jnp.bfloat16):
    """x: (M, K) bf16, w: (K, N) bf16, b: (N,), optional residual: (M, N) -> (M, N)."""
    M, K = x.shape
    N = w.shape[1]
    tm = _row_tile(M)
    tn = _col_tile(N)
    b2 = b.reshape(1, N).astype(jnp.float32)

    in_specs = [
        pl.BlockSpec((tm, K), lambda i, j: (i, 0)),
        pl.BlockSpec((K, tn), lambda i, j: (0, j)),
        pl.BlockSpec((1, tn), lambda i, j: (0, j)),
    ]
    args = [x, w, b2]
    if residual is not None:
        in_specs.append(pl.BlockSpec((tm, tn), lambda i, j: (i, j)))
        args.append(residual)
        kernel = functools.partial(_mm_bias_res_kernel, activation=activation)
    else:
        kernel = functools.partial(_mm_bias_kernel, activation=activation)

    return pl.pallas_call(
        kernel,
        out_shape=jax.ShapeDtypeStruct((M, N), out_dtype),
        grid=(pl.cdiv(M, tm), N // tn),
        in_specs=in_specs,
        out_specs=pl.BlockSpec((tm, tn), lambda i, j: (i, j)),
        compiler_params=pltpu.CompilerParams(
            dimension_semantics=("parallel", "parallel"),
            vmem_limit_bytes=_VMEM_LIMIT),
    )(*args)


# ----------------------------------------------------------------------------
# LayerNorm fused into the consumer matmul's prologue (LN1 -> qkv)
# ----------------------------------------------------------------------------
def _ln_mm_kernel(x_ref, g_ref, b_ref, w_ref, bias_ref, o_ref, *, eps):
    y = _layernorm_f32(x_ref[...].astype(jnp.float32), g_ref, b_ref, eps).astype(jnp.bfloat16)
    acc = jnp.dot(y, w_ref[...], preferred_element_type=jnp.float32) + bias_ref[...]
    o_ref[...] = acc.astype(o_ref.dtype)


def ln_matmul_bias(x, g, b, w, bias, *, eps=1e-6, out_dtype=jnp.bfloat16):
    """out = LN(x) @ w + bias, with LN recomputed on the resident x tile per N-tile."""
    M, D = x.shape
    N = w.shape[1]
    tm = _row_tile(M)
    tn = _col_tile(N)
    return pl.pallas_call(
        functools.partial(_ln_mm_kernel, eps=eps),
        out_shape=jax.ShapeDtypeStruct((M, N), out_dtype),
        grid=(pl.cdiv(M, tm), N // tn),
        in_specs=[
            pl.BlockSpec((tm, D), lambda i, j: (i, 0)),
            pl.BlockSpec((1, D), lambda i, j: (0, 0)),
            pl.BlockSpec((1, D), lambda i, j: (0, 0)),
            pl.BlockSpec((D, tn), lambda i, j: (0, j)),
            pl.BlockSpec((1, tn), lambda i, j: (0, j)),
        ],
        out_specs=pl.BlockSpec((tm, tn), lambda i, j: (i, j)),
        compiler_params=pltpu.CompilerParams(
            dimension_semantics=("parallel", "parallel"),
            vmem_limit_bytes=_VMEM_LIMIT),
    )(x, g.reshape(1, D).astype(jnp.float32), b.reshape(1, D).astype(jnp.float32),
      w, bias.reshape(1, N).astype(jnp.float32))


# ----------------------------------------------------------------------------
# Fused MLP block: out = x + fc2(GELU(fc1(LN(x)))), hidden dim tiled as a
# reduction grid axis -> the (M, 4D) intermediate never touches HBM.
# ----------------------------------------------------------------------------
def _mlp_kernel(x_ref, g_ref, b_ref, w1_ref, b1_ref, w2_ref, b2_ref, o_ref, acc_ref, *, eps):
    hj = pl.program_id(1)

    @pl.when(hj == 0)
    def _init():
        acc_ref[...] = jnp.zeros_like(acc_ref)

    y = _layernorm_f32(x_ref[...].astype(jnp.float32), g_ref, b_ref, eps).astype(jnp.bfloat16)
    h = jnp.dot(y, w1_ref[...], preferred_element_type=jnp.float32) + b1_ref[...]
    h = _gelu_tanh(h).astype(jnp.bfloat16)
    acc_ref[...] += jnp.dot(h, w2_ref[...], preferred_element_type=jnp.float32)

    @pl.when(hj == pl.num_programs(1) - 1)
    def _finalize():
        out = acc_ref[...] + b2_ref[...] + x_ref[...].astype(jnp.float32)
        o_ref[...] = out.astype(o_ref.dtype)


def mlp_block(x, g, b, w1, b1, w2, b2, *, eps=1e-6, out_dtype=jnp.bfloat16):
    M, D = x.shape
    H4 = w1.shape[1]
    tm = _row_tile(M)
    th = 512 if H4 % 512 == 0 else (256 if H4 % 256 == 0 else H4)
    return pl.pallas_call(
        functools.partial(_mlp_kernel, eps=eps),
        out_shape=jax.ShapeDtypeStruct((M, D), out_dtype),
        grid=(pl.cdiv(M, tm), H4 // th),
        in_specs=[
            pl.BlockSpec((tm, D), lambda i, h: (i, 0)),   # x: LN source AND residual
            pl.BlockSpec((1, D), lambda i, h: (0, 0)),
            pl.BlockSpec((1, D), lambda i, h: (0, 0)),
            pl.BlockSpec((D, th), lambda i, h: (0, h)),
            pl.BlockSpec((1, th), lambda i, h: (0, h)),
            pl.BlockSpec((th, D), lambda i, h: (h, 0)),
            pl.BlockSpec((1, D), lambda i, h: (0, 0)),
        ],
        out_specs=pl.BlockSpec((tm, D), lambda i, h: (i, 0)),
        scratch_shapes=[pltpu.VMEM((tm, D), jnp.float32)],
        compiler_params=pltpu.CompilerParams(
            dimension_semantics=("parallel", "arbitrary"),
            vmem_limit_bytes=_VMEM_LIMIT),
    )(x, g.reshape(1, D).astype(jnp.float32), b.reshape(1, D).astype(jnp.float32),
      w1, b1.reshape(1, H4).astype(jnp.float32),
      w2, b2.reshape(1, D).astype(jnp.float32))


# ----------------------------------------------------------------------------
# Softmax attention reading q/k/v directly from the (B, S, 3D) qkv buffer.
# Two dh=64 heads are packed per grid step (128-lane-dense blocks); bf16 MXU
# dots with f32 accumulation; exact softmax divide. Output is written already
# head-merged in (B, S, D) so the proj matmul consumes it without a transpose.
# ----------------------------------------------------------------------------
def _attn_kernel(q_ref, k_ref, v_ref, o_ref, *, scale, dh, hpb):
    q = q_ref[0]                         # (S, hpb*dh) bf16
    k = k_ref[0]
    v = v_ref[0]
    outs = []
    for h in range(hpb):                 # static unroll over heads packed in this block
        qs = q[:, h * dh:(h + 1) * dh]
        ks = k[:, h * dh:(h + 1) * dh]
        vs = v[:, h * dh:(h + 1) * dh]
        s = jax.lax.dot_general(qs, ks, (((1,), (1,)), ((), ())),
                                preferred_element_type=jnp.float32) * scale   # (S, S) f32
        m = jnp.max(s, axis=-1, keepdims=True)
        p = jnp.exp(s - m)
        p = p / jnp.sum(p, axis=-1, keepdims=True)
        outs.append(jnp.dot(p.astype(vs.dtype), vs, preferred_element_type=jnp.float32))
    o_ref[0] = jnp.concatenate(outs, axis=-1).astype(o_ref.dtype)


def attention_from_qkv(qkv_bsd, *, num_heads, scale, out_dtype=jnp.bfloat16):
    """qkv_bsd: (B, S, 3D) in timm layout ([q | k | v], head-major within each) -> (B, S, D)."""
    B, S, threeD = qkv_bsd.shape
    D = threeD // 3
    dh = D // num_heads
    hpb = 1
    if dh < 128 and 128 % dh == 0 and num_heads % (128 // dh) == 0:
        hpb = 128 // dh                 # pack heads until the block is 128 lanes wide
    hd = hpb * dh
    n_hp = num_heads // hpb
    assert hd % 128 == 0 or hd == threeD, "attention head block must be 128-lane aligned"
    return pl.pallas_call(
        functools.partial(_attn_kernel, scale=scale, dh=dh, hpb=hpb),
        out_shape=jax.ShapeDtypeStruct((B, S, D), out_dtype),
        grid=(B, n_hp),
        in_specs=[
            pl.BlockSpec((1, S, hd), lambda b, h: (b, 0, h)),              # q columns
            pl.BlockSpec((1, S, hd), lambda b, h: (b, 0, h + n_hp)),       # k columns
            pl.BlockSpec((1, S, hd), lambda b, h: (b, 0, h + 2 * n_hp)),   # v columns
        ],
        out_specs=pl.BlockSpec((1, S, hd), lambda b, h: (b, 0, h)),
        compiler_params=pltpu.CompilerParams(
            dimension_semantics=("parallel", "parallel"),
            vmem_limit_bytes=_VMEM_LIMIT),
    )(qkv_bsd, qkv_bsd, qkv_bsd)


# ----------------------------------------------------------------------------
# Standalone LayerNorm (final norm only)
# ----------------------------------------------------------------------------
def _layernorm_kernel(x_ref, g_ref, b_ref, o_ref, *, eps):
    o_ref[...] = _layernorm_f32(x_ref[...].astype(jnp.float32), g_ref, b_ref, eps
                                ).astype(o_ref.dtype)


def layernorm(x, g, b, *, eps=1e-6, out_dtype=jnp.bfloat16):
    M, D = x.shape
    tm = _row_tile(M, cap=256)
    return pl.pallas_call(
        functools.partial(_layernorm_kernel, eps=eps),
        out_shape=jax.ShapeDtypeStruct((M, D), out_dtype),
        grid=(pl.cdiv(M, tm),),
        in_specs=[
            pl.BlockSpec((tm, D), lambda i: (i, 0)),
            pl.BlockSpec((1, D), lambda i: (0, 0)),
            pl.BlockSpec((1, D), lambda i: (0, 0)),
        ],
        out_specs=pl.BlockSpec((tm, D), lambda i: (i, 0)),
        compiler_params=pltpu.CompilerParams(
            dimension_semantics=("parallel",), vmem_limit_bytes=_VMEM_LIMIT),
    )(x, g.reshape(1, D).astype(jnp.float32), b.reshape(1, D).astype(jnp.float32))


# ----------------------------------------------------------------------------
# Bilinear resize (align_corners=False) as separable matmuls  Rh @ X @ Rw^T
# (one batch per grid step, all channels batched inside, bf16 MXU operands)
# ----------------------------------------------------------------------------
def _bilinear_matrix(out_size, in_size):
    """PyTorch-compatible bilinear interpolation matrix (out_size, in_size), f32."""
    scale = in_size / out_size
    dst = jnp.arange(out_size, dtype=jnp.float32)
    src = jnp.maximum((dst + 0.5) * scale - 0.5, 0.0)
    i0 = jnp.clip(jnp.floor(src).astype(jnp.int32), 0, in_size - 1)
    i1 = jnp.minimum(i0 + 1, in_size - 1)
    lam = src - i0.astype(jnp.float32)
    return (jax.nn.one_hot(i0, in_size, dtype=jnp.float32) * (1.0 - lam)[:, None]
            + jax.nn.one_hot(i1, in_size, dtype=jnp.float32) * lam[:, None])


def _resize_kernel(x_ref, rh_ref, rwT_ref, o_ref, *, channels):
    rh = rh_ref[...]                                   # (Ho, Hi) bf16
    rwT = rwT_ref[...]                                 # (Wi, Wo) bf16
    for c in range(channels):                          # static unroll; C is small
        t = jnp.dot(rh, x_ref[0, c], preferred_element_type=jnp.float32)              # (Ho, Wi)
        y = jnp.dot(t.astype(jnp.bfloat16), rwT, preferred_element_type=jnp.float32)  # (Ho, Wo)
        o_ref[0, c] = y.astype(o_ref.dtype)


def bilinear_resize(x_nchw, out_h, out_w, *, out_dtype=jnp.bfloat16):
    B, C, Hi, Wi = x_nchw.shape
    rh = _bilinear_matrix(out_h, Hi).astype(jnp.bfloat16)       # (Ho, Hi)
    rwT = _bilinear_matrix(out_w, Wi).T.astype(jnp.bfloat16)    # (Wi, Wo)
    return pl.pallas_call(
        functools.partial(_resize_kernel, channels=C),
        out_shape=jax.ShapeDtypeStruct((B, C, out_h, out_w), out_dtype),
        grid=(B,),
        in_specs=[
            pl.BlockSpec((1, C, Hi, Wi), lambda b: (b, 0, 0, 0)),
            pl.BlockSpec((out_h, Hi), lambda b: (0, 0)),
            pl.BlockSpec((Wi, out_w), lambda b: (0, 0)),
        ],
        out_specs=pl.BlockSpec((1, C, out_h, out_w), lambda b: (b, 0, 0, 0)),
        compiler_params=pltpu.CompilerParams(
            dimension_semantics=("parallel",),
            vmem_limit_bytes=_VMEM_LIMIT),
    )(x_nchw.astype(jnp.bfloat16), rh, rwT)


# ----------------------------------------------------------------------------
# Parameters (deterministic synthetic init; same structure as timm ViT blocks)
# ----------------------------------------------------------------------------
def init_vit_params(key, *, in_channels, patch_size, embed_dim, depth, num_tokens):
    D = embed_dim
    K = patch_size * patch_size * in_channels

    def dense(k, fan_in, shape):
        w = jax.random.normal(k, shape, jnp.float32) * (1.0 / fan_in) ** 0.5
        return w.astype(jnp.bfloat16)

    keys = jax.random.split(key, 3 + depth)
    params = {
        "patch_w": dense(keys[0], K, (K, D)),
        "patch_b": jnp.zeros((D,), jnp.float32),
        "cls_token": jax.random.normal(keys[1], (1, 1, D), jnp.float32) * 0.02,
        "pos_embed": jax.random.normal(keys[2], (1, num_tokens, D), jnp.float32) * 0.02,
        "norm_g": jnp.ones((D,), jnp.float32),
        "norm_b": jnp.zeros((D,), jnp.float32),
        "blocks": [],
    }
    for i in range(depth):
        bk = jax.random.split(keys[3 + i], 4)
        params["blocks"].append({
            "ln1_g": jnp.ones((D,), jnp.float32), "ln1_b": jnp.zeros((D,), jnp.float32),
            "qkv_w": dense(bk[0], D, (D, 3 * D)), "qkv_b": jnp.zeros((3 * D,), jnp.float32),
            "proj_w": dense(bk[1], D, (D, D)), "proj_b": jnp.zeros((D,), jnp.float32),
            "ln2_g": jnp.ones((D,), jnp.float32), "ln2_b": jnp.zeros((D,), jnp.float32),
            "fc1_w": dense(bk[2], D, (D, 4 * D)), "fc1_b": jnp.zeros((4 * D,), jnp.float32),
            "fc2_w": dense(bk[3], 4 * D, (4 * D, D)), "fc2_b": jnp.zeros((D,), jnp.float32),
        })
    return params


# ----------------------------------------------------------------------------
# ViTBlock forward (matches the PyTorch module graph; dropout = identity at eval)
# ----------------------------------------------------------------------------
def vit_block_forward(x_nchw, params, *, img_size, patch_size, embed_dim, num_heads):
    B, C, _, _ = x_nchw.shape
    D, P = embed_dim, patch_size
    dh = D // num_heads
    hw = img_size // P
    N = hw * hw
    S = N + 1

    # 1) bilinear resize to (img_size, img_size)
    xr = bilinear_resize(x_nchw, img_size, img_size)                  # (B,C,img,img) bf16

    # 2) patch embed: stride==kernel conv == patch-wise matmul (pure relayout, no im2col).
    cols = (xr.reshape(B, C, hw, P, hw, P)
              .transpose(0, 2, 4, 3, 5, 1)
              .reshape(B * N, P * P * C))
    patch_tok = matmul_bias(cols, params["patch_w"], params["patch_b"])   # (B*N, D) bf16

    # 3) prepend cls token, add pos_embed (single bf16 add, no f32 broadcast to HBM);
    #    pos_drop is identity at inference
    pos = params["pos_embed"].astype(jnp.bfloat16)                        # (1, S, D)
    cls = jnp.broadcast_to(params["cls_token"].astype(jnp.bfloat16), (B, 1, D))
    tokens = jnp.concatenate([cls, patch_tok.reshape(B, N, D)], axis=1) + pos
    x = tokens.reshape(B * S, D)                                          # (B*S, D) bf16

    # 4) pre-norm transformer blocks
    scale = dh ** -0.5
    for blk in params["blocks"]:
        # LN1 fused into the qkv matmul prologue
        qkv = ln_matmul_bias(x, blk["ln1_g"], blk["ln1_b"],
                             blk["qkv_w"], blk["qkv_b"])                  # (B*S, 3D)
        # attention reads q/k/v straight from the qkv buffer; output is head-merged
        a = attention_from_qkv(qkv.reshape(B, S, 3 * D),
                               num_heads=num_heads, scale=scale)          # (B, S, D)
        x = matmul_bias(a.reshape(B * S, D), blk["proj_w"], blk["proj_b"],
                        residual=x)                                       # attn residual
        # LN2 + fc1 + GELU + fc2 + residual fused; (M, 4D) never hits HBM
        x = mlp_block(x, blk["ln2_g"], blk["ln2_b"],
                      blk["fc1_w"], blk["fc1_b"], blk["fc2_w"], blk["fc2_b"])

    # 5) final norm, drop CLS, (B, N, D) -> (B, D, h, w)
    xf = layernorm(x, params["norm_g"], params["norm_b"], out_dtype=jnp.float32)
    xf = xf.reshape(B, S, D)[:, 1:, :]
    return xf.transpose(0, 2, 1).reshape(B, D, hw, hw)


# ----------------------------------------------------------------------------
if __name__ == "__main__":
    key = jax.random.PRNGKey(0)
    k_in, k_par = jax.random.split(key)

    # Small config (same graph as ViTBlock, scaled down): input 16x16 with 4 channels
    # (exercises the custom patch_embed.proj path), resized to 32x32, patch 8,
    # embed_dim 256, 4 heads (dh=64 -> 2 heads per attention grid step), 2 blocks.
    B, C_IN, S_IN = 2, 4, 16
    IMG, PATCH, DIM, HEADS, DEPTH = 32, 8, 256, 4, 2
    HW = IMG // PATCH

    x = jax.random.normal(k_in, (B, C_IN, S_IN, S_IN), jnp.float32)
    params = init_vit_params(k_par, in_channels=C_IN, patch_size=PATCH,
                             embed_dim=DIM, depth=DEPTH, num_tokens=HW * HW + 1)

    fwd = jax.jit(functools.partial(vit_block_forward, img_size=IMG,
                                    patch_size=PATCH, embed_dim=DIM,
                                    num_heads=HEADS))
    out = jax.block_until_ready(fwd(x, params))

    assert out.shape == (B, DIM, HW, HW), out.shape
    assert bool(jnp.all(jnp.isfinite(out)))
    print("KERNEL_OK")
</pallas_src>

<mosaic_0001>
module attributes {stable_mosaic.version = 11 : i64} {
  func.func @_resize_kernel(%arg0: i32, %arg1: memref<1x4x16x16xbf16, #tpu.memory_space<vmem>>, %arg2: memref<32x16xbf16, #tpu.memory_space<vmem>>, %arg3: memref<16x32xbf16, #tpu.memory_space<vmem>>, %arg4: memref<1x4x32x32xbf16, #tpu.memory_space<vmem>>) attributes {dimension_semantics = [#tpu.dimension_semantics<parallel>], iteration_bounds = array<i64: 2>, scalar_prefetch = 0 : i64, scratch_operands = 0 : i64, tpu.core_type = #tpu.core_type<tc>, window_params = [{transform_indices = @transform_0, window_bounds = array<i64: 1, 4, 16, 16>}, {pipeline_mode = #tpu.pipeline_mode<synchronous>, transform_indices = @transform_1, window_bounds = array<i64: 32, 16>}, {pipeline_mode = #tpu.pipeline_mode<synchronous>, transform_indices = @transform_2, window_bounds = array<i64: 16, 32>}, {transform_indices = @transform_3, window_bounds = array<i64: 1, 4, 32, 32>}]} {
    %c0 = arith.constant 0 : index
    %c0_0 = arith.constant 0 : index
    %0 = vector.load %arg2[%c0, %c0_0] : memref<32x16xbf16, #tpu.memory_space<vmem>>, vector<32x16xbf16>
    %c0_1 = arith.constant 0 : index
    %c0_2 = arith.constant 0 : index
    %1 = vector.load %arg3[%c0_1, %c0_2] : memref<16x32xbf16, #tpu.memory_space<vmem>>, vector<16x32xbf16>
    %c0_3 = arith.constant 0 : index
    %c0_4 = arith.constant 0 : index
    %c0_5 = arith.constant 0 : index
    %c0_6 = arith.constant 0 : index
    %2 = vector.load %arg1[%c0_3, %c0_4, %c0_5, %c0_6] : memref<1x4x16x16xbf16, #tpu.memory_space<vmem>>, vector<1x1x16x16xbf16>
    %3 = vector.shape_cast %2 : vector<1x1x16x16xbf16> to vector<16x16xbf16>
    %cst = arith.constant dense<0.000000e+00> : vector<32x16xf32>
    %4 = tpu.matmul %0, %3, %cst {dimension_numbers = #tpu.dot_dimension_numbers<[1], [0], [0], [1], [0, 0, 1, 1], [], []>} : vector<32x16xbf16>, vector<16x16xbf16>, vector<32x16xf32> -> vector<32x16xf32>
    %5 = arith.truncf %4 : vector<32x16xf32> to vector<32x16xbf16>
    %cst_7 = arith.constant dense<0.000000e+00> : vector<32x32xf32>
    %6 = tpu.matmul %5, %1, %cst_7 {dimension_numbers = #tpu.dot_dimension_numbers<[1], [0], [0], [1], [0, 0, 1, 1], [], []>} : vector<32x16xbf16>, vector<16x32xbf16>, vector<32x32xf32> -> vector<32x32xf32>
    %7 = arith.truncf %6 : vector<32x32xf32> to vector<32x32xbf16>
    %c0_8 = arith.constant 0 : index
    %c0_9 = arith.constant 0 : index
    %c0_10 = arith.constant 0 : index
    %c0_11 = arith.constant 0 : index
    %8 = vector.load %arg4[%c0_8, %c0_9, %c0_10, %c0_11] : memref<1x4x32x32xbf16, #tpu.memory_space<vmem>>, vector<1x1x32x32xbf16>
    %9 = vector.shape_cast %8 : vector<1x1x32x32xbf16> to vector<32x32xbf16>
    %10 = vector.shape_cast %7 : vector<32x32xbf16> to vector<1x1x32x32xbf16>
    tpu.vector_store %arg4[%c0_8, %c0_9, %c0_10, %c0_11], %10 {strides = array<i32>} : memref<1x4x32x32xbf16, #tpu.memory_space<vmem>>, vector<1x1x32x32xbf16>,
    %c0_12 = arith.constant 0 : index
    %c1 = arith.constant 1 : index
    %c0_13 = arith.constant 0 : index
    %c0_14 = arith.constant 0 : index
    %11 = vector.load %arg1[%c0_12, %c1, %c0_13, %c0_14] : memref<1x4x16x16xbf16, #tpu.memory_space<vmem>>, vector<1x1x16x16xbf16>
    %12 = vector.shape_cast %11 : vector<1x1x16x16xbf16> to vector<16x16xbf16>
    %cst_15 = arith.constant dense<0.000000e+00> : vector<32x16xf32>
    %13 = tpu.matmul %0, %12, %cst_15 {dimension_numbers = #tpu.dot_dimension_numbers<[1], [0], [0], [1], [0, 0, 1, 1], [], []>} : vector<32x16xbf16>, vector<16x16xbf16>, vector<32x16xf32> -> vector<32x16xf32>
    %14 = arith.truncf %13 : vector<32x16xf32> to vector<32x16xbf16>
    %cst_16 = arith.constant dense<0.000000e+00> : vector<32x32xf32>
    %15 = tpu.matmul %14, %1, %cst_16 {dimension_numbers = #tpu.dot_dimension_numbers<[1], [0], [0], [1], [0, 0, 1, 1], [], []>} : vector<32x16xbf16>, vector<16x32xbf16>, vector<32x32xf32> -> vector<32x32xf32>
    %16 = arith.truncf %15 : vector<32x32xf32> to vector<32x32xbf16>
    %c0_17 = arith.constant 0 : index
    %c1_18 = arith.constant 1 : index
    %c0_19 = arith.constant 0 : index
    %c0_20 = arith.constant 0 : index
    %17 = vector.load %arg4[%c0_17, %c1_18, %c0_19, %c0_20] : memref<1x4x32x32xbf16, #tpu.memory_space<vmem>>, vector<1x1x32x32xbf16>
    %18 = vector.shape_cast %17 : vector<1x1x32x32xbf16> to vector<32x32xbf16>
    %19 = vector.shape_cast %16 : vector<32x32xbf16> to vector<1x1x32x32xbf16>
    tpu.vector_store %arg4[%c0_17, %c1_18, %c0_19, %c0_20], %19 {strides = array<i32>} : memref<1x4x32x32xbf16, #tpu.memory_space<vmem>>, vector<1x1x32x32xbf16>,
    %c0_21 = arith.constant 0 : index
    %c2 = arith.constant 2 : index
    %c0_22 = arith.constant 0 : index
    %c0_23 = arith.constant 0 : index
    %20 = vector.load %arg1[%c0_21, %c2, %c0_22, %c0_23] : memref<1x4x16x16xbf16, #tpu.memory_space<vmem>>, vector<1x1x16x16xbf16>
    %21 = vector.shape_cast %20 : vector<1x1x16x16xbf16> to vector<16x16xbf16>
    %cst_24 = arith.constant dense<0.000000e+00> : vector<32x16xf32>
    %22 = tpu.matmul %0, %21, %cst_24 {dimension_numbers = #tpu.dot_dimension_numbers<[1], [0], [0], [1], [0, 0, 1, 1], [], []>} : vector<32x16xbf16>, vector<16x16xbf16>, vector<32x16xf32> -> vector<32x16xf32>
    %23 = arith.truncf %22 : vector<32x16xf32> to vector<32x16xbf16>
    %cst_25 = arith.constant dense<0.000000e+00> : vector<32x32xf32>
    %24 = tpu.matmul %23, %1, %cst_25 {dimension_numbers = #tpu.dot_dimension_numbers<[1], [0], [0], [1], [0, 0, 1, 1], [], []>} : vector<32x16xbf16>, vector<16x32xbf16>, vector<32x32xf32> -> vector<32x32xf32>
    %25 = arith.truncf %24 : vector<32x32xf32> to vector<32x32xbf16>
    %c0_26 = arith.constant 0 : index
    %c2_27 = arith.constant 2 : index
    %c0_28 = arith.constant 0 : index
    %c0_29 = arith.constant 0 : index
    %26 = vector.load %arg4[%c0_26, %c2_27, %c0_28, %c0_29] : memref<1x4x32x32xbf16, #tpu.memory_space<vmem>>, vector<1x1x32x32xbf16>
    %27 = vector.shape_cast %26 : vector<1x1x32x32xbf16> to vector<32x32xbf16>
    %28 = vector.shape_cast %25 : vector<32x32xbf16> to vector<1x1x32x32xbf16>
    tpu.vector_store %arg4[%c0_26, %c2_27, %c0_28, %c0_29], %28 {strides = array<i32>} : memref<1x4x32x32xbf16, #tpu.memory_space<vmem>>, vector<1x1x32x32xbf16>,
    %c0_30 = arith.constant 0 : index
    %c3 = arith.constant 3 : index
    %c0_31 = arith.constant 0 : index
    %c0_32 = arith.constant 0 : index
    %29 = vector.load %arg1[%c0_30, %c3, %c0_31, %c0_32] : memref<1x4x16x16xbf16, #tpu.memory_space<vmem>>, vector<1x1x16x16xbf16>
    %30 = vector.shape_cast %29 : vector<1x1x16x16xbf16> to vector<16x16xbf16>
    %cst_33 = arith.constant dense<0.000000e+00> : vector<32x16xf32>
    %31 = tpu.matmul %0, %30, %cst_33 {dimension_numbers = #tpu.dot_dimension_numbers<[1], [0], [0], [1], [0, 0, 1, 1], [], []>} : vector<32x16xbf16>, vector<16x16xbf16>, vector<32x16xf32> -> vector<32x16xf32>
    %32 = arith.truncf %31 : vector<32x16xf32> to vector<32x16xbf16>
    %cst_34 = arith.constant dense<0.000000e+00> : vector<32x32xf32>
    %33 = tpu.matmul %32, %1, %cst_34 {dimension_numbers = #tpu.dot_dimension_numbers<[1], [0], [0], [1], [0, 0, 1, 1], [], []>} : vector<32x16xbf16>, vector<16x32xbf16>, vector<32x32xf32> -> vector<32x32xf32>
    %34 = arith.truncf %33 : vector<32x32xf32> to vector<32x32xbf16>
    %c0_35 = arith.constant 0 : index
    %c3_36 = arith.constant 3 : index
    %c0_37 = arith.constant 0 : index
    %c0_38 = arith.constant 0 : index
    %35 = vector.load %arg4[%c0_35, %c3_36, %c0_37, %c0_38] : memref<1x4x32x32xbf16, #tpu.memory_space<vmem>>, vector<1x1x32x32xbf16>
    %36 = vector.shape_cast %35 : vector<1x1x32x32xbf16> to vector<32x32xbf16>
    %37 = vector.shape_cast %34 : vector<32x32xbf16> to vector<1x1x32x32xbf16>
    tpu.vector_store %arg4[%c0_35, %c3_36, %c0_37, %c0_38], %37 {strides = array<i32>} : memref<1x4x32x32xbf16, #tpu.memory_space<vmem>>, vector<1x1x32x32xbf16>,
    return
  }
  func.func @transform_0(%arg0: i32) -> (i32, i32, i32, i32) {
    %c0_i32 = arith.constant 0 : i32
    %c0_i32_0 = arith.constant 0 : i32
    %c0_i32_1 = arith.constant 0 : i32
    %c0_i32_2 = arith.constant 0 : i32
    return %arg0, %c0_i32, %c0_i32_0, %c0_i32_1 : i32, i32, i32, i32
  }
  func.func @transform_1(%arg0: i32) -> (i32, i32) {
    %c0_i32 = arith.constant 0 : i32
    %c0_i32_0 = arith.constant 0 : i32
    %c0_i32_1 = arith.constant 0 : i32
    return %c0_i32, %c0_i32_0 : i32, i32
  }
  func.func @transform_2(%arg0: i32) -> (i32, i32) {
    %c0_i32 = arith.constant 0 : i32
    %c0_i32_0 = arith.constant 0 : i32
    %c0_i32_1 = arith.constant 0 : i32
    return %c0_i32, %c0_i32_0 : i32, i32
  }
  func.func @transform_3(%arg0: i32) -> (i32, i32, i32, i32) {
    %c0_i32 = arith.constant 0 : i32
    %c0_i32_0 = arith.constant 0 : i32
    %c0_i32_1 = arith.constant 0 : i32
    %c0_i32_2 = arith.constant 0 : i32
    return %arg0, %c0_i32, %c0_i32_0, %c0_i32_1 : i32, i32, i32, i32
  }
}

module attributes {stable_mosaic.version = 11 : i64} {
  func.func @_mm_bias_kernel(%arg0: i32, %arg1: i32, %arg2: memref<32x256xbf16, #tpu.memory_space<vmem>>, %arg3: memref<256x256xbf16, #tpu.memory_space<vmem>>, %arg4: memref<1x256xf32, #tpu.memory_space<vmem>>, %arg5: memref<32x256xbf16, #tpu.memory_space<vmem>>) attributes {dimension_semantics = [#tpu.dimension_semantics<parallel>, #tpu.dimension_semantics<parallel>], iteration_bounds = array<i64: 1, 1>, scalar_prefetch = 0 : i64, scratch_operands = 0 : i64, tpu.core_type = #tpu.core_type<tc>, window_params = [{transform_indices = @transform_0, window_bounds = array<i64: 32, 256>}, {transform_indices = @transform_1, window_bounds = array<i64: 256, 256>}, {transform_indices = @transform_2, window_bounds = array<i64: 1, 256>}, {transform_indices = @transform_3, window_bounds = array<i64: 32, 256>}]} {
    %c0 = arith.constant 0 : index
    %c0_0 = arith.constant 0 : index
    %0 = vector.load %arg2[%c0, %c0_0] : memref<32x256xbf16, #tpu.memory_space<vmem>>, vector<32x256xbf16>
    %c0_1 = arith.constant 0 : index
    %c0_2 = arith.constant 0 : index
    %1 = vector.load %arg3[%c0_1, %c0_2] : memref<256x256xbf16, #tpu.memory_space<vmem>>, vector<256x256xbf16>
    %cst = arith.constant dense<0.000000e+00> : vector<32x256xf32>
    %2 = tpu.matmul %0, %1, %cst {dimension_numbers = #tpu.dot_dimension_numbers<[1], [0], [0], [1], [0, 0, 1, 1], [], []>} : vector<32x256xbf16>, vector<256x256xbf16>, vector<32x256xf32> -> vector<32x256xf32>
    %c0_3 = arith.constant 0 : index
    %c0_4 = arith.constant 0 : index
    %3 = vector.load %arg4[%c0_3, %c0_4] : memref<1x256xf32, #tpu.memory_space<vmem>>, vector<1x256xf32>
    %4 = vector.broadcast %3 : vector<1x256xf32> to vector<32x256xf32>
    %5 = arith.addf %2, %4 : vector<32x256xf32>
    %6 = arith.truncf %5 : vector<32x256xf32> to vector<32x256xbf16>
    %c0_5 = arith.constant 0 : index
    %c0_6 = arith.constant 0 : index
    %7 = vector.load %arg5[%c0_5, %c0_6] : memref<32x256xbf16, #tpu.memory_space<vmem>>, vector<32x256xbf16>
    tpu.vector_store %arg5[%c0_5, %c0_6], %6 {strides = array<i32>} : memref<32x256xbf16, #tpu.memory_space<vmem>>, vector<32x256xbf16>,
    return
  }
  func.func @transform_0(%arg0: i32, %arg1: i32) -> (i32, i32) {
    %c0_i32 = arith.constant 0 : i32
    %c0_i32_0 = arith.constant 0 : i32
    return %arg0, %c0_i32 : i32, i32
  }
  func.func @transform_1(%arg0: i32, %arg1: i32) -> (i32, i32) {
    %c0_i32 = arith.constant 0 : i32
    %c0_i32_0 = arith.constant 0 : i32
    return %c0_i32, %arg1 : i32, i32
  }
  func.func @transform_2(%arg0: i32, %arg1: i32) -> (i32, i32) {
    %c0_i32 = arith.constant 0 : i32
    %c0_i32_0 = arith.constant 0 : i32
    return %c0_i32, %arg1 : i32, i32
  }
  func.func @transform_3(%arg0: i32, %arg1: i32) -> (i32, i32) {
    %c0_i32 = arith.constant 0 : i32
    return %arg0, %arg1 : i32, i32
  }
}

module attributes {stable_mosaic.version = 11 : i64} {
  func.func @_ln_mm_kernel(%arg0: i32, %arg1: i32, %arg2: memref<34x256xbf16, #tpu.memory_space<vmem>>, %arg3: memref<1x256xf32, #tpu.memory_space<vmem>>, %arg4: memref<1x256xf32, #tpu.memory_space<vmem>>, %arg5: memref<256x256xbf16, #tpu.memory_space<vmem>>, %arg6: memref<1x256xf32, #tpu.memory_space<vmem>>, %arg7: memref<34x256xbf16, #tpu.memory_space<vmem>>) attributes {dimension_semantics = [#tpu.dimension_semantics<parallel>, #tpu.dimension_semantics<parallel>], iteration_bounds = array<i64: 1, 3>, scalar_prefetch = 0 : i64, scratch_operands = 0 : i64, tpu.core_type = #tpu.core_type<tc>, window_params = [{transform_indices = @transform_0, window_bounds = array<i64: 34, 256>}, {pipeline_mode = #tpu.pipeline_mode<synchronous>, transform_indices = @transform_1, window_bounds = array<i64: 1, 256>}, {pipeline_mode = #tpu.pipeline_mode<synchronous>, transform_indices = @transform_2, window_bounds = array<i64: 1, 256>}, {transform_indices = @transform_3, window_bounds = array<i64: 256, 256>}, {transform_indices = @transform_4, window_bounds = array<i64: 1, 256>}, {transform_indices = @transform_5, window_bounds = array<i64: 34, 256>}]} {
    %c0 = arith.constant 0 : index
    %c0_0 = arith.constant 0 : index
    %0 = vector.load %arg2[%c0, %c0_0] : memref<34x256xbf16, #tpu.memory_space<vmem>>, vector<34x256xbf16>
    %1 = arith.extf %0 : vector<34x256xbf16> to vector<34x256xf32>
    %cst = arith.constant dense<0.000000e+00> : vector<34xf32>
    %2 = vector.multi_reduction <add>, %1, %cst [1] : vector<34x256xf32> to vector<34xf32>
    %3 = vector.shape_cast %2 : vector<34xf32> to vector<34x1xf32>
    %cst_1 = arith.constant 2.560000e+02 : f32
    %4 = vector.broadcast %cst_1 : f32 to vector<34x1xf32>
    %5 = arith.divf %3, %4 : vector<34x1xf32>
    %6 = vector.broadcast %5 : vector<34x1xf32> to vector<34x256xf32>
    %7 = arith.subf %1, %6 : vector<34x256xf32>
    %8 = arith.mulf %7, %7 : vector<34x256xf32>
    %cst_2 = arith.constant dense<0.000000e+00> : vector<34xf32>
    %9 = vector.multi_reduction <add>, %8, %cst_2 [1] : vector<34x256xf32> to vector<34xf32>
    %10 = vector.shape_cast %9 : vector<34xf32> to vector<34x1xf32>
    %cst_3 = arith.constant 2.560000e+02 : f32
    %11 = vector.broadcast %cst_3 : f32 to vector<34x1xf32>
    %12 = arith.divf %10, %11 : vector<34x1xf32>
    %cst_4 = arith.constant 9.99999997E-7 : f32
    %13 = vector.broadcast %cst_4 : f32 to vector<34x1xf32>
    %14 = arith.addf %12, %13 : vector<34x1xf32>
    %15 = math.rsqrt %14 : vector<34x1xf32>
    %16 = vector.broadcast %15 : vector<34x1xf32> to vector<34x256xf32>
    %17 = arith.mulf %7, %16 : vector<34x256xf32>
    %c0_5 = arith.constant 0 : index
    %c0_6 = arith.constant 0 : index
    %18 = vector.load %arg3[%c0_5, %c0_6] : memref<1x256xf32, #tpu.memory_space<vmem>>, vector<1x256xf32>
    %19 = vector.broadcast %18 : vector<1x256xf32> to vector<34x256xf32>
    %20 = arith.mulf %17, %19 : vector<34x256xf32>
    %c0_7 = arith.constant 0 : index
    %c0_8 = arith.constant 0 : index
    %21 = vector.load %arg4[%c0_7, %c0_8] : memref<1x256xf32, #tpu.memory_space<vmem>>, vector<1x256xf32>
    %22 = vector.broadcast %21 : vector<1x256xf32> to vector<34x256xf32>
    %23 = arith.addf %20, %22 : vector<34x256xf32>
    %24 = arith.truncf %23 : vector<34x256xf32> to vector<34x256xbf16>
    %c0_9 = arith.constant 0 : index
    %c0_10 = arith.constant 0 : index
    %25 = vector.load %arg5[%c0_9, %c0_10] : memref<256x256xbf16, #tpu.memory_space<vmem>>, vector<256x256xbf16>
    %cst_11 = arith.constant dense<0.000000e+00> : vector<34x256xf32>
    %26 = tpu.matmul %24, %25, %cst_11 {dimension_numbers = #tpu.dot_dimension_numbers<[1], [0], [0], [1], [0, 0, 1, 1], [], []>} : vector<34x256xbf16>, vector<256x256xbf16>, vector<34x256xf32> -> vector<34x256xf32>
    %c0_12 = arith.constant 0 : index
    %c0_13 = arith.constant 0 : index
    %27 = vector.load %arg6[%c0_12, %c0_13] : memref<1x256xf32, #tpu.memory_space<vmem>>, vector<1x256xf32>
    %28 = vector.broadcast %27 : vector<1x256xf32> to vector<34x256xf32>
    %29 = arith.addf %26, %28 : vector<34x256xf32>
    %30 = arith.truncf %29 : vector<34x256xf32> to vector<34x256xbf16>
    %c0_14 = arith.constant 0 : index
    %c0_15 = arith.constant 0 : index
    %31 = vector.load %arg7[%c0_14, %c0_15] : memref<34x256xbf16, #tpu.memory_space<vmem>>, vector<34x256xbf16>
    tpu.vector_store %arg7[%c0_14, %c0_15], %30 {strides = array<i32>} : memref<34x256xbf16, #tpu.memory_space<vmem>>, vector<34x256xbf16>,
    return
  }
  func.func @transform_0(%arg0: i32, %arg1: i32) -> (i32, i32) {
    %c0_i32 = arith.constant 0 : i32
    %c0_i32_0 = arith.constant 0 : i32
    return %arg0, %c0_i32 : i32, i32
  }
  func.func @transform_1(%arg0: i32, %arg1: i32) -> (i32, i32) {
    %c0_i32 = arith.constant 0 : i32
    %c0_i32_0 = arith.constant 0 : i32
    %c0_i32_1 = arith.constant 0 : i32
    return %c0_i32, %c0_i32_0 : i32, i32
  }
  func.func @transform_2(%arg0: i32, %arg1: i32) -> (i32, i32) {
    %c0_i32 = arith.constant 0 : i32
    %c0_i32_0 = arith.constant 0 : i32
    %c0_i32_1 = arith.constant 0 : i32
    return %c0_i32, %c0_i32_0 : i32, i32
  }
  func.func @transform_3(%arg0: i32, %arg1: i32) -> (i32, i32) {
    %c0_i32 = arith.constant 0 : i32
    %c0_i32_0 = arith.constant 0 : i32
    return %c0_i32, %arg1 : i32, i32
  }
  func.func @transform_4(%arg0: i32, %arg1: i32) -> (i32, i32) {
    %c0_i32 = arith.constant 0 : i32
    %c0_i32_0 = arith.constant 0 : i32
    return %c0_i32, %arg1 : i32, i32
  }
  func.func @transform_5(%arg0: i32, %arg1: i32) -> (i32, i32) {
    %c0_i32 = arith.constant 0 : i32
    return %arg0, %arg1 : i32, i32
  }
}

module attributes {stable_mosaic.version = 11 : i64} {
  func.func @_attn_kernel(%arg0: i32, %arg1: i32, %arg2: memref<1x17x128xbf16, #tpu.memory_space<vmem>>, %arg3: memref<1x17x128xbf16, #tpu.memory_space<vmem>>, %arg4: memref<1x17x128xbf16, #tpu.memory_space<vmem>>, %arg5: memref<1x17x128xbf16, #tpu.memory_space<vmem>>) attributes {dimension_semantics = [#tpu.dimension_semantics<parallel>, #tpu.dimension_semantics<parallel>], iteration_bounds = array<i64: 2, 2>, scalar_prefetch = 0 : i64, scratch_operands = 0 : i64, tpu.core_type = #tpu.core_type<tc>, window_params = [{transform_indices = @transform_0, window_bounds = array<i64: 1, 17, 128>}, {transform_indices = @transform_1, window_bounds = array<i64: 1, 17, 128>}, {transform_indices = @transform_2, window_bounds = array<i64: 1, 17, 128>}, {transform_indices = @transform_3, window_bounds = array<i64: 1, 17, 128>}]} {
    %c0 = arith.constant 0 : index
    %c0_0 = arith.constant 0 : index
    %c0_1 = arith.constant 0 : index
    %0 = vector.load %arg2[%c0, %c0_0, %c0_1] : memref<1x17x128xbf16, #tpu.memory_space<vmem>>, vector<1x17x128xbf16>
    %1 = vector.shape_cast %0 : vector<1x17x128xbf16> to vector<17x128xbf16>
    %c0_2 = arith.constant 0 : index
    %c0_3 = arith.constant 0 : index
    %c0_4 = arith.constant 0 : index
    %2 = vector.load %arg3[%c0_2, %c0_3, %c0_4] : memref<1x17x128xbf16, #tpu.memory_space<vmem>>, vector<1x17x128xbf16>
    %3 = vector.shape_cast %2 : vector<1x17x128xbf16> to vector<17x128xbf16>
    %c0_5 = arith.constant 0 : index
    %c0_6 = arith.constant 0 : index
    %c0_7 = arith.constant 0 : index
    %4 = vector.load %arg4[%c0_5, %c0_6, %c0_7] : memref<1x17x128xbf16, #tpu.memory_space<vmem>>, vector<1x17x128xbf16>
    %5 = vector.shape_cast %4 : vector<1x17x128xbf16> to vector<17x128xbf16>
    %6 = vector.extract_strided_slice %1 {offsets = [0, 0], sizes = [17, 64], strides = [1, 1]} : vector<17x128xbf16> to vector<17x64xbf16>
    %7 = vector.extract_strided_slice %3 {offsets = [0, 0], sizes = [17, 64], strides = [1, 1]} : vector<17x128xbf16> to vector<17x64xbf16>
    %8 = vector.extract_strided_slice %5 {offsets = [0, 0], sizes = [17, 64], strides = [1, 1]} : vector<17x128xbf16> to vector<17x64xbf16>
    %cst = arith.constant dense<0.000000e+00> : vector<17x17xf32>
    %9 = tpu.matmul %6, %7, %cst {dimension_numbers = #tpu.dot_dimension_numbers<[1], [1], [0], [0], [0, 0, 1, 0], [], []>} : vector<17x64xbf16>, vector<17x64xbf16>, vector<17x17xf32> -> vector<17x17xf32>
    %cst_8 = arith.constant 1.250000e-01 : f32
    %10 = vector.broadcast %cst_8 : f32 to vector<17x17xf32>
    %11 = arith.mulf %9, %10 : vector<17x17xf32>
    %cst_9 = arith.constant dense<0xFF800000> : vector<17xf32>
    %12 = vector.multi_reduction <maximumf>, %11, %cst_9 [1] : vector<17x17xf32> to vector<17xf32>
    %13 = vector.shape_cast %12 : vector<17xf32> to vector<17x1xf32>
    %14 = vector.broadcast %13 : vector<17x1xf32> to vector<17x17xf32>
    %15 = arith.subf %11, %14 : vector<17x17xf32>
    %16 = math.exp %15 : vector<17x17xf32>
    %cst_10 = arith.constant dense<0.000000e+00> : vector<17xf32>
    %17 = vector.multi_reduction <add>, %16, %cst_10 [1] : vector<17x17xf32> to vector<17xf32>
    %18 = vector.shape_cast %17 : vector<17xf32> to vector<17x1xf32>
    %19 = vector.broadcast %18 : vector<17x1xf32> to vector<17x17xf32>
    %20 = arith.divf %16, %19 : vector<17x17xf32>
    %21 = arith.truncf %20 : vector<17x17xf32> to vector<17x17xbf16>
    %cst_11 = arith.constant dense<0.000000e+00> : vector<17x64xf32>
    %22 = tpu.matmul %21, %8, %cst_11 {dimension_numbers = #tpu.dot_dimension_numbers<[1], [0], [0], [1], [0, 0, 1, 1], [], []>} : vector<17x17xbf16>, vector<17x64xbf16>, vector<17x64xf32> -> vector<17x64xf32>
    %23 = vector.extract_strided_slice %1 {offsets = [0, 64], sizes = [17, 64], strides = [1, 1]} : vector<17x128xbf16> to vector<17x64xbf16>
    %24 = vector.extract_strided_slice %3 {offsets = [0, 64], sizes = [17, 64], strides = [1, 1]} : vector<17x128xbf16> to vector<17x64xbf16>
    %25 = vector.extract_strided_slice %5 {offsets = [0, 64], sizes = [17, 64], strides = [1, 1]} : vector<17x128xbf16> to vector<17x64xbf16>
    %cst_12 = arith.constant dense<0.000000e+00> : vector<17x17xf32>
    %26 = tpu.matmul %23, %24, %cst_12 {dimension_numbers = #tpu.dot_dimension_numbers<[1], [1], [0], [0], [0, 0, 1, 0], [], []>} : vector<17x64xbf16>, vector<17x64xbf16>, vector<17x17xf32> -> vector<17x17xf32>
    %cst_13 = arith.constant 1.250000e-01 : f32
    %27 = vector.broadcast %cst_13 : f32 to vector<17x17xf32>
    %28 = arith.mulf %26, %27 : vector<17x17xf32>
    %cst_14 = arith.constant dense<0xFF800000> : vector<17xf32>
    %29 = vector.multi_reduction <maximumf>, %28, %cst_14 [1] : vector<17x17xf32> to vector<17xf32>
    %30 = vector.shape_cast %29 : vector<17xf32> to vector<17x1xf32>
    %31 = vector.broadcast %30 : vector<17x1xf32> to vector<17x17xf32>
    %32 = arith.subf %28, %31 : vector<17x17xf32>
    %33 = math.exp %32 : vector<17x17xf32>
    %cst_15 = arith.constant dense<0.000000e+00> : vector<17xf32>
    %34 = vector.multi_reduction <add>, %33, %cst_15 [1] : vector<17x17xf32> to vector<17xf32>
    %35 = vector.shape_cast %34 : vector<17xf32> to vector<17x1xf32>
    %36 = vector.broadcast %35 : vector<17x1xf32> to vector<17x17xf32>
    %37 = arith.divf %33, %36 : vector<17x17xf32>
    %38 = arith.truncf %37 : vector<17x17xf32> to vector<17x17xbf16>
    %cst_16 = arith.constant dense<0.000000e+00> : vector<17x64xf32>
    %39 = tpu.matmul %38, %25, %cst_16 {dimension_numbers = #tpu.dot_dimension_numbers<[1], [0], [0], [1], [0, 0, 1, 1], [], []>} : vector<17x17xbf16>, vector<17x64xbf16>, vector<17x64xf32> -> vector<17x64xf32>
    %40 = tpu.concatenate %22, %39 in 1 : vector<17x64xf32>, vector<17x64xf32> -> vector<17x128xf32>
    %41 = arith.truncf %40 : vector<17x128xf32> to vector<17x128xbf16>
    %c0_17 = arith.constant 0 : index
    %c0_18 = arith.constant 0 : index
    %c0_19 = arith.constant 0 : index
    %42 = vector.load %arg5[%c0_17, %c0_18, %c0_19] : memref<1x17x128xbf16, #tpu.memory_space<vmem>>, vector<1x17x128xbf16>
    %43 = vector.shape_cast %42 : vector<1x17x128xbf16> to vector<17x128xbf16>
    %44 = vector.shape_cast %41 : vector<17x128xbf16> to vector<1x17x128xbf16>
    tpu.vector_store %arg5[%c0_17, %c0_18, %c0_19], %44 {strides = array<i32>} : memref<1x17x128xbf16, #tpu.memory_space<vmem>>, vector<1x17x128xbf16>,
    return
  }
  func.func @transform_0(%arg0: i32, %arg1: i32) -> (i32, i32, i32) {
    %c0_i32 = arith.constant 0 : i32
    %c0_i32_0 = arith.constant 0 : i32
    return %arg0, %c0_i32, %arg1 : i32, i32, i32
  }
  func.func @transform_1(%arg0: i32, %arg1: i32) -> (i32, i32, i32) {
    %c2_i32 = arith.constant 2 : i32
    %0 = arith.addi %arg1, %c2_i32 : i32
    %c0_i32 = arith.constant 0 : i32
    %c0_i32_0 = arith.constant 0 : i32
    return %arg0, %c0_i32, %0 : i32, i32, i32
  }
  func.func @transform_2(%arg0: i32, %arg1: i32) -> (i32, i32, i32) {
    %c4_i32 = arith.constant 4 : i32
    %0 = arith.addi %arg1, %c4_i32 : i32
    %c0_i32 = arith.constant 0 : i32
    %c0_i32_0 = arith.constant 0 : i32
    return %arg0, %c0_i32, %0 : i32, i32, i32
  }
  func.func @transform_3(%arg0: i32, %arg1: i32) -> (i32, i32, i32) {
    %c0_i32 = arith.constant 0 : i32
    %c0_i32_0 = arith.constant 0 : i32
    return %arg0, %c0_i32, %arg1 : i32, i32, i32
  }
}

module attributes {stable_mosaic.version = 11 : i64} {
  func.func @_mm_bias_res_kernel(%arg0: i32, %arg1: i32, %arg2: memref<34x256xbf16, #tpu.memory_space<vmem>>, %arg3: memref<256x256xbf16, #tpu.memory_space<vmem>>, %arg4: memref<1x256xf32, #tpu.memory_space<vmem>>, %arg5: memref<34x256xbf16, #tpu.memory_space<vmem>>, %arg6: memref<34x256xbf16, #tpu.memory_space<vmem>>) attributes {dimension_semantics = [#tpu.dimension_semantics<parallel>, #tpu.dimension_semantics<parallel>], iteration_bounds = array<i64: 1, 1>, scalar_prefetch = 0 : i64, scratch_operands = 0 : i64, tpu.core_type = #tpu.core_type<tc>, window_params = [{transform_indices = @transform_0, window_bounds = array<i64: 34, 256>}, {transform_indices = @transform_1, window_bounds = array<i64: 256, 256>}, {transform_indices = @transform_2, window_bounds = array<i64: 1, 256>}, {transform_indices = @transform_3, window_bounds = array<i64: 34, 256>}, {transform_indices = @transform_4, window_bounds = array<i64: 34, 256>}]} {
    %c0 = arith.constant 0 : index
    %c0_0 = arith.constant 0 : index
    %0 = vector.load %arg2[%c0, %c0_0] : memref<34x256xbf16, #tpu.memory_space<vmem>>, vector<34x256xbf16>
    %c0_1 = arith.constant 0 : index
    %c0_2 = arith.constant 0 : index
    %1 = vector.load %arg3[%c0_1, %c0_2] : memref<256x256xbf16, #tpu.memory_space<vmem>>, vector<256x256xbf16>
    %cst = arith.constant dense<0.000000e+00> : vector<34x256xf32>
    %2 = tpu.matmul %0, %1, %cst {dimension_numbers = #tpu.dot_dimension_numbers<[1], [0], [0], [1], [0, 0, 1, 1], [], []>} : vector<34x256xbf16>, vector<256x256xbf16>, vector<34x256xf32> -> vector<34x256xf32>
    %c0_3 = arith.constant 0 : index
    %c0_4 = arith.constant 0 : index
    %3 = vector.load %arg4[%c0_3, %c0_4] : memref<1x256xf32, #tpu.memory_space<vmem>>, vector<1x256xf32>
    %4 = vector.broadcast %3 : vector<1x256xf32> to vector<34x256xf32>
    %5 = arith.addf %2, %4 : vector<34x256xf32>
    %c0_5 = arith.constant 0 : index
    %c0_6 = arith.constant 0 : index
    %6 = vector.load %arg5[%c0_5, %c0_6] : memref<34x256xbf16, #tpu.memory_space<vmem>>, vector<34x256xbf16>
    %7 = arith.extf %6 : vector<34x256xbf16> to vector<34x256xf32>
    %8 = arith.addf %5, %7 : vector<34x256xf32>
    %9 = arith.truncf %8 : vector<34x256xf32> to vector<34x256xbf16>
    %c0_7 = arith.constant 0 : index
    %c0_8 = arith.constant 0 : index
    %10 = vector.load %arg6[%c0_7, %c0_8] : memref<34x256xbf16, #tpu.memory_space<vmem>>, vector<34x256xbf16>
    tpu.vector_store %arg6[%c0_7, %c0_8], %9 {strides = array<i32>} : memref<34x256xbf16, #tpu.memory_space<vmem>>, vector<34x256xbf16>,
    return
  }
  func.func @transform_0(%arg0: i32, %arg1: i32) -> (i32, i32) {
    %c0_i32 = arith.constant 0 : i32
    %c0_i32_0 = arith.constant 0 : i32
    return %arg0, %c0_i32 : i32, i32
  }
  func.func @transform_1(%arg0: i32, %arg1: i32) -> (i32, i32) {
    %c0_i32 = arith.constant 0 : i32
    %c0_i32_0 = arith.constant 0 : i32
    return %c0_i32, %arg1 : i32, i32
  }
  func.func @transform_2(%arg0: i32, %arg1: i32) -> (i32, i32) {
    %c0_i32 = arith.constant 0 : i32
    %c0_i32_0 = arith.constant 0 : i32
    return %c0_i32, %arg1 : i32, i32
  }
  func.func @transform_3(%arg0: i32, %arg1: i32) -> (i32, i32) {
    %c0_i32 = arith.constant 0 : i32
    return %arg0, %arg1 : i32, i32
  }
  func.func @transform_4(%arg0: i32, %arg1: i32) -> (i32, i32) {
    %c0_i32 = arith.constant 0 : i32
    return %arg0, %arg1 : i32, i32
  }
}

module attributes {stable_mosaic.version = 11 : i64} {
  func.func @_mlp_kernel(%arg0: i32, %arg1: i32, %arg2: memref<34x256xbf16, #tpu.memory_space<vmem>>, %arg3: memref<1x256xf32, #tpu.memory_space<vmem>>, %arg4: memref<1x256xf32, #tpu.memory_space<vmem>>, %arg5: memref<256x512xbf16, #tpu.memory_space<vmem>>, %arg6: memref<1x512xf32, #tpu.memory_space<vmem>>, %arg7: memref<512x256xbf16, #tpu.memory_space<vmem>>, %arg8: memref<1x256xf32, #tpu.memory_space<vmem>>, %arg9: memref<34x256xbf16, #tpu.memory_space<vmem>>, %arg10: memref<34x256xf32, #tpu.memory_space<vmem>>) attributes {dimension_semantics = [#tpu.dimension_semantics<parallel>, #tpu.dimension_semantics<arbitrary>], iteration_bounds = array<i64: 1, 2>, scalar_prefetch = 0 : i64, scratch_operands = 1 : i64, tpu.core_type = #tpu.core_type<tc>, window_params = [{transform_indices = @transform_0, window_bounds = array<i64: 34, 256>}, {pipeline_mode = #tpu.pipeline_mode<synchronous>, transform_indices = @transform_1, window_bounds = array<i64: 1, 256>}, {pipeline_mode = #tpu.pipeline_mode<synchronous>, transform_indices = @transform_2, window_bounds = array<i64: 1, 256>}, {transform_indices = @transform_3, window_bounds = array<i64: 256, 512>}, {transform_indices = @transform_4, window_bounds = array<i64: 1, 512>}, {transform_indices = @transform_5, window_bounds = array<i64: 512, 256>}, {pipeline_mode = #tpu.pipeline_mode<synchronous>, transform_indices = @transform_6, window_bounds = array<i64: 1, 256>}, {transform_indices = @transform_7, window_bounds = array<i64: 34, 256>}]} {
    %c0_i32 = arith.constant 0 : i32
    %0 = arith.cmpi eq, %arg1, %c0_i32 : i32
    %1 = arith.extui %0 : i1 to i32
    %c0_i32_0 = arith.constant 0 : i32
    %2 = arith.cmpi ne, %1, %c0_i32_0 : i32
    scf.if %2 {
      %cst_27 = arith.constant 0.000000e+00 : f32
      %55 = vector.broadcast %cst_27 : f32 to vector<34x256xf32>
      %c0_28 = arith.constant 0 : index
      %c0_29 = arith.constant 0 : index
      %56 = vector.load %arg10[%c0_28, %c0_29] : memref<34x256xf32, #tpu.memory_space<vmem>>, vector<34x256xf32>
      tpu.vector_store %arg10[%c0_28, %c0_29], %55 {strides = array<i32>} : memref<34x256xf32, #tpu.memory_space<vmem>>, vector<34x256xf32>,
    } else {
    }
    %c0 = arith.constant 0 : index
    %c0_1 = arith.constant 0 : index
    %3 = vector.load %arg2[%c0, %c0_1] : memref<34x256xbf16, #tpu.memory_space<vmem>>, vector<34x256xbf16>
    %4 = arith.extf %3 : vector<34x256xbf16> to vector<34x256xf32>
    %cst = arith.constant dense<0.000000e+00> : vector<34xf32>
    %5 = vector.multi_reduction <add>, %4, %cst [1] : vector<34x256xf32> to vector<34xf32>
    %6 = vector.shape_cast %5 : vector<34xf32> to vector<34x1xf32>
    %cst_2 = arith.constant 2.560000e+02 : f32
    %7 = vector.broadcast %cst_2 : f32 to vector<34x1xf32>
    %8 = arith.divf %6, %7 : vector<34x1xf32>
    %9 = vector.broadcast %8 : vector<34x1xf32> to vector<34x256xf32>
    %10 = arith.subf %4, %9 : vector<34x256xf32>
    %11 = arith.mulf %10, %10 : vector<34x256xf32>
    %cst_3 = arith.constant dense<0.000000e+00> : vector<34xf32>
    %12 = vector.multi_reduction <add>, %11, %cst_3 [1] : vector<34x256xf32> to vector<34xf32>
    %13 = vector.shape_cast %12 : vector<34xf32> to vector<34x1xf32>
    %cst_4 = arith.constant 2.560000e+02 : f32
    %14 = vector.broadcast %cst_4 : f32 to vector<34x1xf32>
    %15 = arith.divf %13, %14 : vector<34x1xf32>
    %cst_5 = arith.constant 9.99999997E-7 : f32
    %16 = vector.broadcast %cst_5 : f32 to vector<34x1xf32>
    %17 = arith.addf %15, %16 : vector<34x1xf32>
    %18 = math.rsqrt %17 : vector<34x1xf32>
    %19 = vector.broadcast %18 : vector<34x1xf32> to vector<34x256xf32>
    %20 = arith.mulf %10, %19 : vector<34x256xf32>
    %c0_6 = arith.constant 0 : index
    %c0_7 = arith.constant 0 : index
    %21 = vector.load %arg3[%c0_6, %c0_7] : memref<1x256xf32, #tpu.memory_space<vmem>>, vector<1x256xf32>
    %22 = vector.broadcast %21 : vector<1x256xf32> to vector<34x256xf32>
    %23 = arith.mulf %20, %22 : vector<34x256xf32>
    %c0_8 = arith.constant 0 : index
    %c0_9 = arith.constant 0 : index
    %24 = vector.load %arg4[%c0_8, %c0_9] : memref<1x256xf32, #tpu.memory_space<vmem>>, vector<1x256xf32>
    %25 = vector.broadcast %24 : vector<1x256xf32> to vector<34x256xf32>
    %26 = arith.addf %23, %25 : vector<34x256xf32>
    %27 = arith.truncf %26 : vector<34x256xf32> to vector<34x256xbf16>
    %c0_10 = arith.constant 0 : index
    %c0_11 = arith.constant 0 : index
    %28 = vector.load %arg5[%c0_10, %c0_11] : memref<256x512xbf16, #tpu.memory_space<vmem>>, vector<256x512xbf16>
    %cst_12 = arith.constant dense<0.000000e+00> : vector<34x512xf32>
    %29 = tpu.matmul %27, %28, %cst_12 {dimension_numbers = #tpu.dot_dimension_numbers<[1], [0], [0], [1], [0, 0, 1, 1], [], []>} : vector<34x256xbf16>, vector<256x512xbf16>, vector<34x512xf32> -> vector<34x512xf32>
    %c0_13 = arith.constant 0 : index
    %c0_14 = arith.constant 0 : index
    %30 = vector.load %arg6[%c0_13, %c0_14] : memref<1x512xf32, #tpu.memory_space<vmem>>, vector<1x512xf32>
    %31 = vector.broadcast %30 : vector<1x512xf32> to vector<34x512xf32>
    %32 = arith.addf %29, %31 : vector<34x512xf32>
    %cst_15 = arith.constant 5.000000e-01 : f32
    %33 = vector.broadcast %cst_15 : f32 to vector<34x512xf32>
    %34 = arith.mulf %33, %32 : vector<34x512xf32>
    %cst_16 = arith.constant 4.471500e-02 : f32
    %35 = vector.broadcast %cst_16 : f32 to vector<34x512xf32>
    %36 = arith.mulf %35, %32 : vector<34x512xf32>
    %37 = arith.mulf %36, %32 : vector<34x512xf32>
    %38 = arith.mulf %37, %32 : vector<34x512xf32>
    %39 = arith.addf %32, %38 : vector<34x512xf32>
    %cst_17 = arith.constant 0.797884583 : f32
    %40 = vector.broadcast %cst_17 : f32 to vector<34x512xf32>
    %41 = arith.mulf %40, %39 : vector<34x512xf32>
    %42 = math.tanh %41 : vector<34x512xf32>
    %cst_18 = arith.constant 1.000000e+00 : f32
    %43 = vector.broadcast %cst_18 : f32 to vector<34x512xf32>
    %44 = arith.addf %43, %42 : vector<34x512xf32>
    %45 = arith.mulf %34, %44 : vector<34x512xf32>
    %46 = arith.truncf %45 : vector<34x512xf32> to vector<34x512xbf16>
    %c0_19 = arith.constant 0 : index
    %c0_20 = arith.constant 0 : index
    %47 = vector.load %arg10[%c0_19, %c0_20] : memref<34x256xf32, #tpu.memory_space<vmem>>, vector<34x256xf32>
    %c0_21 = arith.constant 0 : index
    %c0_22 = arith.constant 0 : index
    %48 = vector.load %arg7[%c0_21, %c0_22] : memref<512x256xbf16, #tpu.memory_space<vmem>>, vector<512x256xbf16>
    %cst_23 = arith.constant dense<0.000000e+00> : vector<34x256xf32>
    %49 = tpu.matmul %46, %48, %cst_23 {dimension_numbers = #tpu.dot_dimension_numbers<[1], [0], [0], [1], [0, 0, 1, 1], [], []>} : vector<34x512xbf16>, vector<512x256xbf16>, vector<34x256xf32> -> vector<34x256xf32>
    %50 = arith.addf %47, %49 : vector<34x256xf32>
    %c0_24 = arith.constant 0 : index
    %c0_25 = arith.constant 0 : index
    %51 = vector.load %arg10[%c0_24, %c0_25] : memref<34x256xf32, #tpu.memory_space<vmem>>, vector<34x256xf32>
    tpu.vector_store %arg10[%c0_24, %c0_25], %50 {strides = array<i32>} : memref<34x256xf32, #tpu.memory_space<vmem>>, vector<34x256xf32>,
    %c1_i32 = arith.constant 1 : i32
    %52 = arith.cmpi eq, %arg1, %c1_i32 : i32
    %53 = arith.extui %52 : i1 to i32
    %c0_i32_26 = arith.constant 0 : i32
    %54 = arith.cmpi ne, %53, %c0_i32_26 : i32
    scf.if %54 {
      %c0_27 = arith.constant 0 : index
      %c0_28 = arith.constant 0 : index
      %55 = vector.load %arg10[%c0_27, %c0_28] : memref<34x256xf32, #tpu.memory_space<vmem>>, vector<34x256xf32>
      %c0_29 = arith.constant 0 : index
      %c0_30 = arith.constant 0 : index
      %56 = vector.load %arg8[%c0_29, %c0_30] : memref<1x256xf32, #tpu.memory_space<vmem>>, vector<1x256xf32>
      %57 = vector.broadcast %56 : vector<1x256xf32> to vector<34x256xf32>
      %58 = arith.addf %55, %57 : vector<34x256xf32>
      %c0_31 = arith.constant 0 : index
      %c0_32 = arith.constant 0 : index
      %59 = vector.load %arg2[%c0_31, %c0_32] : memref<34x256xbf16, #tpu.memory_space<vmem>>, vector<34x256xbf16>
      %60 = arith.extf %59 : vector<34x256xbf16> to vector<34x256xf32>
      %61 = arith.addf %58, %60 : vector<34x256xf32>
      %62 = arith.truncf %61 : vector<34x256xf32> to vector<34x256xbf16>
      %c0_33 = arith.constant 0 : index
      %c0_34 = arith.constant 0 : index
      %63 = vector.load %arg9[%c0_33, %c0_34] : memref<34x256xbf16, #tpu.memory_space<vmem>>, vector<34x256xbf16>
      tpu.vector_store %arg9[%c0_33, %c0_34], %62 {strides = array<i32>} : memref<34x256xbf16, #tpu.memory_space<vmem>>, vector<34x256xbf16>,
    } else {
    }
    return
  }
  func.func @transform_0(%arg0: i32, %arg1: i32) -> (i32, i32) {
    %c0_i32 = arith.constant 0 : i32
    %c0_i32_0 = arith.constant 0 : i32
    return %arg0, %c0_i32 : i32, i32
  }
  func.func @transform_1(%arg0: i32, %arg1: i32) -> (i32, i32) {
    %c0_i32 = arith.constant 0 : i32
    %c0_i32_0 = arith.constant 0 : i32
    %c0_i32_1 = arith.constant 0 : i32
    return %c0_i32, %c0_i32_0 : i32, i32
  }
  func.func @transform_2(%arg0: i32, %arg1: i32) -> (i32, i32) {
    %c0_i32 = arith.constant 0 : i32
    %c0_i32_0 = arith.constant 0 : i32
    %c0_i32_1 = arith.constant 0 : i32
    return %c0_i32, %c0_i32_0 : i32, i32
  }
  func.func @transform_3(%arg0: i32, %arg1: i32) -> (i32, i32) {
    %c0_i32 = arith.constant 0 : i32
    %c0_i32_0 = arith.constant 0 : i32
    return %c0_i32, %arg1 : i32, i32
  }
  func.func @transform_4(%arg0: i32, %arg1: i32) -> (i32, i32) {
    %c0_i32 = arith.constant 0 : i32
    %c0_i32_0 = arith.constant 0 : i32
    return %c0_i32, %arg1 : i32, i32
  }
  func.func @transform_5(%arg0: i32, %arg1: i32) -> (i32, i32) {
    %c0_i32 = arith.constant 0 : i32
    %c0_i32_0 = arith.constant 0 : i32
    return %arg1, %c0_i32 : i32, i32
  }
  func.func @transform_6(%arg0: i32, %arg1: i32) -> (i32, i32) {
    %c0_i32 = arith.constant 0 : i32
    %c0_i32_0 = arith.constant 0 : i32
    %c0_i32_1 = arith.constant 0 : i32
    return %c0_i32, %c0_i32_0 : i32, i32
  }
  func.func @transform_7(%arg0: i32, %arg1: i32) -> (i32, i32) {
    %c0_i32 = arith.constant 0 : i32
    %c0_i32_0 = arith.constant 0 : i32
    return %arg0, %c0_i32 : i32, i32
  }
}

module attributes {stable_mosaic.version = 11 : i64} {
  func.func @_layernorm_kernel(%arg0: i32, %arg1: memref<34x256xbf16, #tpu.memory_space<vmem>>, %arg2: memref<1x256xf32, #tpu.memory_space<vmem>>, %arg3: memref<1x256xf32, #tpu.memory_space<vmem>>, %arg4: memref<34x256xf32, #tpu.memory_space<vmem>>) attributes {dimension_semantics = [#tpu.dimension_semantics<parallel>], iteration_bounds = array<i64: 1>, scalar_prefetch = 0 : i64, scratch_operands = 0 : i64, tpu.core_type = #tpu.core_type<tc>, window_params = [{transform_indices = @transform_0, window_bounds = array<i64: 34, 256>}, {pipeline_mode = #tpu.pipeline_mode<synchronous>, transform_indices = @transform_1, window_bounds = array<i64: 1, 256>}, {pipeline_mode = #tpu.pipeline_mode<synchronous>, transform_indices = @transform_2, window_bounds = array<i64: 1, 256>}, {transform_indices = @transform_3, window_bounds = array<i64: 34, 256>}]} {
    %c0 = arith.constant 0 : index
    %c0_0 = arith.constant 0 : index
    %0 = vector.load %arg1[%c0, %c0_0] : memref<34x256xbf16, #tpu.memory_space<vmem>>, vector<34x256xbf16>
    %1 = arith.extf %0 : vector<34x256xbf16> to vector<34x256xf32>
    %cst = arith.constant dense<0.000000e+00> : vector<34xf32>
    %2 = vector.multi_reduction <add>, %1, %cst [1] : vector<34x256xf32> to vector<34xf32>
    %3 = vector.shape_cast %2 : vector<34xf32> to vector<34x1xf32>
    %cst_1 = arith.constant 2.560000e+02 : f32
    %4 = vector.broadcast %cst_1 : f32 to vector<34x1xf32>
    %5 = arith.divf %3, %4 : vector<34x1xf32>
    %6 = vector.broadcast %5 : vector<34x1xf32> to vector<34x256xf32>
    %7 = arith.subf %1, %6 : vector<34x256xf32>
    %8 = arith.mulf %7, %7 : vector<34x256xf32>
    %cst_2 = arith.constant dense<0.000000e+00> : vector<34xf32>
    %9 = vector.multi_reduction <add>, %8, %cst_2 [1] : vector<34x256xf32> to vector<34xf32>
    %10 = vector.shape_cast %9 : vector<34xf32> to vector<34x1xf32>
    %cst_3 = arith.constant 2.560000e+02 : f32
    %11 = vector.broadcast %cst_3 : f32 to vector<34x1xf32>
    %12 = arith.divf %10, %11 : vector<34x1xf32>
    %cst_4 = arith.constant 9.99999997E-7 : f32
    %13 = vector.broadcast %cst_4 : f32 to vector<34x1xf32>
    %14 = arith.addf %12, %13 : vector<34x1xf32>
    %15 = math.rsqrt %14 : vector<34x1xf32>
    %16 = vector.broadcast %15 : vector<34x1xf32> to vector<34x256xf32>
    %17 = arith.mulf %7, %16 : vector<34x256xf32>
    %c0_5 = arith.constant 0 : index
    %c0_6 = arith.constant 0 : index
    %18 = vector.load %arg2[%c0_5, %c0_6] : memref<1x256xf32, #tpu.memory_space<vmem>>, vector<1x256xf32>
    %19 = vector.broadcast %18 : vector<1x256xf32> to vector<34x256xf32>
    %20 = arith.mulf %17, %19 : vector<34x256xf32>
    %c0_7 = arith.constant 0 : index
    %c0_8 = arith.constant 0 : index
    %21 = vector.load %arg3[%c0_7, %c0_8] : memref<1x256xf32, #tpu.memory_space<vmem>>, vector<1x256xf32>
    %22 = vector.broadcast %21 : vector<1x256xf32> to vector<34x256xf32>
    %23 = arith.addf %20, %22 : vector<34x256xf32>
    %c0_9 = arith.constant 0 : index
    %c0_10 = arith.constant 0 : index
    %24 = vector.load %arg4[%c0_9, %c0_10] : memref<34x256xf32, #tpu.memory_space<vmem>>, vector<34x256xf32>
    tpu.vector_store %arg4[%c0_9, %c0_10], %23 {strides = array<i32>} : memref<34x256xf32, #tpu.memory_space<vmem>>, vector<34x256xf32>,
    return
  }
  func.func @transform_0(%arg0: i32) -> (i32, i32) {
    %c0_i32 = arith.constant 0 : i32
    %c0_i32_0 = arith.constant 0 : i32
    return %arg0, %c0_i32 : i32, i32
  }
  func.func @transform_1(%arg0: i32) -> (i32, i32) {
    %c0_i32 = arith.constant 0 : i32
    %c0_i32_0 = arith.constant 0 : i32
    %c0_i32_1 = arith.constant 0 : i32
    return %c0_i32, %c0_i32_0 : i32, i32
  }
  func.func @transform_2(%arg0: i32) -> (i32, i32) {
    %c0_i32 = arith.constant 0 : i32
    %c0_i32_0 = arith.constant 0 : i32
    %c0_i32_1 = arith.constant 0 : i32
    return %c0_i32, %c0_i32_0 : i32, i32
  }
  func.func @transform_3(%arg0: i32) -> (i32, i32) {
    %c0_i32 = arith.constant 0 : i32
    %c0_i32_0 = arith.constant 0 : i32
    return %arg0, %c0_i32 : i32, i32
  }
}

</mosaic_0001>

<bundles_post_ra>
// kernel: vit_block_forward.11
= control target key start
LH: loop header
LB: loop body
LE: loop exit
PB: predicated region body
PF: predicated region fallthrough
CT: control target
= control target key end

     0   :  { %s1000_s12 = smov 0   ;;  %s1080_s0 = inlined_call_operand.vmem [shape: bf16[2,4,16,16], index: 0, kind: input, shape index: {}]   ;;  %s1081_s1 = inlined_call_operand.vmem [shape: bf16[32,16], index: 1, kind: input, shape index: {}]   ;;  %s1082_s2 = inlined_call_operand.vmem [shape: bf16[16,32], index: 2, kind: input, shape index: {}]   ;;  %s1083_s3 = inlined_call_operand.vmem [shape: bf16[2,4,32,32], index: 3, kind: output, shape index: {}]  }
   0x1 LB: > { %s799_s13 = sadd.s32 4294967295, %s978_s12   ;;  %p803_p0 = scmp.ge.s32.totalorder %s978_s12, 1  ;;  %s978_s12 = sphi %s1000_s12, %s13_s12  }
   0x2   : > { %p137_p1 = scmp.lt.s32.totalorder %s978_s12, 3 }
   0x4   : > { %p138_p2 = pnand %p803_p0, %p137_p1 }
   0x5   : > { %p161_p3 = scmp.lt.s32.totalorder (!%p138_p2), %s799_s13, 1  ;;  %v966_v0 = vld [vmem:[%s1081_s1] sm:$0xff] (!%p138_p2)   ;;  %vm196_vm0 = vcmask (!%p138_p2), 130048   ;;  %v967_v3 = vld [vmem:[%s1081_s1 + $0x8] sm:$0xff] (!%p138_p2)   ;;  %vm331_vm1 = vcmask (!%p138_p2), 257024  }
   0x6   : > { %141 = sbr.rel (%p138_p2) target bundleno = 481 (0x1e1), region = 32  ;;  %911 = vmatprep.mubr.msk.bf16.mxu0 (!%p138_p2), %vm196_vm0, %v966_v0  ;;  %v971_v6 = vld [vmem:[%s1082_s2] sm:$0xff] (!%p138_p2)  }
   0x7   : > { %915 = vmatprep.subr.bf16.mxu1 (!%p138_p2), %v971_v6 }
   0x8   : > { %916 = vmatpush3.bf16.msra.mxu1 (!%p138_p2), %v971_v6 }
   0x9   : > { %927 = vmatprep.subr.bf16.mxu1 (!%p138_p2), %v971_v6 }
   0xd   : > { %s1085_s13 = smov (!%p161_p3, %s799_s13), 1 }
   0xe   : > { %s867_s16 = sshll.u32 %s1085_s13, 5  ;;  %s868_s24 = sshll.u32 %s1085_s13, 6 }
   0xf   : > { %s165_s19 = scalar_lea.vmem %s1080_s0, %s867_s16  ;;  %s1043_s27 = scalar_lea.vmem %s1083_s3, %s868_s24 }
  0x10   : > { %v965_v1 = vld [vmem:[%s165_s19] sm:$0xff]   ;;  %v968_v2 = vld [vmem:[%s165_s19 + $0x8] sm:$0xff]   ;;  %v969_v4 = vld [vmem:[%s165_s19 + $0x10] sm:$0xff]  }
  0x11   : > { %909 = vmatprep.subr.bf16.mxu0 %v965_v1  ;;  %v970_v5 = vld [vmem:[%s165_s19 + $0x18] sm:$0xff]  }
  0x12   : > { %910 = vmatpush3.bf16.msra.mxu0 %v965_v1 }
  0x13   : > { %921 = vmatprep.subr.bf16.mxu0 %v968_v2 }
  0x15   : > { %912 = vmatmul.mubr.msk.bf16.vlgmr.msra.gmra.mrb[0].mxu0 %vm196_vm0, %v967_v3 }
  0x16   : > { %922 = vmatpush3.bf16.msra.mxu0 %v968_v2  ;;  %923 = vmatprep.mubr.msk.bf16.mxu0 %vm196_vm0, %v966_v0 }
  0x17   : > { %933 = vmatprep.subr.bf16.mxu0 %v969_v4 }
  0x1d   : > { %924 = vmatmul.mubr.msk.bf16.vlgmr.msra.gmra.mrb[4].mxu0 %vm196_vm0, %v967_v3 }
  0x1e   : > { %934 = vmatpush3.bf16.msra.mxu0 %v969_v4  ;;  %935 = vmatprep.mubr.msk.bf16.mxu0 %vm196_vm0, %v966_v0 }
  0x1f   : > { %945 = vmatprep.subr.bf16.mxu0 %v970_v5 }
  0x25   : > { %936 = vmatmul.mubr.msk.bf16.vlgmr.msra.gmra.mrb[8].mxu0 %vm196_vm0, %v967_v3 }
  0x26   : > { %946 = vmatpush3.bf16.msra.mxu0 %v970_v5  ;;  %947 = vmatprep.mubr.msk.bf16.mxu0 %vm196_vm0, %v966_v0 }
  0x2d   : > { %948 = vmatmul.mubr.msk.bf16.vlgmr.msra.gmra.mrb[12].mxu0 %vm196_vm0, %v967_v3 }
  0xe8   : > { %v913_v7 = vpop.f32.mrb[0].mxu0 }
  0xe9   : > { %v237_v8 = vpop.f32.mrb[1].mxu0 }
  0xea   : > { %v914_v9 = vpop.f32.mrb[2].mxu0 }
  0xeb   : > { %v253_v10 = vpack.c.bf16 %v914_v9, %v913_v7  ;;  %v240_v11 = vpop.f32.mrb[3].mxu0 }
  0xec   : > { %v252_v12 = vpack.c.bf16 %v240_v11, %v237_v8 }
  0xee   : > { %917 = vmatprep.mubr.msk.bf16.mxu1 %vm196_vm0, %v252_v12 }
  0xef   : > { %918 = vmatmul.mubr.msk.bf16.vlgmr.msra.gmra.mrb[0].mxu1 %vm196_vm0, %v253_v10 }
  0xf0   : > { %v925_v13 = vpop.f32.mrb[4].mxu0  ;;  %928 = vmatpush3.bf16.msra.mxu1 %v971_v6 }
  0xf1   : > { %v379_v14 = vpop.f32.mrb[5].mxu0  ;;  %939 = vmatprep.subr.bf16.mxu1 %v971_v6 }
  0xf2   : > { %v926_v15 = vpop.f32.mrb[6].mxu0 }
  0xf3   : > { %v395_v16 = vpack.c.bf16 %v926_v15, %v925_v13  ;;  %v382_v17 = vpop.f32.mrb[7].mxu0 }
  0xf4   : > { %v394_v18 = vpack.c.bf16 %v382_v17, %v379_v14 }
  0xf6   : > { %929 = vmatprep.mubr.msk.bf16.mxu1 %vm196_vm0, %v394_v18 }
  0xf7   : > { %930 = vmatmul.mubr.msk.bf16.vlgmr.msra.gmra.mrb[4].mxu1 %vm196_vm0, %v395_v16 }
  0xf8   : > { %v937_v19 = vpop.f32.mrb[8].mxu0  ;;  %940 = vmatpush3.bf16.msra.mxu1 %v971_v6 }
  0xf9   : > { %v515_v20 = vpop.f32.mrb[9].mxu0  ;;  %951 = vmatprep.subr.bf16.mxu1 %v971_v6 }
  0xfa   : > { %v938_v21 = vpop.f32.mrb[10].mxu0 }
  0xfb   : > { %v531_v22 = vpack.c.bf16 %v938_v21, %v937_v19  ;;  %v518_v23 = vpop.f32.mrb[11].mxu0 }
  0xfc   : > { %v530_v24 = vpack.c.bf16 %v518_v23, %v515_v20 }
  0xfe   : > { %941 = vmatprep.mubr.msk.bf16.mxu1 %vm196_vm0, %v530_v24 }
  0xff   : > { %942 = vmatmul.mubr.msk.bf16.vlgmr.msra.gmra.mrb[8].mxu1 %vm196_vm0, %v531_v22 }
 0x100   : > { %v949_v25 = vpop.f32.mrb[12].mxu0  ;;  %952 = vmatpush3.bf16.msra.mxu1 %v971_v6 }
 0x101   : > { %v651_v26 = vpop.f32.mrb[13].mxu0 }
 0x102   : > { %v950_v27 = vpop.f32.mrb[14].mxu0 }
 0x103   : > { %v667_v28 = vpack.c.bf16 %v950_v27, %v949_v25  ;;  %v654_v29 = vpop.f32.mrb[15].mxu0 }
 0x104   : > { %v666_v30 = vpack.c.bf16 %v654_v29, %v651_v26 }
 0x106   : > { %953 = vmatprep.mubr.msk.bf16.mxu1 %vm196_vm0, %v666_v30 }
 0x107   : > { %954 = vmatmul.mubr.msk.bf16.vlgmr.msra.gmra.mrb[12].mxu1 %vm196_vm0, %v667_v28 }
 0x1c2   : > { %v919_v31 = vpop.f32.mrb[0].mxu1 }
 0x1c3   : > { %v871_v32 = vpack.c.bf16 %v919_v31, %v919_v31  ;;  %v300_v33 = vpop.f32.mrb[1].mxu1 }
 0x1c4   : > { %v869_v34 = vpack.c.bf16 %v300_v33, %v300_v33  ;;  %v920_v35 = vpop.f32.mrb[2].mxu1 }
 0x1c5   : > { %334 = vst.msk [vmem:[%s1043_s27 + $0x8] sm:$0xf] %vm331_vm1, %v871_v32  ;;  %v872_v36 = vpack.c.bf16 %v920_v35, %v920_v35  ;;  %v303_v37 = vpop.f32.mrb[3].mxu1 }
 0x1c6   : > { %332 = vst.msk [vmem:[%s1043_s27] sm:$0xf] %vm331_vm1, %v869_v34  ;;  %v870_v38 = vpack.c.bf16 %v303_v37, %v303_v37 }
 0x1c7   : > { %335 = vst.msk [vmem:[%s1043_s27 + $0xc] sm:$0xf] %vm331_vm1, %v872_v36 }
 0x1c8   : > { %333 = vst.msk [vmem:[%s1043_s27 + $0x4] sm:$0xf] %vm331_vm1, %v870_v38 }
 0x1ca   : > { %v931_v39 = vpop.f32.mrb[4].mxu1 }
 0x1cb   : > { %v875_v40 = vpack.c.bf16 %v931_v39, %v931_v39  ;;  %v436_v41 = vpop.f32.mrb[5].mxu1 }
 0x1cc   : > { %v873_v42 = vpack.c.bf16 %v436_v41, %v436_v41  ;;  %v932_v43 = vpop.f32.mrb[6].mxu1 }
 0x1cd   : > { %833 = vst.msk [vmem:[%s1043_s27 + $0x18] sm:$0xf] %vm331_vm1, %v875_v40  ;;  %v876_v44 = vpack.c.bf16 %v932_v43, %v932_v43  ;;  %v439_v45 = vpop.f32.mrb[7].mxu1 }
 0x1ce   : > { %831 = vst.msk [vmem:[%s1043_s27 + $0x10] sm:$0xf] %vm331_vm1, %v873_v42  ;;  %v874_v46 = vpack.c.bf16 %v439_v45, %v439_v45 }
 0x1cf   : > { %834 = vst.msk [vmem:[%s1043_s27 + $0x1c] sm:$0xf] %vm331_vm1, %v876_v44 }
 0x1d0   : > { %832 = vst.msk [vmem:[%s1043_s27 + $0x14] sm:$0xf] %vm331_vm1, %v874_v46 }
 0x1d2   : > { %v943_v47 = vpop.f32.mrb[8].mxu1 }
 0x1d3   : > { %v879_v48 = vpack.c.bf16 %v943_v47, %v943_v47  ;;  %v572_v49 = vpop.f32.mrb[9].mxu1 }
 0x1d4   : > { %v877_v50 = vpack.c.bf16 %v572_v49, %v572_v49  ;;  %v944_v51 = vpop.f32.mrb[10].mxu1 }
 0x1d5   : > { %848 = vst.msk [vmem:[%s1043_s27 + $0x28] sm:$0xf] %vm331_vm1, %v879_v48  ;;  %v880_v52 = vpack.c.bf16 %v944_v51, %v944_v51  ;;  %v575_v53 = vpop.f32.mrb[11].mxu1 }
 0x1d6   : > { %846 = vst.msk [vmem:[%s1043_s27 + $0x20] sm:$0xf] %vm331_vm1, %v877_v50  ;;  %v878_v54 = vpack.c.bf16 %v575_v53, %v575_v53 }
 0x1d7   : > { %849 = vst.msk [vmem:[%s1043_s27 + $0x2c] sm:$0xf] %vm331_vm1, %v880_v52 }
 0x1d8   : > { %847 = vst.msk [vmem:[%s1043_s27 + $0x24] sm:$0xf] %vm331_vm1, %v878_v54 }
 0x1da   : > { %v955_v55 = vpop.f32.mrb[12].mxu1 }
 0x1db   : > { %v883_v56 = vpack.c.bf16 %v955_v55, %v955_v55  ;;  %v708_v57 = vpop.f32.mrb[13].mxu1 }
 0x1dc   : > { %v881_v58 = vpack.c.bf16 %v708_v57, %v708_v57  ;;  %v956_v59 = vpop.f32.mrb[14].mxu1 }
 0x1dd   : > { %863 = vst.msk [vmem:[%s1043_s27 + $0x38] sm:$0xf] %vm331_vm1, %v883_v56  ;;  %v884_v60 = vpack.c.bf16 %v956_v59, %v956_v59  ;;  %v711_v61 = vpop.f32.mrb[15].mxu1 }
 0x1de   : > { %861 = vst.msk [vmem:[%s1043_s27 + $0x30] sm:$0xf] %vm331_vm1, %v881_v58  ;;  %v882_v62 = vpack.c.bf16 %v711_v61, %v711_v61 }
 0x1df   : > { %864 = vst.msk [vmem:[%s1043_s27 + $0x3c] sm:$0xf] %vm331_vm1, %v884_v60 }
 0x1e0   : > { %862 = vst.msk [vmem:[%s1043_s27 + $0x34] sm:$0xf] %vm331_vm1, %v882_v62 }
 0x1e1 PF: > { %s13_s12 = sadd.s32 1, %s978_s12  }
 0x1e2   : > { %p10_p4 = scmp.ge.s32.totalorder %s13_s12, 4  }
 0x1e4   :  { %12 = sbr.rel (!%p10_p4) target bundleno = 1 (0x1), region = 68 }

// kernel: vit_block_forward.12
= control target key start
LH: loop header
LB: loop body
LE: loop exit
PB: predicated region body
PF: predicated region fallthrough
CT: control target
= control target key end

     0   :  { %v52_v36 = vlaneseq  ;;  %s600_s1 = inlined_call_operand.vmem [shape: bf16[256,256], index: 1, kind: input, shape index: {}]   ;;  %s601_s0 = inlined_call_operand.vmem [shape: bf16[32,256], index: 0, kind: input, shape index: {}]   ;;  %s602_s2 = inlined_call_operand.vmem [shape: f32[1,256], index: 2, kind: input, shape index: {}]   ;;  %s603_s3 = inlined_call_operand.vmem [shape: bf16[32,256], index: 3, kind: output, shape index: {}]  }
   0x1   :  { %v403_v0 = vld [vmem:[%s600_s1 + $0x4] ss:$8 sps:$4 sm:$0xff]   ;;  %v405_v1 = vld [vmem:[%s600_s1] ss:$8 sps:$4 sm:$0xff]   ;;  %v406_v2 = vld [vmem:[%s600_s1 + $0x14] ss:$8 sps:$4 sm:$0xff]  }
   0x2   :  { %242 = vmatprep.subr.bf16.mxu0 %v403_v0  ;;  %371 = vmatprep.subr.bf16.mxu1 %v403_v0  ;;  %v408_v3 = vld [vmem:[%s600_s1 + $0x10] ss:$8 sps:$4 sm:$0xff]   ;;  %v409_v4 = vld [vmem:[%s600_s1 + $0x24] ss:$8 sps:$4 sm:$0xff]   ;;  %v411_v5 = vld [vmem:[%s600_s1 + $0x20] ss:$8 sps:$4 sm:$0xff]  }
   0x3   :  { %243 = vmatpush1.bf16.msra.mxu0 %v405_v1  ;;  %387 = vmatpush1.bf16.msra.mxu1 %v405_v1  ;;  %v412_v6 = vld [vmem:[%s600_s1 + $0x34] ss:$8 sps:$4 sm:$0xff]   ;;  %v414_v7 = vld [vmem:[%s600_s1 + $0x30] ss:$8 sps:$4 sm:$0xff]   ;;  %v415_v8 = vld [vmem:[%s600_s1 + $0x44] ss:$8 sps:$4 sm:$0xff]  }
   0x4   :  { %244 = vmatprep.subr.bf16.mxu0 %v406_v2  ;;  %372 = vmatprep.subr.bf16.mxu1 %v406_v2  ;;  %v417_v9 = vld [vmem:[%s600_s1 + $0x40] ss:$8 sps:$4 sm:$0xff]   ;;  %v418_v10 = vld [vmem:[%s600_s1 + $0x54] ss:$8 sps:$4 sm:$0xff]   ;;  %v420_v11 = vld [vmem:[%s600_s1 + $0x50] ss:$8 sps:$4 sm:$0xff]  }
   0x5   :  { %v421_v12 = vld [vmem:[%s600_s1 + $0x64] ss:$8 sps:$4 sm:$0xff]   ;;  %v423_v14 = vld [vmem:[%s600_s1 + $0x60] ss:$8 sps:$4 sm:$0xff]   ;;  %v456_v15 = vld [vmem:[%s601_s0 + $0x14] ss:$8 sps:$4 sm:$0xff]  }
   0x6   :  { %v453_v13 = vld [vmem:[%s601_s0 + $0x4] ss:$8 sps:$4 sm:$0xff]   ;;  %v424_v16 = vld [vmem:[%s600_s1 + $0x74] ss:$8 sps:$4 sm:$0xff]   ;;  %284 = vmatprep.mubr.bf16.mxu1 %v456_v15  ;;  %v426_v17 = vld [vmem:[%s600_s1 + $0x70] ss:$8 sps:$4 sm:$0xff]  }
   0x7   :  { %245 = vmatpush1.bf16.msra.mxu0 %v408_v3  ;;  %388 = vmatpush1.bf16.msra.mxu1 %v408_v3  ;;  %v427_v18 = vld [vmem:[%s600_s1 + $0x84] ss:$8 sps:$4 sm:$0xff]   ;;  %v429_v19 = vld [vmem:[%s600_s1 + $0x80] ss:$8 sps:$4 sm:$0xff]   ;;  %v430_v20 = vld [vmem:[%s600_s1 + $0x94] ss:$8 sps:$4 sm:$0xff]  }
   0x8   :  { %246 = vmatprep.subr.bf16.mxu0 %v409_v4  ;;  %373 = vmatprep.subr.bf16.mxu1 %v409_v4  ;;  %v432_v21 = vld [vmem:[%s600_s1 + $0x90] ss:$8 sps:$4 sm:$0xff]   ;;  %v433_v22 = vld [vmem:[%s600_s1 + $0xa4] ss:$8 sps:$4 sm:$0xff]   ;;  %v435_v23 = vld [vmem:[%s600_s1 + $0xa0] ss:$8 sps:$4 sm:$0xff]  }
   0x9   :  { %274 = vmatprep.mubr.bf16.mxu0 %v453_v13  ;;  %v436_v24 = vld [vmem:[%s600_s1 + $0xb4] ss:$8 sps:$4 sm:$0xff]   ;;  %v438_v25 = vld [vmem:[%s600_s1 + $0xb0] ss:$8 sps:$4 sm:$0xff]   ;;  %v439_v26 = vld [vmem:[%s600_s1 + $0xc4] ss:$8 sps:$4 sm:$0xff]  }
   0xa   :  { %v441_v27 = vld [vmem:[%s600_s1 + $0xc0] ss:$8 sps:$4 sm:$0xff]   ;;  %v442_v28 = vld [vmem:[%s600_s1 + $0xd4] ss:$8 sps:$4 sm:$0xff]   ;;  %v444_v29 = vld [vmem:[%s600_s1 + $0xd0] ss:$8 sps:$4 sm:$0xff]  }
   0xb   :  { %247 = vmatpush1.bf16.msra.mxu0 %v411_v5  ;;  %389 = vmatpush1.bf16.msra.mxu1 %v411_v5  ;;  %v445_v30 = vld [vmem:[%s600_s1 + $0xe4] ss:$8 sps:$4 sm:$0xff]   ;;  %v447_v31 = vld [vmem:[%s600_s1 + $0xe0] ss:$8 sps:$4 sm:$0xff]   ;;  %v448_v32 = vld [vmem:[%s600_s1 + $0xf4] ss:$8 sps:$4 sm:$0xff]  }
   0xc   :  { %248 = vmatprep.subr.bf16.mxu0 %v412_v6  ;;  %374 = vmatprep.subr.bf16.mxu1 %v412_v6  ;;  %v450_v33 = vld [vmem:[%s600_s1 + $0xf0] ss:$8 sps:$4 sm:$0xff]   ;;  %v451_v34 = vld [vmem:[%s601_s0] ss:$8 sps:$4 sm:$0xff]   ;;  %v53_v37 = vshrl.u32 %v52_v36, 7 }
   0xd   :  { %v454_v35 = vld [vmem:[%s601_s0 + $0x10] ss:$8 sps:$4 sm:$0xff]   ;;  %v50_v39 = vld [vmem:[%s602_s2] sm:$0x3] }
   0xe   :  { %v54_v38 = vsub.s32 0, %v53_v37  ;;  %v58_v40 = vsub.s32 1, %v53_v37 }
   0xf   :  { %249 = vmatpush1.bf16.msra.mxu0 %v414_v7  ;;  %390 = vmatpush1.bf16.msra.mxu1 %v414_v7 }
  0x10   :  { %250 = vmatprep.subr.bf16.mxu0 %v415_v8  ;;  %375 = vmatprep.subr.bf16.mxu1 %v415_v8  ;;  %v55_v41 = vrot.slane %v50_v39, %v54_v38  ;;  %v59_v42 = vrot.slane %v50_v39, %v58_v40 }
  0x13   :  { %251 = vmatpush1.bf16.msra.mxu0 %v417_v9  ;;  %391 = vmatpush1.bf16.msra.mxu1 %v417_v9 }
  0x14   :  { %252 = vmatprep.subr.bf16.mxu0 %v418_v10  ;;  %376 = vmatprep.subr.bf16.mxu1 %v418_v10 }
  0x17   :  { %253 = vmatpush1.bf16.msra.mxu0 %v420_v11  ;;  %392 = vmatpush1.bf16.msra.mxu1 %v420_v11 }
  0x18   :  { %254 = vmatprep.subr.bf16.mxu0 %v421_v12  ;;  %377 = vmatprep.subr.bf16.mxu1 %v421_v12 }
  0x1b   :  { %255 = vmatpush1.bf16.msra.mxu0 %v423_v14  ;;  %393 = vmatpush1.bf16.msra.mxu1 %v423_v14 }
  0x1c   :  { %256 = vmatprep.subr.bf16.mxu0 %v424_v16  ;;  %378 = vmatprep.subr.bf16.mxu1 %v424_v16 }
  0x1f   :  { %257 = vmatpush1.bf16.msra.mxu0 %v426_v17  ;;  %394 = vmatpush1.bf16.msra.mxu1 %v426_v17 }
  0x20   :  { %258 = vmatprep.subr.bf16.mxu0 %v427_v18  ;;  %379 = vmatprep.subr.bf16.mxu1 %v427_v18 }
  0x23   :  { %259 = vmatpush1.bf16.msra.mxu0 %v429_v19  ;;  %395 = vmatpush1.bf16.msra.mxu1 %v429_v19 }
  0x24   :  { %260 = vmatprep.subr.bf16.mxu0 %v430_v20  ;;  %380 = vmatprep.subr.bf16.mxu1 %v430_v20 }
  0x27   :  { %261 = vmatpush1.bf16.msra.mxu0 %v432_v21  ;;  %396 = vmatpush1.bf16.msra.mxu1 %v432_v21 }
  0x28   :  { %262 = vmatprep.subr.bf16.mxu0 %v433_v22  ;;  %381 = vmatprep.subr.bf16.mxu1 %v433_v22 }
  0x2b   :  { %263 = vmatpush1.bf16.msra.mxu0 %v435_v23  ;;  %397 = vmatpush1.bf16.msra.mxu1 %v435_v23 }
  0x2c   :  { %264 = vmatprep.subr.bf16.mxu0 %v436_v24  ;;  %382 = vmatprep.subr.bf16.mxu1 %v436_v24 }
  0x2f   :  { %265 = vmatpush1.bf16.msra.mxu0 %v438_v25  ;;  %398 = vmatpush1.bf16.msra.mxu1 %v438_v25 }
  0x30   :  { %266 = vmatprep.subr.bf16.mxu0 %v439_v26  ;;  %383 = vmatprep.subr.bf16.mxu1 %v439_v26 }
  0x33   :  { %267 = vmatpush1.bf16.msra.mxu0 %v441_v27  ;;  %399 = vmatpush1.bf16.msra.mxu1 %v441_v27 }
  0x34   :  { %268 = vmatprep.subr.bf16.mxu0 %v442_v28  ;;  %384 = vmatprep.subr.bf16.mxu1 %v442_v28 }
  0x37   :  { %269 = vmatpush1.bf16.msra.mxu0 %v444_v29  ;;  %400 = vmatpush1.bf16.msra.mxu1 %v444_v29 }
  0x38   :  { %270 = vmatprep.subr.bf16.mxu0 %v445_v30  ;;  %385 = vmatprep.subr.bf16.mxu1 %v445_v30 }
  0x3b   :  { %271 = vmatpush1.bf16.msra.mxu0 %v447_v31  ;;  %401 = vmatpush1.bf16.msra.mxu1 %v447_v31 }
  0x3c   :  { %272 = vmatprep.subr.bf16.mxu0 %v448_v32  ;;  %386 = vmatprep.subr.bf16.mxu1 %v448_v32 }
  0x3f   :  { %273 = vmatpush1.bf16.msra.mxu0 %v450_v33  ;;  %402 = vmatpush1.bf16.msra.mxu1 %v450_v33 }
  0x42   :  { %275 = vmatmul.mubr.bf16.vlgmr.msra.gmra.mrb[0].mxu0 %v451_v34  ;;  %285 = vmatmul.mubr.bf16.vlgmr.msra.gmra.mrb[0].mxu1 %v454_v35 }
 0x115   :  { %v276_v43 = vpop.f32.mrb[0].mxu0  ;;  %v286_v44 = vpop.f32.mrb[0].mxu1 }
 0x116   :  { %v277_v45 = vadd.f32 %v276_v43, %v55_v41  ;;  %v287_v46 = vadd.f32 %v286_v44, %v55_v41  ;;  %v278_v47 = vpop.f32.mrb[1].mxu0  ;;  %v288_v48 = vpop.f32.mrb[1].mxu1 }
 0x117   :  { %v279_v49 = vadd.f32 %v278_v47, %v59_v42  ;;  %v289_v50 = vadd.f32 %v288_v48, %v59_v42  ;;  %v280_v51 = vpop.f32.mrb[2].mxu0  ;;  %v290_v52 = vpop.f32.mrb[2].mxu1 }
 0x118   :  { %v281_v53 = vadd.f32 %v280_v51, %v55_v41  ;;  %v291_v54 = vadd.f32 %v290_v52, %v55_v41  ;;  %v282_v55 = vpop.f32.mrb[3].mxu0  ;;  %v292_v56 = vpop.f32.mrb[3].mxu1 }
 0x119   :  { %v367_v57 = vpack.c.bf16 %v279_v49, %v277_v45  ;;  %v369_v58 = vpack.c.bf16 %v289_v50, %v287_v46  ;;  %v283_v59 = vadd.f32 %v282_v55, %v59_v42  ;;  %v293_v60 = vadd.f32 %v292_v56, %v59_v42 }
 0x11b   :  { %319 = vst [vmem:[%s603_s3] sm:$0xff] %v367_v57  ;;  %321 = vst [vmem:[%s603_s3 + $0x10] sm:$0xff] %v369_v58  ;;  %v368_v61 = vpack.c.bf16 %v283_v59, %v281_v53  ;;  %v370_v62 = vpack.c.bf16 %v293_v60, %v291_v54 }
 0x11d   :  { %320 = vst [vmem:[%s603_s3 + $0x8] sm:$0xff] %v368_v61  ;;  %322 = vst [vmem:[%s603_s3 + $0x18] sm:$0xff] %v370_v62 }

// kernel: vit_block_forward.13
= control target key start
LH: loop header
LB: loop body
LE: loop exit
PB: predicated region body
PF: predicated region fallthrough
CT: control target
= control target key end

     0   :  { %s1305_s18 = smov 0   ;;  %s1307_s19 = smov 0   ;;  %s1632_s0 = inlined_call_operand.vmem [shape: bf16[34,256], index: 0, kind: input, shape index: {}]   ;;  %s1633_s1 = inlined_call_operand.vmem [shape: f32[1,256], index: 1, kind: input, shape index: {}]   ;;  %s1634_s2 = inlined_call_operand.vmem [shape: f32[1,256], index: 2, kind: input, shape index: {}]   ;;  %s1635_s3 = inlined_call_operand.vmem [shape: bf16[256,768], index: 3, kind: input, shape index: {}]   ;;  %s1636_s4 = inlined_call_operand.vmem [shape: f32[1,768], index: 4, kind: input, shape index: {}]   ;;  %s1637_s5 = inlined_call_operand.vmem [shape: bf16[34,768], index: 5, kind: output, shape index: {}]  }
   0x1   :  { %s1309_s20 = smov 0   ;;  %s1311_s21 = smov 0  }
   0x2   :  { %s1313_s22 = smov 0  }
   0x3 LB: > { %s24_s23 = sadd.s32 1, %s1269_s21  ;;  %s1045_s24 = sadd.s32 4294967295, %s1273_s22   ;;  %s1273_s22 = sphi %s1313_s22, %s15_s22   ;;  %s1269_s21 = sphi %s1311_s21, %s1642_s21   ;;  %s1265_s20 = sphi %s1309_s20, %s1641_s20   ;;  %s1261_s19 = sphi %s1307_s19, %s1640_s19   ;;  %s1257_s18 = sphi %s1305_s18, %s1639_s18  }
   0x4   : > { %p25_p0 = scmp.ge.s32.totalorder %s24_s23, 3  ;;  %p109_p1 = scmp.ne.s32.totalorder %s1261_s19, %s1257_s18 }
   0x5   : > { %p110_p2 = scmp.eq.s32.totalorder %s1273_s22, 0  ;;  %p167_p4 = scmp.eq.s32.totalorder %s1045_s24, 2 }
   0x6   : > { %s1644_s23 = smov (%p25_p0, %s24_s23), 0  ;;  %s102_s26 = sadd.s32 1, %s1261_s19 }
   0x7   : > { %p111_p3 = por %p110_p2, %p109_p1  ;;  %s99_s25 = ssub.s32 %s1269_s21, %s1644_s23 }
   0x8   : > { %p100_p5 = scmp.eq.s32.totalorder %s99_s25, 0  ;;  %p1340_p6 = por %p167_p4, %p109_p1 }
   0x9   : > { %p1049_p7 = scmp.ge.s32.totalorder %s1273_s22, 3 }
   0xa   : > { %s1345_s28 = scalar_select %p100_p5, %s1261_s19, %s102_s26  }
   0xb   : > { %205 = sbr.rel (%p1049_p7) target bundleno = 38 (0x26), region = 28 }
  0x12   : > { %208 = sbr.rel (!%p111_p3) target bundleno = 38 (0x26), region = 32  ;;  %s210_s29 = sand.u32 (%p111_p3), 1, %s1261_s19  }
  0x13   : > { %s1097_s30 = sshll.u32 (%p111_p3), %s1269_s21, 3  ;;  %s1050_s6 = sshll.u32 (%p111_p3), %s210_s29, 8 }
  0x14   : > { %s1353_s9 = scalar_lea.vmem (%p111_p3), %s1635_s3, %s1097_s30  ;;  %s1358_s10 = scalar_lea.vmem (%p111_p3), [#allocation2], %s1050_s6 }
  0x15   : > { %v305_v0 = vld [vmem:[%s1353_s9] sm:$0xff] (%p111_p3)  ;;  %v307_v1 = vld [vmem:[%s1353_s9 + $0x18] sm:$0xff] (%p111_p3)  ;;  %v309_v2 = vld [vmem:[%s1353_s9 + $0x30] sm:$0xff] (%p111_p3) }
  0x16   : > { %306 = vst [vmem:[%s1358_s10] sm:$0xff] (%p111_p3), %v305_v0  ;;  %308 = vst [vmem:[%s1358_s10 + $0x8] sm:$0xff] (%p111_p3), %v307_v1  ;;  %v311_v3 = vld [vmem:[%s1353_s9 + $0x48] sm:$0xff] (%p111_p3)  ;;  %v313_v4 = vld [vmem:[%s1353_s9 + $0x60] sm:$0xff] (%p111_p3) }
  0x17   : > { %310 = vst [vmem:[%s1358_s10 + $0x10] sm:$0xff] (%p111_p3), %v309_v2  ;;  %v315_v5 = vld [vmem:[%s1353_s9 + $0x78] sm:$0xff] (%p111_p3)  ;;  %312 = vst [vmem:[%s1358_s10 + $0x18] sm:$0xff] (%p111_p3), %v311_v3  ;;  %v317_v6 = vld [vmem:[%s1353_s9 + $0x90] sm:$0xff] (%p111_p3) }
  0x18   : > { %314 = vst [vmem:[%s1358_s10 + $0x20] sm:$0xff] (%p111_p3), %v313_v4  ;;  %316 = vst [vmem:[%s1358_s10 + $0x28] sm:$0xff] (%p111_p3), %v315_v5  ;;  %v319_v7 = vld [vmem:[%s1353_s9 + $0xa8] sm:$0xff] (%p111_p3)  ;;  %v321_v8 = vld [vmem:[%s1353_s9 + $0xc0] sm:$0xff] (%p111_p3) }
  0x19   : > { %318 = vst [vmem:[%s1358_s10 + $0x30] sm:$0xff] %v317_v6  ;;  %320 = vst [vmem:[%s1358_s10 + $0x38] sm:$0xff] %v319_v7  ;;  %v323_v9 = vld [vmem:[%s1353_s9 + $0xd8] sm:$0xff]  ;;  %v325_v10 = vld [vmem:[%s1353_s9 + $0xf0] sm:$0xff] }
  0x1a   : > { %322 = vst [vmem:[%s1358_s10 + $0x40] sm:$0xff] %v321_v8  ;;  %v327_v11 = vld [vmem:[%s1353_s9 + $0x108] sm:$0xff]  ;;  %324 = vst [vmem:[%s1358_s10 + $0x48] sm:$0xff] %v323_v9  ;;  %v329_v12 = vld [vmem:[%s1353_s9 + $0x120] sm:$0xff] }
  0x1b   : > { %326 = vst [vmem:[%s1358_s10 + $0x50] sm:$0xff] %v325_v10  ;;  %328 = vst [vmem:[%s1358_s10 + $0x58] sm:$0xff] %v327_v11  ;;  %v331_v13 = vld [vmem:[%s1353_s9 + $0x138] sm:$0xff]  ;;  %v333_v14 = vld [vmem:[%s1353_s9 + $0x150] sm:$0xff] }
  0x1c   : > { %330 = vst [vmem:[%s1358_s10 + $0x60] sm:$0xff] %v329_v12  ;;  %332 = vst [vmem:[%s1358_s10 + $0x68] sm:$0xff] %v331_v13  ;;  %v335_v15 = vld [vmem:[%s1353_s9 + $0x168] sm:$0xff]  ;;  %v337_v16 = vld [vmem:[%s1353_s9 + $0x180] sm:$0xff] }
  0x1d   : > { %334 = vst [vmem:[%s1358_s10 + $0x70] sm:$0xff] %v333_v14  ;;  %v339_v17 = vld [vmem:[%s1353_s9 + $0x198] sm:$0xff]  ;;  %336 = vst [vmem:[%s1358_s10 + $0x78] sm:$0xff] %v335_v15  ;;  %v341_v18 = vld [vmem:[%s1353_s9 + $0x1b0] sm:$0xff] }
  0x1e   : > { %338 = vst [vmem:[%s1358_s10 + $0x80] sm:$0xff] %v337_v16  ;;  %340 = vst [vmem:[%s1358_s10 + $0x88] sm:$0xff] %v339_v17  ;;  %v343_v19 = vld [vmem:[%s1353_s9 + $0x1c8] sm:$0xff]  ;;  %v345_v20 = vld [vmem:[%s1353_s9 + $0x1e0] sm:$0xff] }
  0x1f   : > { %342 = vst [vmem:[%s1358_s10 + $0x90] sm:$0xff] %v341_v18  ;;  %344 = vst [vmem:[%s1358_s10 + $0x98] sm:$0xff] %v343_v19  ;;  %v347_v21 = vld [vmem:[%s1353_s9 + $0x1f8] sm:$0xff]  ;;  %v349_v22 = vld [vmem:[%s1353_s9 + $0x210] sm:$0xff] }
  0x20   : > { %346 = vst [vmem:[%s1358_s10 + $0xa0] sm:$0xff] %v345_v20  ;;  %v351_v23 = vld [vmem:[%s1353_s9 + $0x228] sm:$0xff]  ;;  %348 = vst [vmem:[%s1358_s10 + $0xa8] sm:$0xff] %v347_v21  ;;  %v353_v24 = vld [vmem:[%s1353_s9 + $0x240] sm:$0xff] }
  0x21   : > { %350 = vst [vmem:[%s1358_s10 + $0xb0] sm:$0xff] %v349_v22  ;;  %352 = vst [vmem:[%s1358_s10 + $0xb8] sm:$0xff] %v351_v23  ;;  %v355_v25 = vld [vmem:[%s1353_s9 + $0x258] sm:$0xff]  ;;  %v357_v26 = vld [vmem:[%s1353_s9 + $0x270] sm:$0xff] }
  0x22   : > { %354 = vst [vmem:[%s1358_s10 + $0xc0] sm:$0xff] %v353_v24  ;;  %356 = vst [vmem:[%s1358_s10 + $0xc8] sm:$0xff] %v355_v25  ;;  %v359_v27 = vld [vmem:[%s1353_s9 + $0x288] sm:$0xff]  ;;  %v361_v28 = vld [vmem:[%s1353_s9 + $0x2a0] sm:$0xff] }
  0x23   : > { %358 = vst [vmem:[%s1358_s10 + $0xd0] sm:$0xff] %v357_v26  ;;  %v363_v29 = vld [vmem:[%s1353_s9 + $0x2b8] sm:$0xff]  ;;  %360 = vst [vmem:[%s1358_s10 + $0xd8] sm:$0xff] %v359_v27  ;;  %v365_v30 = vld [vmem:[%s1353_s9 + $0x2d0] sm:$0xff] }
  0x24   : > { %362 = vst [vmem:[%s1358_s10 + $0xe0] sm:$0xff] %v361_v28  ;;  %364 = vst [vmem:[%s1358_s10 + $0xe8] sm:$0xff] %v363_v29  ;;  %v367_v31 = vld [vmem:[%s1353_s9 + $0x2e8] sm:$0xff] }
  0x25   : > { %366 = vst [vmem:[%s1358_s10 + $0xf0] sm:$0xff] %v365_v30  ;;  %368 = vst [vmem:[%s1358_s10 + $0xf8] sm:$0xff] %v367_v31 }
  0x26 PF: > { %p1053_p8 = scmp.ge.s32.totalorder %s1273_s22, 1  ;;  %p381_p9 = scmp.lt.s32.totalorder %s1273_s22, 4 }
  0x28   : > { %p382_p10 = pnand %p1053_p8, %p381_p9 }
  0x29   : > { %v1426_v32 = vld [vmem:[%s1632_s0 + $0x10] sm:$0xff] (!%p382_p10)  ;;  %v1431_v33 = vld [vmem:[%s1632_s0 + $0x18] sm:$0xff] (!%p382_p10)  ;;  %v1436_v34 = vld [vmem:[%s1632_s0] sm:$0xff] (!%p382_p10)  ;;  %vm466_vm0 = vcmask (!%p382_p10), 1041408   ;;  %s388_s29 = sand.u32 (!%p382_p10), 1, %s1257_s18   ;;  %s1055_s11 = sshll.u32 (!%p382_p10), %s1265_s20, 1 }
  0x2a   : > { %385 = sbr.rel (%p382_p10) target bundleno = 600 (0x258), region = 74  ;;  %v448_v35 = vunpack.c.l.bf16 (!%p382_p10), %v1426_v32  ;;  %v449_v36 = vunpack.c.h.bf16 (!%p382_p10), %v1426_v32  ;;  %v450_v37 = vunpack.c.l.bf16 (!%p382_p10), %v1431_v33  ;;  %v451_v38 = vunpack.c.h.bf16 (!%p382_p10), %v1431_v33  ;;  %v1445_v39 = vld [vmem:[%s1632_s0 + $0x20] sm:$0x11] (!%p382_p10)  ;;  %v1450_v40 = vld [vmem:[%s1632_s0 + $0x8] sm:$0xff] (!%p382_p10)  ;;  %s1054_s30 = sshll.u32 (!%p382_p10), %s388_s29, 8 }
  0x2b   : > { %v444_v41 = vunpack.c.l.bf16 (!%p382_p10), %v1436_v34  ;;  %v445_v42 = vunpack.c.h.bf16 (!%p382_p10), %v1436_v34  ;;  %v452_v43 = vunpack.c.l.bf16 (!%p382_p10), %v1445_v39  ;;  %v453_v44 = vunpack.c.h.bf16 (!%p382_p10), %v1445_v39  ;;  %s1483_s6 = scalar_lea.vmem (!%p382_p10), [#allocation2], %s1054_s30  ;;  %p433_p11 = scmp.lt.s32.totalorder (!%p382_p10), %s1055_s11, 5 }
  0x2c   : > { %v460_v45 = vadd.f32 (!%p382_p10), %v449_v36, %v448_v35  ;;  %v446_v46 = vunpack.c.l.bf16 (!%p382_p10), %v1450_v40  ;;  %v447_v47 = vunpack.c.h.bf16 (!%p382_p10), %v1450_v40  ;;  %v463_v49 = vadd.f32 (!%p382_p10), %v451_v38, %v450_v37  ;;  %v1177_v54 = vld [vmem:[%s1483_s6 + $0x4] ss:$8 sps:$4 sm:$0xff] (!%p382_p10)   ;;  %v1179_v55 = vld [vmem:[%s1483_s6] ss:$8 sps:$4 sm:$0xff] (!%p382_p10)   ;;  %v1180_v56 = vld [vmem:[%s1483_s6 + $0x14] ss:$8 sps:$4 sm:$0xff] (!%p382_p10)  }
  0x2d   : > { %v454_v48 = vadd.f32 (!%p382_p10), %v445_v42, %v444_v41  ;;  %v467_v50 = vsel (!%p382_p10), %vm466_vm0, %v452_v43, 0.0  ;;  %v468_v51 = vsel (!%p382_p10), %vm466_vm0, %v453_v44, 0.0  ;;  %1104 = vmatprep.subr.bf16.mxu1 (!%p382_p10), %v1177_v54  ;;  %794 = vmatprep.subr.bf16.mxu0 (!%p382_p10), %v1177_v54  ;;  %v1182_v57 = vld [vmem:[%s1483_s6 + $0x10] ss:$8 sps:$4 sm:$0xff] (!%p382_p10)   ;;  %v1183_v58 = vld [vmem:[%s1483_s6 + $0x24] ss:$8 sps:$4 sm:$0xff] (!%p382_p10)  }
  0x2e   : > { %461 = vadd.xlane.f32.xlu0 (!%p382_p10), %v460_v45  ;;  %v457_v52 = vadd.f32 (!%p382_p10), %v447_v47, %v446_v46  ;;  %v469_v53 = vadd.f32 (!%p382_p10), %v468_v51, %v467_v50  ;;  %1120 = vmatpush1.bf16.msra.mxu1 (!%p382_p10), %v1179_v55  ;;  %v1185_v59 = vld [vmem:[%s1483_s6 + $0x20] ss:$8 sps:$4 sm:$0xff] (!%p382_p10)   ;;  %v1186_v60 = vld [vmem:[%s1483_s6 + $0x34] ss:$8 sps:$4 sm:$0xff] (!%p382_p10)   ;;  %v1188_v61 = vld [vmem:[%s1483_s6 + $0x30] ss:$8 sps:$4 sm:$0xff] (!%p382_p10)  }
  0x2f   : > { %455 = vadd.xlane.f32.xlu1 (!%p382_p10), %v454_v48  ;;  %795 = vmatpush1.bf16.msra.mxu0 (!%p382_p10), %v1179_v55  ;;  %v1189_v62 = vld [vmem:[%s1483_s6 + $0x44] ss:$8 sps:$4 sm:$0xff] (!%p382_p10)   ;;  %v1191_v63 = vld [vmem:[%s1483_s6 + $0x40] ss:$8 sps:$4 sm:$0xff] (!%p382_p10)   ;;  %v1192_v0 = vld [vmem:[%s1483_s6 + $0x54] ss:$8 sps:$4 sm:$0xff] (!%p382_p10)  }
  0x30   : > { %1105 = vmatprep.subr.bf16.mxu1 (!%p382_p10), %v1180_v56  ;;  %796 = vmatprep.subr.bf16.mxu0 (!%p382_p10), %v1180_v56  ;;  %v1194_v1 = vld [vmem:[%s1483_s6 + $0x50] ss:$8 sps:$4 sm:$0xff] (!%p382_p10)   ;;  %v1195_v2 = vld [vmem:[%s1483_s6 + $0x64] ss:$8 sps:$4 sm:$0xff] (!%p382_p10)   ;;  %v1197_v3 = vld [vmem:[%s1483_s6 + $0x60] ss:$8 sps:$4 sm:$0xff] (!%p382_p10)  }
  0x31   : > { %v1198_v4 = vld [vmem:[%s1483_s6 + $0x74] ss:$8 sps:$4 sm:$0xff]   ;;  %v1200_v5 = vld [vmem:[%s1483_s6 + $0x70] ss:$8 sps:$4 sm:$0xff]   ;;  %v1201_v6 = vld [vmem:[%s1483_s6 + $0x84] ss:$8 sps:$4 sm:$0xff]  }
  0x32   : > { %464 = vadd.xlane.f32.xlu0 %v463_v49  ;;  %1121 = vmatpush1.bf16.msra.mxu1 %v1182_v57  ;;  %v1203_v7 = vld [vmem:[%s1483_s6 + $0x80] ss:$8 sps:$4 sm:$0xff]   ;;  %v1210_v49 = vld [vmem:[%s1483_s6 + $0xb4] ss:$8 sps:$4 sm:$0xff]   ;;  %v1212_v50 = vld [vmem:[%s1483_s6 + $0xb0] ss:$8 sps:$4 sm:$0xff]  }
  0x33   : > { %458 = vadd.xlane.f32.xlu1 %v457_v52  ;;  %797 = vmatpush1.bf16.msra.mxu0 %v1182_v57  ;;  %v1209_v48 = vld [vmem:[%s1483_s6 + $0xa0] ss:$8 sps:$4 sm:$0xff]   ;;  %v1213_v51 = vld [vmem:[%s1483_s6 + $0xc4] ss:$8 sps:$4 sm:$0xff]   ;;  %v1218_v54 = vld [vmem:[%s1483_s6 + $0xd0] ss:$8 sps:$4 sm:$0xff]  }
  0x34   : > { %1106 = vmatprep.subr.bf16.mxu1 %v1183_v58  ;;  %798 = vmatprep.subr.bf16.mxu0 %v1183_v58  ;;  %v1215_v52 = vld [vmem:[%s1483_s6 + $0xc0] ss:$8 sps:$4 sm:$0xff]   ;;  %v1219_v55 = vld [vmem:[%s1483_s6 + $0xe4] ss:$8 sps:$4 sm:$0xff]   ;;  %v1222_v57 = vld [vmem:[%s1483_s6 + $0xf4] ss:$8 sps:$4 sm:$0xff]  }
  0x35   : > { %v1221_v56 = vld [vmem:[%s1483_s6 + $0xe0] ss:$8 sps:$4 sm:$0xff]   ;;  %v1224_v58 = vld [vmem:[%s1483_s6 + $0xf0] ss:$8 sps:$4 sm:$0xff]   ;;  %s1646_s11 = smov (!%p433_p11, %s1055_s11), 5  ;;  %s1136_s15 = smul.u32 40, %s388_s29 }
  0x36   : > { %470 = vadd.xlane.f32.xlu0 %v469_v53  ;;  %1122 = vmatpush1.bf16.msra.mxu1 %v1185_v59  ;;  %v1216_v53 = vld [vmem:[%s1483_s6 + $0xd4] ss:$8 sps:$4 sm:$0xff]   ;;  %s435_s14 = scalar_lea.vmem %s1636_s4, %s1646_s11  ;;  %s1103_s18 = sshll.u32 (%p1340_p6), %s1265_s20, 3 }
  0x37   : > { %799 = vmatpush1.bf16.msra.mxu0 %v1185_v59  ;;  %1107 = vmatprep.subr.bf16.mxu1 %v1186_v60  ;;  %s423_s16 = scalar_lea.vmem [#allocation3], %s1136_s15  ;;  %s904_s25 = scalar_lea.vmem (%p1340_p6), %s1637_s5, %s1103_s18 }
  0x38   : > { %800 = vmatprep.subr.bf16.mxu0 %v1186_v60 }
  0x3a   : > { %1123 = vmatpush1.bf16.msra.mxu1 %v1188_v61 }
  0x3b   : > { %801 = vmatpush1.bf16.msra.mxu0 %v1188_v61  ;;  %1108 = vmatprep.subr.bf16.mxu1 %v1189_v62 }
  0x3c   : > { %802 = vmatprep.subr.bf16.mxu0 %v1189_v62  ;;  %v542_v62 = vlaneseq }
  0x3e   : > { %1124 = vmatpush1.bf16.msra.mxu1 %v1191_v63 }
  0x3f   : > { %803 = vmatpush1.bf16.msra.mxu0 %v1191_v63  ;;  %1109 = vmatprep.subr.bf16.mxu1 %v1192_v0 }
  0x40   : > { %804 = vmatprep.subr.bf16.mxu0 %v1192_v0 }
  0x42   : > { %1125 = vmatpush1.bf16.msra.mxu1 %v1194_v1 }
  0x43   : > { %805 = vmatpush1.bf16.msra.mxu0 %v1194_v1  ;;  %1110 = vmatprep.subr.bf16.mxu1 %v1195_v2 }
  0x44   : > { %806 = vmatprep.subr.bf16.mxu0 %v1195_v2 }
  0x46   : > { %1126 = vmatpush1.bf16.msra.mxu1 %v1197_v3 }
  0x47   : > { %807 = vmatpush1.bf16.msra.mxu0 %v1197_v3  ;;  %1111 = vmatprep.subr.bf16.mxu1 %v1198_v4 }
  0x48   : > { %808 = vmatprep.subr.bf16.mxu0 %v1198_v4 }
  0x4a   : > { %1127 = vmatpush1.bf16.msra.mxu1 %v1200_v5 }
  0x4b   : > { %809 = vmatpush1.bf16.msra.mxu0 %v1200_v5  ;;  %1112 = vmatprep.subr.bf16.mxu1 %v1201_v6  ;;  %v543_v5 = vshrl.u32 %v542_v62, 7 }
  0x4c   : > { %810 = vmatprep.subr.bf16.mxu0 %v1201_v6 }
  0x4e   : > { %1128 = vmatpush1.bf16.msra.mxu1 %v1203_v7 }
  0x4f   : > { %811 = vmatpush1.bf16.msra.mxu0 %v1203_v7 }
  0xbb   : > { %v462_v8 = vpop.xlane.xlu0 %461 }
  0xbc   : > { %v475_v9 = vmul.f32 0.00390625, %v462_v8  ;;  %v456_v10 = vpop.xlane.xlu1 %455 }
  0xbd   : > { %v473_v11 = vmul.f32 0.00390625, %v456_v10 }
  0xbe   : > { %v1505_v12 = vsub.f32 %v448_v35, %v475_v9  ;;  %v1509_v13 = vsub.f32 %v449_v36, %v475_v9 }
  0xbf   : > { %v465_v14 = vpop.xlane.xlu0 %464  ;;  %v1513_v15 = vsub.f32 %v444_v41, %v473_v11  ;;  %v1517_v16 = vsub.f32 %v445_v42, %v473_v11  ;;  %v1579_v11 = vsub.s32 0, %v543_v5 }
  0xc0   : > { %v476_v17 = vmul.f32 0.00390625, %v465_v14  ;;  %v459_v18 = vpop.xlane.xlu1 %458  ;;  %v492_v19 = vmul.f32 %v1505_v12, %v1505_v12  ;;  %v493_v20 = vmul.f32 %v1509_v13, %v1509_v13  ;;  %v1581_v14 = vsub.s32 1, %v543_v5 }
  0xc1   : > { %v474_v21 = vmul.f32 0.00390625, %v459_v18  ;;  %v488_v22 = vmul.f32 %v1513_v15, %v1513_v15  ;;  %v489_v23 = vmul.f32 %v1517_v16, %v1517_v16  ;;  %v540_v18 = vld [vmem:[%s1633_s1] sm:$0x3] }
  0xc2   : > { %v1529_v24 = vsub.f32 %v450_v37, %v476_v17  ;;  %v1533_v25 = vsub.f32 %v451_v38, %v476_v17  ;;  %v504_v26 = vadd.f32 %v493_v20, %v492_v19  ;;  %v545_v20 = vrot.slane %v540_v18, %v1579_v11 }
  0xc3   : > { %v471_v27 = vpop.xlane.xlu0 %470  ;;  %v1537_v28 = vsub.f32 %v446_v46, %v474_v21  ;;  %v1541_v29 = vsub.f32 %v447_v47, %v474_v21  ;;  %v498_v33 = vadd.f32 %v489_v23, %v488_v22  ;;  %v1206_v46 = vld [vmem:[%s1483_s6 + $0x90] ss:$8 sps:$4 sm:$0xff]   ;;  %v1207_v47 = vld [vmem:[%s1483_s6 + $0xa4] ss:$8 sps:$4 sm:$0xff]   ;;  %v549_v21 = vrot.slane %v540_v18, %v1581_v14  ;;  %v562_v23 = vld [vmem:[%s1634_s2] sm:$0x3] }
  0xc4   : > { %v477_v30 = vmul.f32 0.00390625, %v471_v27  ;;  %505 = vadd.xlane.f32.xlu1 %v504_v26  ;;  %v494_v31 = vmul.f32 %v1529_v24, %v1529_v24  ;;  %v495_v32 = vmul.f32 %v1533_v25, %v1533_v25 }
  0xc5   : > { %v490_v34 = vmul.f32 %v1537_v28, %v1537_v28  ;;  %v491_v35 = vmul.f32 %v1541_v29, %v1541_v29 }
  0xc6   : > { %v1553_v36 = vsub.f32 %v452_v43, %v477_v30  ;;  %v1557_v37 = vsub.f32 %v453_v44, %v477_v30  ;;  %v507_v38 = vadd.f32 %v495_v32, %v494_v31  ;;  %v1204_v44 = vld [vmem:[%s1483_s6 + $0x94] ss:$8 sps:$4 sm:$0xff]   ;;  %v567_v31 = vrot.slane %v562_v23, %v1579_v11 }
  0xc7   : > { %v501_v40 = vadd.f32 %v491_v35, %v490_v34  ;;  %1113 = vmatprep.subr.bf16.mxu1 %v1204_v44  ;;  %812 = vmatprep.subr.bf16.mxu0 %v1204_v44  ;;  %v571_v32 = vrot.slane %v562_v23, %v1581_v14 }
  0xc8   : > { %508 = vadd.xlane.f32.xlu0 %v507_v38  ;;  %499 = vadd.xlane.f32.xlu1 %v498_v33  ;;  %v496_v41 = vmul.f32 %v1553_v36, %v1553_v36  ;;  %v497_v42 = vmul.f32 %v1557_v37, %v1557_v37 }
  0xc9   : > { %1129 = vmatpush1.bf16.msra.mxu1 %v1206_v46  ;;  %813 = vmatpush1.bf16.msra.mxu0 %v1206_v46 }
  0xca   : > { %v510_v45 = vsel %vm466_vm0, %v496_v41, 0.0  ;;  %v511_v43 = vsel %vm466_vm0, %v497_v42, 0.0  ;;  %1114 = vmatprep.subr.bf16.mxu1 %v1207_v47  ;;  %814 = vmatprep.subr.bf16.mxu0 %v1207_v47 }
  0xcb   : > { %v512_v39 = vadd.f32 %v511_v43, %v510_v45 }
  0xcc   : > { %502 = vadd.xlane.f32.xlu0 %v501_v40 }
  0xcd   : > { %513 = vadd.xlane.f32.xlu1 %v512_v39  ;;  %1130 = vmatpush1.bf16.msra.mxu1 %v1209_v48 }
  0xce   : > { %815 = vmatpush1.bf16.msra.mxu0 %v1209_v48  ;;  %1115 = vmatprep.subr.bf16.mxu1 %v1210_v49 }
  0xcf   : > { %816 = vmatprep.subr.bf16.mxu0 %v1210_v49 }
  0xd1   : > { %1131 = vmatpush1.bf16.msra.mxu1 %v1212_v50 }
  0xd2   : > { %817 = vmatpush1.bf16.msra.mxu0 %v1212_v50  ;;  %1116 = vmatprep.subr.bf16.mxu1 %v1213_v51 }
  0xd3   : > { %818 = vmatprep.subr.bf16.mxu0 %v1213_v51 }
  0xd5   : > { %1132 = vmatpush1.bf16.msra.mxu1 %v1215_v52 }
  0xd6   : > { %819 = vmatpush1.bf16.msra.mxu0 %v1215_v52  ;;  %1117 = vmatprep.subr.bf16.mxu1 %v1216_v53 }
  0xd7   : > { %820 = vmatprep.subr.bf16.mxu0 %v1216_v53 }
  0xd9   : > { %1133 = vmatpush1.bf16.msra.mxu1 %v1218_v54 }
  0xda   : > { %821 = vmatpush1.bf16.msra.mxu0 %v1218_v54  ;;  %1118 = vmatprep.subr.bf16.mxu1 %v1219_v55 }
  0xdb   : > { %822 = vmatprep.subr.bf16.mxu0 %v1219_v55 }
  0xdd   : > { %1134 = vmatpush1.bf16.msra.mxu1 %v1221_v56 }
  0xde   : > { %823 = vmatpush1.bf16.msra.mxu0 %v1221_v56  ;;  %1119 = vmatprep.subr.bf16.mxu1 %v1222_v57 }
  0xdf   : > { %824 = vmatprep.subr.bf16.mxu0 %v1222_v57 }
  0xe1   : > { %1135 = vmatpush1.bf16.msra.mxu1 %v1224_v58 }
  0xe2   : > { %825 = vmatpush1.bf16.msra.mxu0 %v1224_v58 }
 0x151   : > { %v506_v59 = vpop.xlane.xlu1 %505 }
 0x152   : > { %v517_v60 = vmul.f32 0.00390625, %v506_v59 }
 0x154   : > { %v522_v61 = vadd.f32 1e-06, %v517_v60 }
 0x155   : > { %v509_v63 = vpop.xlane.xlu0 %508  ;;  %v500_v0 = vpop.xlane.xlu1 %499 }
 0x156   : > { %1225 = vrsqrt.f32 %v522_v61  ;;  %v518_v1 = vmul.f32 0.00390625, %v509_v63  ;;  %v515_v2 = vmul.f32 0.00390625, %v500_v0  ;;  %v622_v61 = vld [vmem:[%s435_s14] sm:$0x3] }
 0x157   : > { %v627_v62 = vrot.slane %v622_v61, %v1579_v11  ;;  %v631_v63 = vrot.slane %v622_v61, %v1581_v14 }
 0x158   : > { %v523_v3 = vadd.f32 1e-06, %v518_v1  ;;  %v520_v4 = vadd.f32 1e-06, %v515_v2 }
 0x159   : > { %v503_v6 = vpop.xlane.xlu0 %502 }
 0x15a   : > { %1227 = vrsqrt.f32 %v523_v3  ;;  %v516_v7 = vmul.f32 0.00390625, %v503_v6  ;;  %v514_v8 = vpop.xlane.xlu1 %513 }
 0x15b   : > { %1229 = vrsqrt.f32 %v520_v4  ;;  %v519_v9 = vmul.f32 0.00390625, %v514_v8 }
 0x15c   : > { %v521_v10 = vadd.f32 1e-06, %v516_v7 }
 0x15d   : > { %v524_v17 = vadd.f32 1e-06, %v519_v9 }
 0x15e   : > { %1231 = vrsqrt.f32 %v521_v10 }
 0x15f   : > { %1233 = vrsqrt.f32 %v524_v17 }
 0x160   : > { %v1226_v19 = vpop.eup %1225 }
 0x161   : > { %v535_v22 = vmul.f32 %v1226_v19, %v1509_v13  ;;  %v534_v26 = vmul.f32 %v1226_v19, %v1505_v12 }
 0x163   : > { %v557_v30 = vmul.f32 %v549_v21, %v535_v22  ;;  %v556_v33 = vmul.f32 %v545_v20, %v534_v26 }
 0x164   : > { %v1228_v27 = vpop.eup %1227 }
 0x165   : > { %v1230_v34 = vpop.eup %1229  ;;  %v537_v35 = vmul.f32 %v1228_v27, %v1533_v25  ;;  %v536_v38 = vmul.f32 %v1228_v27, %v1529_v24  ;;  %v579_v12 = vadd.f32 %v571_v32, %v557_v30  ;;  %v578_v43 = vadd.f32 %v567_v31, %v556_v33 }
 0x166   : > { %v531_v13 = vmul.f32 %v1230_v34, %v1517_v16  ;;  %v530_v40 = vmul.f32 %v1230_v34, %v1513_v15 }
 0x167   : > { %v559_v41 = vmul.f32 %v549_v21, %v537_v35  ;;  %v558_v42 = vmul.f32 %v545_v20, %v536_v38 }
 0x168   : > { %v1232_v45 = vpop.eup %1231  ;;  %v553_v39 = vmul.f32 %v549_v21, %v531_v13  ;;  %v552_v44 = vmul.f32 %v545_v20, %v530_v40 }
 0x169   : > { %v1234_v46 = vpop.eup %1233  ;;  %v581_v47 = vadd.f32 %v571_v32, %v559_v41  ;;  %v580_v48 = vadd.f32 %v567_v31, %v558_v42  ;;  %v533_v49 = vmul.f32 %v1232_v45, %v1541_v29  ;;  %v532_v25 = vmul.f32 %v1232_v45, %v1537_v28 }
 0x16a   : > { %v539_v24 = vmul.f32 %v1234_v46, %v1557_v37  ;;  %v538_v16 = vmul.f32 %v1234_v46, %v1553_v36  ;;  %v575_v55 = vadd.f32 %v571_v32, %v553_v39  ;;  %v574_v57 = vadd.f32 %v567_v31, %v552_v44 }
 0x16b   : > { %v587_v50 = vpack.c.bf16 %v581_v47, %v579_v12  ;;  %v586_v15 = vpack.c.bf16 %v580_v48, %v578_v43  ;;  %v555_v51 = vmul.f32 %v549_v21, %v533_v49  ;;  %v554_v52 = vmul.f32 %v545_v20, %v532_v25 }
 0x16c   : > { %v561_v53 = vmul.f32 %v549_v21, %v539_v24  ;;  %v560_v54 = vmul.f32 %v545_v20, %v538_v16 }
 0x16d   : > { %836 = vmatprep.mubr.bf16.mxu1 %v587_v50  ;;  %v577_v56 = vadd.f32 %v571_v32, %v555_v51  ;;  %v576_v58 = vadd.f32 %v567_v31, %v554_v52 }
 0x16e   : > { %837 = vmatmul.mubr.bf16.vlgmr.msra.gmra.mrb[0].mxu1 %v586_v15  ;;  %v583_v29 = vadd.f32 %v571_v32, %v561_v53  ;;  %v582_v60 = vadd.f32 %v567_v31, %v560_v54 }
 0x16f   : > { %v585_v59 = vpack.c.bf16 %v577_v56, %v575_v55  ;;  %v584_v28 = vpack.c.bf16 %v576_v58, %v574_v57 }
 0x170   : > { %v589_v37 = vpack.c.bf16 %v583_v29, %v583_v29  ;;  %v588_v36 = vpack.c.bf16 %v582_v60, %v582_v60 }
 0x171   : > { %826 = vmatprep.mubr.bf16.mxu0 %v585_v59 }
 0x172   : > { %827 = vmatmul.mubr.bf16.vlgmr.msra.gmra.mrb[0].mxu0 %v584_v28  ;;  %846 = vmatprep.mubr.bf16.mxu1 %v589_v37 }
 0x176   : > { %847 = vmatmul.mubr.bf16.gmra.mrb[4].mxu1 %v588_v36 }
 0x241   : > { %v838_v0 = vpop.f32.mrb[0].mxu1 }
 0x242   : > { %v839_v1 = vadd.f32 %v838_v0, %v627_v62  ;;  %v840_v2 = vpop.f32.mrb[1].mxu1 }
 0x243   : > { %v841_v3 = vadd.f32 %v840_v2, %v631_v63  ;;  %v842_v4 = vpop.f32.mrb[2].mxu1 }
 0x244   : > { %v843_v5 = vadd.f32 %v842_v4, %v627_v62  ;;  %v844_v6 = vpop.f32.mrb[3].mxu1 }
 0x245   : > { %v1100_v7 = vpack.c.bf16 %v841_v3, %v839_v1  ;;  %v845_v8 = vadd.f32 %v844_v6, %v631_v63  ;;  %v828_v9 = vpop.f32.mrb[0].mxu0 }
 0x246   : > { %v829_v10 = vadd.f32 %v828_v9, %v627_v62  ;;  %v830_v17 = vpop.f32.mrb[1].mxu0 }
 0x247   : > { %889 = vst [vmem:[%s423_s16 + $0x10] sm:$0xff] %v1100_v7  ;;  %v1101_v18 = vpack.c.bf16 %v845_v8, %v843_v5  ;;  %v831_v11 = vadd.f32 %v830_v17, %v631_v63  ;;  %v832_v19 = vpop.f32.mrb[2].mxu0 }
 0x248   : > { %v833_v14 = vadd.f32 %v832_v19, %v627_v62  ;;  %v834_v20 = vpop.f32.mrb[3].mxu0 }
 0x249   : > { %890 = vst [vmem:[%s423_s16 + $0x18] sm:$0xff] %v1101_v18  ;;  %v1098_v21 = vpack.c.bf16 %v831_v11, %v829_v10  ;;  %v835_v22 = vadd.f32 %v834_v20, %v631_v63  ;;  %v848_v23 = vpop.f32.mrb[4].mxu1  ;;  %898 = sbr.rel (!%p1340_p6) target bundleno = 600 (0x258), region = 82 }
 0x24a   : > { %v849_v26 = vadd.f32 %v848_v23, %v627_v62  ;;  %v850_v27 = vpop.f32.mrb[5].mxu1 }
 0x24b   : > { %887 = vst [vmem:[%s423_s16] sm:$0xff] %v1098_v21  ;;  %v1099_v30 = vpack.c.bf16 %v835_v22, %v833_v14  ;;  %v851_v31 = vadd.f32 %v850_v27, %v631_v63  ;;  %v852_v32 = vpop.f32.mrb[6].mxu1 }
 0x24c   : > { %v853_v33 = vpop.f32.mrb[7].mxu1 }
 0x24d   : > { %888 = vst [vmem:[%s423_s16 + $0x8] sm:$0xff] %v1099_v30  ;;  %v1102_v34 = vpack.c.bf16 %v851_v31, %v849_v26 }
 0x24e   : > { %v944_v13 = vld [vmem:[%s423_s16 + $0x10] sm:$0xff] (%p1340_p6) }
 0x24f   : > { %891 = vst [vmem:[%s423_s16 + $0x20] sm:$0x11] %v1102_v34  ;;  %945 = vst [vmem:[%s904_s25 + $0x30] sm:$0xff] (%p1340_p6), %v944_v13 }
 0x250   : > { %v946_v40 = vld [vmem:[%s423_s16 + $0x18] sm:$0xff] }
 0x251   : > { %947 = vst [vmem:[%s904_s25 + $0x48] sm:$0xff] %v946_v40 }
 0x252   : > { %v940_v35 = vld [vmem:[%s423_s16] sm:$0xff] }
 0x253   : > { %941 = vst [vmem:[%s904_s25] sm:$0xff] %v940_v35 }
 0x254   : > { %v942_v38 = vld [vmem:[%s423_s16 + $0x8] sm:$0xff] }
 0x255   : > { %943 = vst [vmem:[%s904_s25 + $0x18] sm:$0xff] %v942_v38 }
 0x256   : > { %v948_v41 = vld [vmem:[%s423_s16 + $0x20] sm:$0xff] }
 0x257   : > { %949 = vst [vmem:[%s904_s25 + $0x60] sm:$0xff] %v948_v41 }
 0x258 PF: > { %s15_s22 = sadd.s32 1, %s1273_s22   ;;  %s1639_s18 = smov %s1261_s19 }
 0x259   : > { %p12_p12 = scmp.ge.s32.totalorder %s15_s22, 5   ;;  %s1640_s19 = smov %s1345_s28 }
 0x25a   : > { %s1641_s20 = smov %s1269_s21  ;;  %s1642_s21 = smov %s1644_s23 }
 0x25b   :  { %14 = sbr.rel (!%p12_p12) target bundleno = 3 (0x3), region = 157 }

// kernel: vit_block_forward.14
= control target key start
LH: loop header
LB: loop body
LE: loop exit
PB: predicated region body
PF: predicated region fallthrough
CT: control target
= control target key end

     0   :  { %s1557_s0 = inlined_call_operand.vmem [shape: bf16[2,17,768], index: 0, kind: input, shape index: {}, may-alias: {0,1,2}]   ;;  %s1558_s1 = inlined_call_operand.vmem [shape: bf16[2,17,768], index: 1, kind: input, shape index: {}, may-alias: {0,1,2}]   ;;  %s1559_s2 = inlined_call_operand.vmem [shape: bf16[2,17,768], index: 2, kind: input, shape index: {}, may-alias: {0,1,2}]   ;;  %s1560_s3 = inlined_call_operand.vmem [shape: bf16[2,17,256], index: 3, kind: output, shape index: {}]  }
   0x1   :  { %1562 = sst [smem:[#allocation7_spill]] %s1560_s3 }
   0x2   :  { %s1295_s12 = smov 0   ;;  %s1297_s13 = smov 0  }
   0x3   :  { %s1299_s14 = smov 0   ;;  %s1301_s15 = smov 0  }
   0x4   :  { %s1303_s16 = smov 0   ;;  %s1305_s17 = smov 0  }
   0x5   :  { %s1307_s18 = smov 0   ;;  %s1309_s19 = smov 0  }
   0x6   :  { %s1311_s20 = smov 0   ;;  %s1313_s21 = smov 0  }
   0x7   :  { %s1315_s22 = smov 0  }
   0x8 LB: > { %s22_s24 = sadd.s32 1, %s1263_s20  ;;  %s25_s25 = sadd.s32 1, %s1267_s21  ;;  %s1271_s22 = sphi %s1315_s22, %s13_s22   ;;  %s1267_s21 = sphi %s1313_s21, %s1580_s21   ;;  %s1263_s20 = sphi %s1311_s20, %s1579_s20   ;;  %s1259_s19 = sphi %s1309_s19, %s1578_s19   ;;  %s1255_s18 = sphi %s1307_s18, %s1577_s18   ;;  %s1251_s17 = sphi %s1305_s17, %s1576_s17   ;;  %s1247_s16 = sphi %s1303_s16, %s1575_s16   ;;  %s1243_s15 = sphi %s1301_s15, %s1574_s15   ;;  %s1239_s14 = sphi %s1299_s14, %s1573_s14   ;;  %s1235_s13 = sphi %s1297_s13, %s1572_s13   ;;  %s1231_s12 = sphi %s1295_s12, %s1571_s12  }
   0x9   : > { %p23_p0 = scmp.ge.s32.totalorder %s22_s24, 2  ;;  %s34_s26 = sadd.s32 1, %s1251_s17 }
   0xa   : > { %p41_p1 = scmp.ne.s32.totalorder %s1251_s17, %s1247_s16  ;;  %p42_p2 = scmp.eq.s32.totalorder %s1271_s22, 0 }
   0xb   : > { %s1582_s24 = smov (%p23_p0, %s22_s24), 0  ;;  %s1584_s25 = smov (!%p23_p0, %s25_s25), %s1267_s21 }
   0xc   : > { %s30_s27 = ssub.s32 %s1263_s20, %s1582_s24  ;;  %p27_p3 = scmp.ge.s32.totalorder %s1584_s25, 2 }
   0xd   : > { %s57_s28 = sadd.s32 2, %s1263_s20  ;;  %p1368_p4 = por %p42_p2, %p41_p1 }
   0xe   : > { %s58_s30 = sadd.s32 2, %s1582_s24  ;;  %s1586_s25 = smov (%p27_p3, %s1584_s25), 0 }
   0xf   : > { %1564 = sst [smem:[#allocation6_spill]] %s1586_s25  ;;  %s60_s4 = ssub.s32 %s57_s28, %s58_s30 }
  0x10   : > { %s64_s5 = sadd.s32 1, %s1243_s15  ;;  %s29_s6 = ssub.s32 %s1267_s21, %s1586_s25 }
  0x11   : > { %p71_p5 = scmp.ne.s32.totalorder %s1243_s15, %s1239_s14  ;;  %s31_s7 = sor.u32 %s30_s27, %s29_s6 }
  0x12   : > { %s61_s8 = sor.u32 %s60_s4, %s29_s6  ;;  %p32_p6 = scmp.eq.s32.totalorder %s31_s7, 0 }
  0x13   : > { %p62_p7 = scmp.eq.s32.totalorder %s61_s8, 0  ;;  %p1382_p8 = por %p71_p5, %p42_p2 }
  0x14   : > { %s87_s10 = sadd.s32 4, %s1263_s20  ;;  %s88_s30 = sadd.s32 4, %s1582_s24 }
  0x15   : > { %s1388_s11 = scalar_select %p32_p6, %s1251_s17, %s34_s26  }
  0x16   : > { %s1391_s28 = scalar_select %p62_p7, %s1243_s15, %s64_s5  }
  0x17   : > { %s94_s23 = sadd.s32 1, %s1235_s13  ;;  %s90_s25 = ssub.s32 %s87_s10, %s88_s30 }
  0x18   : > { %p101_p9 = scmp.ne.s32.totalorder %s1235_s13, %s1231_s12  ;;  %s91_s27 = sor.u32 %s90_s25, %s29_s6 }
  0x19   : > { %s1566_s3 = sadd.s32 4294967295, %s1271_s22   ;;  %p92_p11 = scmp.eq.s32.totalorder %s91_s27, 0 }
  0x1a   : > { %p133_p10 = scmp.eq.s32.totalorder %s1566_s3, 3  ;;  %p1401_p12 = por %p101_p9, %p42_p2 }
  0x1b   : > { %s1413_s26 = scalar_select %p92_p11, %s1235_s13, %s94_s23  }
  0x1c   : > { %p1408_p13 = por %p133_p10, %p41_p1  ;;  %p961_p0 = scmp.ge.s32.totalorder %s1271_s22, 4 }
  0x1e   : > { %155 = sbr.rel (%p961_p0) target bundleno = 64 (0x40), region = 16 }
  0x25   : > { %158 = sbr.rel (!%p1368_p4) target bundleno = 46 (0x2e), region = 20  ;;  %s160_s3 = sand.u32 (%p1368_p4), 1, %s1251_s17  }
  0x26   : > { %s1053_s25 = smul.u32 (%p1368_p4), 18, %s1267_s21 }
  0x27   : > { %s1052_s5 = smul.u32 (%p1368_p4), 12, %s160_s3 }
  0x28   : > { %s164_s6 = sadd.s32 (%p1368_p4), %s1263_s20, %s1053_s25 }
  0x29   : > { %s962_s8 = sshll.u32 (%p1368_p4), %s164_s6, 2  ;;  %s162_s23 = scalar_lea.vmem (%p1368_p4), [#allocation2], %s1052_s5 }
  0x2a   : > { %s166_s27 = scalar_lea.vmem (%p1368_p4), %s1557_s0, %s962_s8 }
  0x2b   : > { %v182_v0 = vld [vmem:[%s166_s27] sm:$0xf] (%p1368_p4)  ;;  %v184_v1 = vld [vmem:[%s166_s27 + $0x18] sm:$0xf] (%p1368_p4)  ;;  %v186_v2 = vld [vmem:[%s166_s27 + $0x30] sm:$0xf] (%p1368_p4) }
  0x2c   : > { %183 = vst [vmem:[%s162_s23] sm:$0xf] %v182_v0  ;;  %185 = vst [vmem:[%s162_s23 + $0x4] sm:$0xf] %v184_v1 }
  0x2d   : > { %187 = vst [vmem:[%s162_s23 + $0x8] sm:$0xf] %v186_v2 }
  0x2e PF: > { %216 = sbr.rel (!%p1382_p8) target bundleno = 55 (0x37), region = 61  ;;  %s218_s29 = sand.u32 (%p1382_p8), 1, %s1243_s15  }
  0x2f   : > { %s864_s3 = smul.u32 (%p1382_p8), 18, %s1267_s21 }
  0x30   : > { %s1054_s25 = smul.u32 (%p1382_p8), 12, %s218_s29 }
  0x31   : > { %s865_s6 = sadd.s32 (%p1382_p8), %s1263_s20, %s864_s3 }
  0x32   : > { %s963_s10 = sshll.u32 (%p1382_p8), %s865_s6, 2  ;;  %s220_s5 = scalar_lea.vmem (%p1382_p8), [#allocation3], %s1054_s25 }
  0x33   : > { %s867_s27 = scalar_lea.vmem (%p1382_p8), %s1558_s1, %s963_s10 }
  0x34   : > { %v964_v3 = vld [vmem:[%s867_s27 + $0x8] sm:$0xf] (%p1382_p8)  ;;  %v965_v4 = vld [vmem:[%s867_s27 + $0x20] sm:$0xf] (%p1382_p8)  ;;  %v966_v5 = vld [vmem:[%s867_s27 + $0x38] sm:$0xf] (%p1382_p8) }
  0x35   : > { %242 = vst [vmem:[%s220_s5] sm:$0xf] %v964_v3  ;;  %244 = vst [vmem:[%s220_s5 + $0x4] sm:$0xf] %v965_v4 }
  0x36   : > { %246 = vst [vmem:[%s220_s5 + $0x8] sm:$0xf] %v966_v5 }
  0x37 PF: > { %275 = sbr.rel (!%p1401_p12) target bundleno = 64 (0x40), region = 102  ;;  %s277_s9 = sand.u32 (%p1401_p12), 1, %s1235_s13  }
  0x38   : > { %s871_s23 = smul.u32 (%p1401_p12), 18, %s1267_s21 }
  0x39   : > { %s1055_s29 = smul.u32 (%p1401_p12), 12, %s277_s9 }
  0x3a   : > { %s872_s3 = sadd.s32 (%p1401_p12), %s1263_s20, %s871_s23 }
  0x3b   : > { %s967_s6 = sshll.u32 (%p1401_p12), %s872_s3, 2  ;;  %s279_s25 = scalar_lea.vmem (%p1401_p12), [#allocation4], %s1055_s29 }
  0x3c   : > { %s874_s30 = scalar_lea.vmem (%p1401_p12), %s1559_s2, %s967_s6 }
  0x3d   : > { %v968_v6 = vld [vmem:[%s874_s30 + $0x10] sm:$0xf] (%p1401_p12)  ;;  %v969_v7 = vld [vmem:[%s874_s30 + $0x28] sm:$0xf] (%p1401_p12)  ;;  %v970_v8 = vld [vmem:[%s874_s30 + $0x40] sm:$0xf] (%p1401_p12) }
  0x3e   : > { %301 = vst [vmem:[%s279_s25] sm:$0xf] %v968_v6  ;;  %303 = vst [vmem:[%s279_s25 + $0x4] sm:$0xf] %v969_v7 }
  0x3f   : > { %305 = vst [vmem:[%s279_s25 + $0x8] sm:$0xf] %v970_v8 }
  0x40 PF: > { %p971_p1 = scmp.ge.s32.totalorder %s1271_s22, 1  ;;  %p333_p2 = scmp.lt.s32.totalorder %s1271_s22, 5 }
  0x42   : > { %p334_p3 = pnand %p971_p1, %p333_p2 }
  0x43   : > { %s347_s4 = sand.u32 (!%p334_p3), 1, %s1239_s14   ;;  %s340_s27 = sand.u32 (!%p334_p3), 1, %s1247_s16   ;;  %vm412_vm0 = vcmask (!%p334_p3), 523264   ;;  %vm483_vm1 = vcmask (!%p334_p3), 131072   ;;  %vm476_vm2 = vcmask (!%p334_p3), 138240   ;;  %vm528_vm3 = vcmask (!%p334_p3), 1040384  }
  0x44   : > { %337 = sbr.rel (%p334_p3) target bundleno = 1524 (0x5f4), region = 143  ;;  %s354_s14 = sand.u32 (!%p334_p3), 1, %s1231_s12   ;;  %v1274_v42 = vmov (!%p334_p3), 0   ;;  %vm781_vm4 = vsmask.f32 (!%p334_p3), 256 }
  0x45   : > { %s1057_s5 = smul.u32 (!%p334_p3), 12, %s347_s4  ;;  %s1273_s6 = smov (!%p334_p3), 64   ;;  %v1471_v43 = vsel (!%p334_p3), %vm528_vm3, 65535, %v1274_v42  ;;  %vm782_vm5 = vmand (!%p334_p3), %vm528_vm3, %vm781_vm4 }
  0x46   : > { %s1444_s9 = smul.u32 (!%p334_p3), 12, %s340_s27 }
  0x47   : > { %s349_s23 = scalar_lea.vmem (!%p334_p3), [#allocation3], %s1057_s5  ;;  %s1058_s16 = smul.u32 (!%p334_p3), 12, %s354_s14 }
  0x48   : > { %v1446_v9 = vld [vmem:[%s349_s23] sm:$0xff] (!%p334_p3)   ;;  %v1156_v10 = vld [vmem:[%s349_s23 + $0x8] ss:$0 sps:$4 sm:$0x11] (!%p334_p3)   ;;  %s342_s29 = scalar_lea.vmem (!%p334_p3), [#allocation2], %s1444_s9  ;;  %s383_s12 = scalar_lea.vmem (!%p334_p3), [#allocation5], %s1444_s9 }
  0x49   : > { %v1157_v11 = vld [vmem:[%s342_s29] sm:$0xff] (!%p334_p3)   ;;  %1048 = vmatprep.subr.msk.bf16.mxu0 (!%p334_p3), %vm412_vm0, %v1446_v9  ;;  %v420_v12 = vsel (!%p334_p3), %vm412_vm0, %v1446_v9, 0  ;;  %v423_v13 = vsel (!%p334_p3), %vm412_vm0, %v1156_v10, 0  ;;  %v1158_v14 = vld [vmem:[%s342_s29 + $0x8] ss:$0 sps:$4 sm:$0x11] (!%p334_p3)  }
  0x4a   : > { %1017 = vmatpush3.bf16.xpose.msra.mxu0 (!%p334_p3), %v420_v12  ;;  %1020 = vmatprep.mubr.msk.bf16.mxu0 (!%p334_p3), %vm412_vm0, %v1157_v11  ;;  %s356_s3 = scalar_lea.vmem (!%p334_p3), [#allocation4], %s1058_s16 }
  0x4b   : > { %1049 = vmatprep.subr.msk.bf16.mxu0 %vm412_vm0, %v1156_v10  ;;  %v1464_v40 = vld [vmem:[%s356_s3] sm:$0xff]   ;;  %v1466_v41 = vld [vmem:[%s356_s3 + $0x8] ss:$0 sps:$4 sm:$0x11]   ;;  %s1059_s10 = smul.u32 (%p1408_p13), 6, %s1259_s19  ;;  %s1569_s27 = sld [smem:[#allocation7_spill]] (%p1408_p13) }
  0x4c   : > { %1024 = vmatprep.subr.bf16.mxu1 %v1464_v40  ;;  %v532_v44 = vand.u32 %v1466_v41, %v1471_v43 }
  0x4d   : > { %1025 = vmatpush3.bf16.msra.mxu1 %v1464_v40  ;;  %s794_s8 = sadd.s32 (%p1408_p13), %s1255_s18, %s1059_s10 }
  0x4e   : > { %1026 = vmatprep.subr.bf16.mxu1 %v532_v44  ;;  %s989_s30 = sshll.u32 (%p1408_p13), %s794_s8, 2 }
  0x51   : > { %1027 = vmatpush3.bf16.msra.mxu1 %v532_v44  ;;  %s796_s5 = scalar_lea.vmem (%p1408_p13), %s1569_s27, %s989_s30 }
  0x52   : > { %1019 = vmatpush3.bf16.xpose.msra.mxu0 %v423_v13 }
  0x59   : > { %1021 = vmatmul.mubr.msk.bf16.vlgmr.msra.gmra.mrb[0].mxu0 %vm412_vm0, %v1158_v14 }
 0x12c   : > { %v1022_v15 = vpop.f32.mrb[0].mxu0 }
 0x12d   : > { %v475_v16 = vmul.f32 0.125, %v1022_v15  ;;  %v459_v17 = vpop.f32.mrb[1].mxu0 }
 0x12e   : > { %v473_v18 = vmul.f32 0.125, %v459_v17  ;;  %v1023_v19 = vpop.f32.mrb[2].mxu0 }
 0x12f   : > { %v462_v20 = vpop.f32.mrb[3].mxu0  ;;  %v484_v21 = vsel %vm483_vm1, %v475_v16, -inf }
 0x130   : > { %v474_v22 = vmul.f32 0.125, %v462_v20  ;;  %485 = vmax.xlane.f32.xlu1 %v484_v21  ;;  %v477_v23 = vsel %vm476_vm2, %v473_v18, -inf }
 0x131   : > { %478 = vmax.xlane.f32.xlu0 %v477_v23 }
 0x132   : > { %v480_v24 = vsel %vm476_vm2, %v474_v22, -inf }
 0x135   : > { %481 = vmax.xlane.f32.xlu0 %v480_v24 }
 0x1bd   : > { %v486_v25 = vpop.xlane.xlu1 %485 }
 0x1be   : > { %v489_v26 = vsub.f32 %v475_v16, %v486_v25  ;;  %v479_v27 = vpop.xlane.xlu0 %478 }
 0x1bf   : > { %v487_v28 = vsub.f32 %v473_v18, %v479_v27 }
 0x1c0   : > { %v494_v29 = vmul.f32 1.442695, %v489_v26 }
 0x1c1   : > { %v490_v30 = vmul.f32 1.442695, %v487_v28 }
 0x1c2   : > { %v482_v31 = vpop.xlane.xlu0 %481 }
 0x1c3   : > { %1161 = vpow2.f32 %v490_v30  ;;  %v488_v32 = vsub.f32 %v474_v22, %v482_v31 }
 0x1c4   : > { %1163 = vpow2.f32 %v494_v29 }
 0x1c5   : > { %v492_v33 = vmul.f32 1.442695, %v488_v32 }
 0x1c7   : > { %1165 = vpow2.f32 %v492_v33 }
 0x1cd   : > { %v1162_v34 = vpop.eup %1161 }
 0x1ce   : > { %v496_v35 = vsel %vm476_vm2, %v1162_v34, 0.0  ;;  %v1164_v36 = vpop.eup %1163 }
 0x1cf   : > { %497 = vadd.xlane.f32.xlu1 %v496_v35  ;;  %v502_v38 = vsel %vm483_vm1, %v1164_v36, 0.0 }
 0x1d1   : > { %v1166_v37 = vpop.eup %1165 }
 0x1d2   : > { %v499_v39 = vsel %vm476_vm2, %v1166_v37, 0.0 }
 0x1d3   : > { %503 = vadd.xlane.f32.xlu1 %v502_v38  ;;  %500 = vadd.xlane.f32.xlu0 %v499_v39 }
 0x1e4   : > { %588 = vrot.lane.b32.xlu1 %v1156_v10, %s1273_s6 }
 0x1e8   : > { %582 = vrot.lane.b32.xlu1 %v1157_v11, %s1273_s6 }
 0x1e9   : > { %586 = vrot.lane.b32.xlu0 %v1446_v9, %s1273_s6 }
 0x1ec   : > { %584 = vrot.lane.b32.xlu1 %v1158_v14, %s1273_s6 }
 0x25c   : > { %v498_v45 = vpop.xlane.xlu1 %497 }
 0x25d   : > { %1167 = vrcp.f32 %v498_v45 }
 0x260   : > { %v504_v46 = vpop.xlane.xlu1 %503  ;;  %v501_v47 = vpop.xlane.xlu0 %500 }
 0x261   : > { %1169 = vrcp.f32 %v504_v46 }
 0x262   : > { %1171 = vrcp.f32 %v501_v47 }
 0x264   : > { %v587_v48 = vpop.permute.xlu0 %586  ;;  %v589_v50 = vpop.permute.xlu1 %588 }
 0x265   : > { %1050 = vmatprep.subr.msk.bf16.mxu1 %vm412_vm0, %v587_v48  ;;  %v597_v58 = vsel %vm412_vm0, %v587_v48, 0  ;;  %v600_v60 = vsel %vm412_vm0, %v589_v50, 0 }
 0x267   : > { %v1168_v49 = vpop.eup %1167 }
 0x268   : > { %v506_v54 = vmul.f32 %v1168_v49, %v1162_v34  ;;  %v583_v59 = vpop.permute.xlu1 %582 }
 0x26b   : > { %v1170_v51 = vpop.eup %1169 }
 0x26c   : > { %v1172_v52 = vpop.eup %1171  ;;  %v510_v53 = vmul.f32 %v1170_v51, %v1164_v36  ;;  %v585_v61 = vpop.permute.xlu1 %584 }
 0x26d   : > { %v508_v55 = vmul.f32 %v1172_v52, %v1166_v37 }
 0x26e   : > { %v512_v56 = vpack.c.bf16 %v510_v53, %v510_v53 }
 0x26f   : > { %v511_v57 = vpack.c.bf16 %v508_v55, %v506_v54 }
 0x271   : > { %1028 = vmatprep.mubr.msk.bf16.mxu1 %vm476_vm2, %v511_v57 }
 0x272   : > { %1029 = vmatmul.mubr.msk.bf16.vlgmr.msra.gmra.mrb[0].mxu1 %vm476_vm2, %v512_v56 }
 0x273   : > { %1033 = vmatpush3.bf16.xpose.msra.mxu1 %v597_v58  ;;  %1036 = vmatprep.mubr.msk.bf16.mxu1 %vm412_vm0, %v583_v59 }
 0x274   : > { %1051 = vmatprep.subr.msk.bf16.mxu1 %vm412_vm0, %v589_v50  ;;  %v783_v50 = vld [vmem:[%s383_s12 + $0x8] sm:$0x1] }
 0x27b   : > { %1035 = vmatpush3.bf16.xpose.msra.mxu1 %v600_v60 }
 0x282   : > { %1037 = vmatmul.mubr.msk.bf16.vlgmr.msra.gmra.mrb[4].mxu1 %vm412_vm0, %v585_v61 }
 0x345   : > { %v1488_v62 = vpop.f32.mrb[0].mxu1 }
 0x346   : > { %v1490_v63 = vpop.f32.mrb[1].mxu1 }
 0x347   : > { %v1031_v0 = vpop.f32.mrb[2].mxu1 }
 0x348   : > { %v1492_v1 = vpop.f32.mrb[3].mxu1 }
 0x355   : > { %v1038_v2 = vpop.f32.mrb[4].mxu1 }
 0x356   : > { %v636_v3 = vpop.f32.mrb[5].mxu1  ;;  %v652_v7 = vmul.f32 0.125, %v1038_v2 }
 0x357   : > { %v650_v4 = vmul.f32 0.125, %v636_v3  ;;  %v1039_v5 = vpop.f32.mrb[6].mxu1 }
 0x358   : > { %v639_v6 = vpop.f32.mrb[7].mxu1  ;;  %v659_v11 = vsel %vm483_vm1, %v652_v7, -inf }
 0x359   : > { %v651_v8 = vmul.f32 0.125, %v639_v6  ;;  %v653_v9 = vsel %vm476_vm2, %v650_v4, -inf }
 0x35a   : > { %654 = vmax.xlane.f32.xlu0 %v653_v9 }
 0x35b   : > { %v656_v10 = vsel %vm476_vm2, %v651_v8, -inf }
 0x35c   : > { %657 = vmax.xlane.f32.xlu1 %v656_v10 }
 0x35e   : > { %660 = vmax.xlane.f32.xlu0 %v659_v11 }
 0x3e7   : > { %v655_v12 = vpop.xlane.xlu0 %654 }
 0x3e8   : > { %v662_v13 = vsub.f32 %v650_v4, %v655_v12 }
 0x3e9   : > { %v658_v14 = vpop.xlane.xlu1 %657 }
 0x3ea   : > { %v665_v15 = vmul.f32 1.442695, %v662_v13  ;;  %v663_v16 = vsub.f32 %v651_v8, %v658_v14 }
 0x3eb   : > { %v661_v17 = vpop.xlane.xlu0 %660 }
 0x3ec   : > { %1173 = vpow2.f32 %v665_v15  ;;  %v667_v18 = vmul.f32 1.442695, %v663_v16  ;;  %v664_v19 = vsub.f32 %v652_v7, %v661_v17 }
 0x3ee   : > { %1175 = vpow2.f32 %v667_v18  ;;  %v669_v20 = vmul.f32 1.442695, %v664_v19 }
 0x3f0   : > { %1177 = vpow2.f32 %v669_v20 }
 0x3f6   : > { %v1174_v21 = vpop.eup %1173 }
 0x3f7   : > { %v671_v22 = vsel %vm476_vm2, %v1174_v21, 0.0 }
 0x3f8   : > { %v1176_v23 = vpop.eup %1175  ;;  %672 = vadd.xlane.f32.xlu0 %v671_v22 }
 0x3f9   : > { %v674_v26 = vsel %vm476_vm2, %v1176_v23, 0.0 }
 0x3fa   : > { %v1178_v24 = vpop.eup %1177 }
 0x3fb   : > { %v677_v25 = vsel %vm483_vm1, %v1178_v24, 0.0 }
 0x3fc   : > { %678 = vadd.xlane.f32.xlu1 %v677_v25  ;;  %675 = vadd.xlane.f32.xlu0 %v674_v26 }
 0x40d   : > { %690 = vrot.lane.b32.xlu1 %v1466_v41, %s1273_s6 }
 0x412   : > { %688 = vrot.lane.b32.xlu0 %v1464_v40, %s1273_s6 }
 0x485   : > { %v673_v27 = vpop.xlane.xlu0 %672 }
 0x486   : > { %1179 = vrcp.f32 %v673_v27 }
 0x489   : > { %v676_v28 = vpop.xlane.xlu0 %675  ;;  %v679_v29 = vpop.xlane.xlu1 %678 }
 0x48a   : > { %1181 = vrcp.f32 %v676_v28 }
 0x48b   : > { %1183 = vrcp.f32 %v679_v29 }
 0x48d   : > { %v689_v30 = vpop.permute.xlu0 %688  ;;  %v691_v31 = vpop.permute.xlu1 %690 }
 0x48e   : > { %1040 = vmatprep.subr.bf16.mxu0 %v689_v30  ;;  %v700_v32 = vand.u32 %v691_v31, %v1471_v43 }
 0x48f   : > { %1041 = vmatpush3.bf16.msra.mxu0 %v689_v30 }
 0x490   : > { %1042 = vmatprep.subr.bf16.mxu0 %v700_v32  ;;  %v1180_v33 = vpop.eup %1179 }
 0x491   : > { %v681_v36 = vmul.f32 %v1180_v33, %v1174_v21 }
 0x493   : > { %1043 = vmatpush3.bf16.msra.mxu0 %v700_v32 }
 0x494   : > { %v1182_v34 = vpop.eup %1181 }
 0x495   : > { %v1184_v35 = vpop.eup %1183  ;;  %v683_v37 = vmul.f32 %v1182_v34, %v1176_v23 }
 0x496   : > { %v685_v38 = vmul.f32 %v1184_v35, %v1178_v24 }
 0x497   : > { %v686_v39 = vpack.c.bf16 %v683_v37, %v681_v36 }
 0x498   : > { %v687_v40 = vpack.c.bf16 %v685_v38, %v685_v38 }
 0x499   : > { %1044 = vmatprep.mubr.msk.bf16.mxu0 %vm476_vm2, %v686_v39 }
 0x49a   : > { %1045 = vmatmul.mubr.msk.bf16.vlgmr.msra.gmra.mrb[4].mxu0 %vm476_vm2, %v687_v40 }
 0x56d   : > { %v1046_v41 = vpop.f32.mrb[4].mxu0 }
 0x56e   : > { %v736_v42 = vpop.f32.mrb[5].mxu0 }
 0x56f   : > { %v1150_v44 = vpack.i.bf16 %v736_v42, %v1046_v41  ;;  %v1047_v43 = vpop.f32.mrb[6].mxu0 }
 0x570   : > { %v739_v45 = vpop.f32.mrb[7].mxu0 }
 0x571   : > { %1151 = vrot.lane.b32.xlu1 %v1150_v44, %s1273_s6 }
 0x575   : > { %755 = vrot.lane.b32.xlu1 %v739_v45, %s1273_s6 }
 0x5e3   : > { %v1152_v46 = vpop.permute.xlu1 %1151 }
 0x5e4   : > { %v1154_v47 = vunpack.i.h.bf16 %v1152_v46  ;;  %v1153_v48 = vunpack.i.l.bf16 %v1152_v46 }
 0x5e5   : > { %792 = sbr.rel (!%p1408_p13) target bundleno = 1524 (0x5f4), region = 159 }
 0x5e6   : > { %v764_v49 = vsel %vm412_vm0, %v1488_v62, %v1153_v48  ;;  %v762_v53 = vsel %vm412_vm0, %v1490_v63, %v1154_v47 }
 0x5e7   : > { %v994_v51 = vpack.c.bf16 %v764_v49, %v764_v49  ;;  %v756_v52 = vpop.permute.xlu1 %755 }
 0x5e8   : > { %v763_v54 = vsel %vm412_vm0, %v1492_v1, %v756_v52 }
 0x5e9   : > { %v784_v55 = vsel %vm782_vm5, %v994_v51, %v783_v50  ;;  %v998_v56 = vpack.c.bf16 %v763_v54, %v762_v53 }
 0x5ea   : > { %785 = vst [vmem:[%s383_s12 + $0x8] sm:$0x1] %v784_v55 }
 0x5eb   : > { %999 = vst [vmem:[%s383_s12] sm:$0xff] %v998_v56  }
 0x5f1   : > { %v816_v59 = vld [vmem:[%s383_s12 + $0x8] sm:$0xf] }
 0x5f2   : > { %v812_v57 = vld [vmem:[%s383_s12] sm:$0xf]  ;;  %v814_v58 = vld [vmem:[%s383_s12 + $0x4] sm:$0xf]  ;;  %817 = vst [vmem:[%s796_s5 + $0x10] sm:$0xf] %v816_v59 }
 0x5f3   : > { %813 = vst [vmem:[%s796_s5] sm:$0xf] %v812_v57  ;;  %815 = vst [vmem:[%s796_s5 + $0x8] sm:$0xf] %v814_v58 }
 0x5f4 PF: > { %s13_s22 = sadd.s32 1, %s1271_s22   ;;  %s1570_s7 = sld [smem:[#allocation6_spill]] }
 0x5f5   : > { %p10_p4 = scmp.ge.s32.totalorder %s13_s22, 6   ;;  %s1571_s12 = smov %s1235_s13 }
 0x5f6   : > { %s1572_s13 = smov %s1413_s26  ;;  %s1573_s14 = smov %s1243_s15 }
 0x5f7   : > { %s1574_s15 = smov %s1391_s28  ;;  %s1575_s16 = smov %s1251_s17 }
 0x5f8   : > { %s1576_s17 = smov %s1388_s11  ;;  %s1577_s18 = smov %s1263_s20 }
 0x5f9   : > { %s1578_s19 = smov %s1267_s21  ;;  %s1579_s20 = smov %s1582_s24 }
 0x5fa   : > { %s1580_s21 = smov %s1570_s7  ;;  %12 = sbr.rel (!%p10_p4) target bundleno = 8 (0x8), region = 247 }

// kernel: vit_block_forward.15
= control target key start
LH: loop header
LB: loop body
LE: loop exit
PB: predicated region body
PF: predicated region fallthrough
CT: control target
= control target key end

     0   :  { %v56_v39 = vlaneseq  ;;  %s685_s1 = inlined_call_operand.vmem [shape: bf16[256,256], index: 1, kind: input, shape index: {}]   ;;  %s686_s0 = inlined_call_operand.vmem [shape: bf16[34,256], index: 0, kind: input, shape index: {}]   ;;  %s687_s2 = inlined_call_operand.vmem [shape: f32[1,256], index: 2, kind: input, shape index: {}]   ;;  %s688_s3 = inlined_call_operand.vmem [shape: bf16[34,256], index: 3, kind: input, shape index: {}]   ;;  %s689_s4 = inlined_call_operand.vmem [shape: bf16[34,256], index: 4, kind: output, shape index: {}]  }
   0x1   :  { %v460_v0 = vld [vmem:[%s685_s1 + $0x4] ss:$8 sps:$4 sm:$0xff]   ;;  %v462_v1 = vld [vmem:[%s685_s1] ss:$8 sps:$4 sm:$0xff]   ;;  %v463_v2 = vld [vmem:[%s685_s1 + $0x14] ss:$8 sps:$4 sm:$0xff]  }
   0x2   :  { %428 = vmatprep.subr.bf16.mxu1 %v460_v0  ;;  %253 = vmatprep.subr.bf16.mxu0 %v460_v0  ;;  %v465_v3 = vld [vmem:[%s685_s1 + $0x10] ss:$8 sps:$4 sm:$0xff]   ;;  %v466_v4 = vld [vmem:[%s685_s1 + $0x24] ss:$8 sps:$4 sm:$0xff]   ;;  %v468_v5 = vld [vmem:[%s685_s1 + $0x20] ss:$8 sps:$4 sm:$0xff]  }
   0x3   :  { %444 = vmatpush1.bf16.msra.mxu1 %v462_v1  ;;  %254 = vmatpush1.bf16.msra.mxu0 %v462_v1  ;;  %v469_v6 = vld [vmem:[%s685_s1 + $0x34] ss:$8 sps:$4 sm:$0xff]   ;;  %v471_v7 = vld [vmem:[%s685_s1 + $0x30] ss:$8 sps:$4 sm:$0xff]   ;;  %v472_v8 = vld [vmem:[%s685_s1 + $0x44] ss:$8 sps:$4 sm:$0xff]  }
   0x4   :  { %429 = vmatprep.subr.bf16.mxu1 %v463_v2  ;;  %255 = vmatprep.subr.bf16.mxu0 %v463_v2  ;;  %v474_v9 = vld [vmem:[%s685_s1 + $0x40] ss:$8 sps:$4 sm:$0xff]   ;;  %v475_v10 = vld [vmem:[%s685_s1 + $0x54] ss:$8 sps:$4 sm:$0xff]   ;;  %v477_v11 = vld [vmem:[%s685_s1 + $0x50] ss:$8 sps:$4 sm:$0xff]  }
   0x5   :  { %v478_v12 = vld [vmem:[%s685_s1 + $0x64] ss:$8 sps:$4 sm:$0xff]   ;;  %v510_v13 = vld [vmem:[%s686_s0 + $0x14] ss:$8 sps:$4 sm:$0xff]   ;;  %v480_v14 = vld [vmem:[%s685_s1 + $0x60] ss:$8 sps:$4 sm:$0xff]  }
   0x6   :  { %v513_v15 = vld [vmem:[%s686_s0 + $0x4] ss:$8 sps:$4 sm:$0xff]   ;;  %v481_v16 = vld [vmem:[%s685_s1 + $0x74] ss:$8 sps:$4 sm:$0xff]   ;;  %295 = vmatprep.mubr.bf16.mxu1 %v510_v13  ;;  %v483_v17 = vld [vmem:[%s685_s1 + $0x70] ss:$8 sps:$4 sm:$0xff]  }
   0x7   :  { %445 = vmatpush1.bf16.msra.mxu1 %v465_v3  ;;  %256 = vmatpush1.bf16.msra.mxu0 %v465_v3  ;;  %v484_v18 = vld [vmem:[%s685_s1 + $0x84] ss:$8 sps:$4 sm:$0xff]   ;;  %v486_v19 = vld [vmem:[%s685_s1 + $0x80] ss:$8 sps:$4 sm:$0xff]   ;;  %v487_v20 = vld [vmem:[%s685_s1 + $0x94] ss:$8 sps:$4 sm:$0xff]  }
   0x8   :  { %430 = vmatprep.subr.bf16.mxu1 %v466_v4  ;;  %257 = vmatprep.subr.bf16.mxu0 %v466_v4  ;;  %v489_v21 = vld [vmem:[%s685_s1 + $0x90] ss:$8 sps:$4 sm:$0xff]   ;;  %v490_v22 = vld [vmem:[%s685_s1 + $0xa4] ss:$8 sps:$4 sm:$0xff]   ;;  %v492_v23 = vld [vmem:[%s685_s1 + $0xa0] ss:$8 sps:$4 sm:$0xff]  }
   0x9   :  { %285 = vmatprep.mubr.bf16.mxu0 %v513_v15  ;;  %v493_v24 = vld [vmem:[%s685_s1 + $0xb4] ss:$8 sps:$4 sm:$0xff]   ;;  %v495_v25 = vld [vmem:[%s685_s1 + $0xb0] ss:$8 sps:$4 sm:$0xff]   ;;  %v496_v26 = vld [vmem:[%s685_s1 + $0xc4] ss:$8 sps:$4 sm:$0xff]  }
   0xa   :  { %v498_v27 = vld [vmem:[%s685_s1 + $0xc0] ss:$8 sps:$4 sm:$0xff]   ;;  %v499_v28 = vld [vmem:[%s685_s1 + $0xd4] ss:$8 sps:$4 sm:$0xff]   ;;  %v501_v29 = vld [vmem:[%s685_s1 + $0xd0] ss:$8 sps:$4 sm:$0xff]  }
   0xb   :  { %446 = vmatpush1.bf16.msra.mxu1 %v468_v5  ;;  %258 = vmatpush1.bf16.msra.mxu0 %v468_v5  ;;  %v502_v30 = vld [vmem:[%s685_s1 + $0xe4] ss:$8 sps:$4 sm:$0xff]   ;;  %v504_v31 = vld [vmem:[%s685_s1 + $0xe0] ss:$8 sps:$4 sm:$0xff]   ;;  %v505_v32 = vld [vmem:[%s685_s1 + $0xf4] ss:$8 sps:$4 sm:$0xff]  }
   0xc   :  { %431 = vmatprep.subr.bf16.mxu1 %v469_v6  ;;  %259 = vmatprep.subr.bf16.mxu0 %v469_v6  ;;  %v507_v33 = vld [vmem:[%s685_s1 + $0xf0] ss:$8 sps:$4 sm:$0xff]   ;;  %v21_v34 = vld [vmem:[%s686_s0 + $0x20] sm:$0x11]  ;;  %v57_v40 = vshrl.u32 %v56_v39, 7  ;;  %v315_v49 = vld [vmem:[%s688_s3 + $0x8] sm:$0xff] }
   0xd   :  { %v508_v35 = vld [vmem:[%s686_s0 + $0x10] ss:$8 sps:$4 sm:$0xff]   ;;  %v511_v36 = vld [vmem:[%s686_s0] ss:$8 sps:$4 sm:$0xff]   ;;  %v385_v37 = vcombine.high %v21_v34, %v21_v34  ;;  %v384_v38 = vcombine.low %v21_v34, %v21_v34  ;;  %v321_v61 = vunpack.c.l.bf16 %v315_v49  ;;  %v322_v3 = vunpack.c.h.bf16 %v315_v49 }
   0xe   :  { %v58_v41 = vsub.s32 0, %v57_v40  ;;  %v54_v42 = vld [vmem:[%s687_s2] sm:$0x3]  ;;  %v62_v43 = vsub.s32 1, %v57_v40  ;;  %v316_v44 = vld [vmem:[%s688_s3 + $0x10] sm:$0xff]  ;;  %v317_v48 = vld [vmem:[%s688_s3 + $0x18] sm:$0xff] }
   0xf   :  { %447 = vmatpush1.bf16.msra.mxu1 %v471_v7  ;;  %260 = vmatpush1.bf16.msra.mxu0 %v471_v7  ;;  %v314_v45 = vld [vmem:[%s688_s3] sm:$0xff]  ;;  %v323_v50 = vunpack.c.l.bf16 %v316_v44  ;;  %v324_v53 = vunpack.c.h.bf16 %v316_v44  ;;  %v325_v58 = vunpack.c.l.bf16 %v317_v48  ;;  %v326_v0 = vunpack.c.h.bf16 %v317_v48 }
  0x10   :  { %432 = vmatprep.subr.bf16.mxu1 %v472_v8  ;;  %261 = vmatprep.subr.bf16.mxu0 %v472_v8  ;;  %v59_v46 = vrot.slane %v54_v42, %v58_v41  ;;  %v63_v47 = vrot.slane %v54_v42, %v62_v43  ;;  %v319_v51 = vunpack.c.l.bf16 %v314_v45  ;;  %v320_v55 = vunpack.c.h.bf16 %v314_v45 }
  0x13   :  { %448 = vmatpush1.bf16.msra.mxu1 %v474_v9  ;;  %262 = vmatpush1.bf16.msra.mxu0 %v474_v9 }
  0x14   :  { %433 = vmatprep.subr.bf16.mxu1 %v475_v10  ;;  %263 = vmatprep.subr.bf16.mxu0 %v475_v10 }
  0x17   :  { %449 = vmatpush1.bf16.msra.mxu1 %v477_v11  ;;  %264 = vmatpush1.bf16.msra.mxu0 %v477_v11 }
  0x18   :  { %434 = vmatprep.subr.bf16.mxu1 %v478_v12  ;;  %265 = vmatprep.subr.bf16.mxu0 %v478_v12 }
  0x1b   :  { %450 = vmatpush1.bf16.msra.mxu1 %v480_v14  ;;  %266 = vmatpush1.bf16.msra.mxu0 %v480_v14  ;;  %v318_v14 = vld [vmem:[%s688_s3 + $0x20] sm:$0x11] }
  0x1c   :  { %435 = vmatprep.subr.bf16.mxu1 %v481_v16  ;;  %267 = vmatprep.subr.bf16.mxu0 %v481_v16 }
  0x1f   :  { %451 = vmatpush1.bf16.msra.mxu1 %v483_v17  ;;  %268 = vmatpush1.bf16.msra.mxu0 %v483_v17 }
  0x20   :  { %436 = vmatprep.subr.bf16.mxu1 %v484_v18  ;;  %269 = vmatprep.subr.bf16.mxu0 %v484_v18 }
  0x23   :  { %452 = vmatpush1.bf16.msra.mxu1 %v486_v19  ;;  %270 = vmatpush1.bf16.msra.mxu0 %v486_v19 }
  0x24   :  { %437 = vmatprep.subr.bf16.mxu1 %v487_v20  ;;  %271 = vmatprep.subr.bf16.mxu0 %v487_v20 }
  0x27   :  { %453 = vmatpush1.bf16.msra.mxu1 %v489_v21  ;;  %272 = vmatpush1.bf16.msra.mxu0 %v489_v21  ;;  %v327_v21 = vunpack.c.l.bf16 %v318_v14 }
  0x28   :  { %438 = vmatprep.subr.bf16.mxu1 %v490_v22  ;;  %273 = vmatprep.subr.bf16.mxu0 %v490_v22 }
  0x2b   :  { %454 = vmatpush1.bf16.msra.mxu1 %v492_v23  ;;  %274 = vmatpush1.bf16.msra.mxu0 %v492_v23 }
  0x2c   :  { %439 = vmatprep.subr.bf16.mxu1 %v493_v24  ;;  %275 = vmatprep.subr.bf16.mxu0 %v493_v24 }
  0x2f   :  { %455 = vmatpush1.bf16.msra.mxu1 %v495_v25  ;;  %276 = vmatpush1.bf16.msra.mxu0 %v495_v25  ;;  %v328_v25 = vunpack.c.h.bf16 %v318_v14 }
  0x30   :  { %440 = vmatprep.subr.bf16.mxu1 %v496_v26  ;;  %277 = vmatprep.subr.bf16.mxu0 %v496_v26 }
  0x33   :  { %456 = vmatpush1.bf16.msra.mxu1 %v498_v27  ;;  %278 = vmatpush1.bf16.msra.mxu0 %v498_v27 }
  0x34   :  { %441 = vmatprep.subr.bf16.mxu1 %v499_v28  ;;  %279 = vmatprep.subr.bf16.mxu0 %v499_v28 }
  0x37   :  { %457 = vmatpush1.bf16.msra.mxu1 %v501_v29  ;;  %280 = vmatpush1.bf16.msra.mxu0 %v501_v29 }
  0x38   :  { %442 = vmatprep.subr.bf16.mxu1 %v502_v30  ;;  %281 = vmatprep.subr.bf16.mxu0 %v502_v30 }
  0x3b   :  { %458 = vmatpush1.bf16.msra.mxu1 %v504_v31  ;;  %282 = vmatpush1.bf16.msra.mxu0 %v504_v31 }
  0x3c   :  { %443 = vmatprep.subr.bf16.mxu1 %v505_v32  ;;  %283 = vmatprep.subr.bf16.mxu0 %v505_v32 }
  0x3f   :  { %459 = vmatpush1.bf16.msra.mxu1 %v507_v33  ;;  %284 = vmatpush1.bf16.msra.mxu0 %v507_v33 }
  0x42   :  { %296 = vmatmul.mubr.bf16.vlgmr.msra.gmra.mrb[0].mxu1 %v508_v35  ;;  %286 = vmatmul.mubr.bf16.vlgmr.msra.gmra.mrb[0].mxu0 %v511_v36 }
  0x43   :  { %305 = vmatprep.mubr.bf16.mxu1 %v385_v37 }
  0x4a   :  { %306 = vmatmul.mubr.bf16.gmra.mrb[4].mxu1 %v384_v38 }
 0x115   :  { %v297_v52 = vpop.f32.mrb[0].mxu1  ;;  %v287_v54 = vpop.f32.mrb[0].mxu0 }
 0x116   :  { %v298_v56 = vadd.f32 %v297_v52, %v59_v46  ;;  %v299_v57 = vpop.f32.mrb[1].mxu1  ;;  %v288_v59 = vadd.f32 %v287_v54, %v59_v46  ;;  %v289_v60 = vpop.f32.mrb[1].mxu0 }
 0x117   :  { %v300_v62 = vadd.f32 %v299_v57, %v63_v47  ;;  %v301_v63 = vpop.f32.mrb[2].mxu1  ;;  %v290_v1 = vadd.f32 %v289_v60, %v63_v47  ;;  %v291_v2 = vpop.f32.mrb[2].mxu0 }
 0x118   :  { %v333_v4 = vadd.f32 %v323_v50, %v298_v56  ;;  %v302_v5 = vadd.f32 %v301_v63, %v59_v46  ;;  %v329_v6 = vadd.f32 %v319_v51, %v288_v59  ;;  %v303_v7 = vpop.f32.mrb[3].mxu1  ;;  %v292_v8 = vadd.f32 %v291_v2, %v59_v46  ;;  %v293_v9 = vpop.f32.mrb[3].mxu0 }
 0x119   :  { %v334_v10 = vadd.f32 %v324_v53, %v300_v62  ;;  %v304_v11 = vadd.f32 %v303_v7, %v63_v47  ;;  %v330_v12 = vadd.f32 %v320_v55, %v290_v1  ;;  %v294_v13 = vadd.f32 %v293_v9, %v63_v47 }
 0x11a   :  { %v335_v15 = vadd.f32 %v325_v58, %v302_v5  ;;  %v331_v16 = vadd.f32 %v321_v61, %v292_v8 }
 0x11b   :  { %v425_v17 = vpack.c.bf16 %v334_v10, %v333_v4  ;;  %v336_v18 = vadd.f32 %v326_v0, %v304_v11  ;;  %v423_v19 = vpack.c.bf16 %v330_v12, %v329_v6  ;;  %v332_v20 = vadd.f32 %v322_v3, %v294_v13 }
 0x11d   :  { %373 = vst [vmem:[%s689_s4 + $0x10] sm:$0xff] %v425_v17  ;;  %v426_v22 = vpack.c.bf16 %v336_v18, %v335_v15  ;;  %371 = vst [vmem:[%s689_s4] sm:$0xff] %v423_v19  ;;  %v424_v23 = vpack.c.bf16 %v332_v20, %v331_v16  ;;  %v307_v24 = vpop.f32.mrb[4].mxu1 }
 0x11e   :  { %v308_v26 = vadd.f32 %v307_v24, %v59_v46  ;;  %v309_v27 = vpop.f32.mrb[5].mxu1 }
 0x11f   :  { %374 = vst [vmem:[%s689_s4 + $0x18] sm:$0xff] %v426_v22  ;;  %372 = vst [vmem:[%s689_s4 + $0x8] sm:$0xff] %v424_v23  ;;  %v310_v28 = vadd.f32 %v309_v27, %v63_v47  ;;  %v311_v29 = vpop.f32.mrb[6].mxu1 }
 0x120   :  { %v337_v30 = vadd.f32 %v327_v21, %v308_v26  ;;  %v312_v31 = vpop.f32.mrb[7].mxu1 }
 0x121   :  { %v338_v32 = vadd.f32 %v328_v25, %v310_v28 }
 0x123   :  { %v427_v33 = vpack.c.bf16 %v338_v32, %v337_v30 }
 0x125   :  { %375 = vst [vmem:[%s689_s4 + $0x20] sm:$0x11] %v427_v33 }

// kernel: vit_block_forward.16
= control target key start
LH: loop header
LB: loop body
LE: loop exit
PB: predicated region body
PF: predicated region fallthrough
CT: control target
= control target key end

     0   :  { %s2666_s24 = smov 0   ;;  %s2668_s25 = smov 0   ;;  %s3367_s0 = inlined_call_operand.vmem [shape: bf16[34,256], index: 0, kind: input, shape index: {}]   ;;  %s3368_s1 = inlined_call_operand.vmem [shape: f32[1,256], index: 1, kind: input, shape index: {}]   ;;  %s3369_s2 = inlined_call_operand.vmem [shape: f32[1,256], index: 2, kind: input, shape index: {}]   ;;  %s3370_s3 = inlined_call_operand.vmem [shape: bf16[256,1024], index: 3, kind: input, shape index: {}]   ;;  %s3371_s4 = inlined_call_operand.vmem [shape: f32[1,1024], index: 4, kind: input, shape index: {}]   ;;  %s3372_s5 = inlined_call_operand.vmem [shape: bf16[1024,256], index: 5, kind: input, shape index: {}]   ;;  %s3373_s6 = inlined_call_operand.vmem [shape: f32[1,256], index: 6, kind: input, shape index: {}]   ;;  %s3374_s7 = inlined_call_operand.vmem [shape: bf16[34,256], index: 7, kind: output, shape index: {}]  }
   0x1   :  { %s2670_s26 = smov 0   ;;  %s2672_s27 = smov 0  }
   0x2   :  { %s2674_s28 = smov 0  }
   0x3 LB: > { %s26_s29 = sadd.s32 1, %s2619_s27  ;;  %p111_p1 = scmp.ne.s32.totalorder %s2611_s25, %s2607_s24  ;;  %s2623_s28 = sphi %s2674_s28, %s17_s28   ;;  %s2619_s27 = sphi %s2672_s27, %s3378_s27   ;;  %s2615_s26 = sphi %s2670_s26, %s3377_s26   ;;  %s2611_s25 = sphi %s2668_s25, %s3376_s25   ;;  %s2607_s24 = sphi %s2666_s24, %s3375_s24  }
   0x4   : > { %p27_p0 = scmp.ge.s32.totalorder %s26_s29, 2  ;;  %p112_p2 = scmp.eq.s32.totalorder %s2623_s28, 0 }
   0x5   : > { %s104_s8 = sadd.s32 1, %s2611_s25  ;;  %p2138_p5 = scmp.ge.s32.totalorder %s2623_s28, 2 }
   0x6   : > { %s3380_s29 = smov (%p27_p0, %s26_s29), 0  ;;  %p113_p3 = por %p112_p2, %p111_p1 }
   0x7   : > { %s101_s30 = ssub.s32 %s2619_s27, %s3380_s29  ;;  %255 = sbr.rel (%p2138_p5) target bundleno = 50 (0x32), region = 32 }
   0x8   : > { %p102_p4 = scmp.eq.s32.totalorder %s101_s30, 0 }
   0xa   : > { %s2701_s9 = scalar_select %p102_p4, %s2611_s25, %s104_s8  }
   0xe   : > { %258 = sbr.rel (!%p113_p3) target bundleno = 50 (0x32), region = 36  ;;  %s260_s10 = sand.u32 (%p113_p3), 1, %s2611_s25  }
   0xf   : > { %s2287_s11 = sshll.u32 (%p113_p3), %s2619_s27, 4  ;;  %s2139_s12 = sshll.u32 (%p113_p3), %s260_s10, 9 }
  0x10   : > { %s2709_s15 = scalar_lea.vmem (%p113_p3), %s3370_s3, %s2287_s11  ;;  %s2714_s16 = scalar_lea.vmem (%p113_p3), [#allocation3], %s2139_s12 }
  0x11   : > { %v278_v0 = vld [vmem:[%s2709_s15] sm:$0xff] (%p113_p3)  ;;  %v280_v1 = vld [vmem:[%s2709_s15 + $0x8] sm:$0xff] (%p113_p3) }
  0x12   : > { %v282_v2 = vld [vmem:[%s2709_s15 + $0x20] sm:$0xff] (%p113_p3)  ;;  %279 = vst [vmem:[%s2714_s16] sm:$0xff] (%p113_p3), %v278_v0  ;;  %281 = vst [vmem:[%s2714_s16 + $0x8] sm:$0xff] (%p113_p3), %v280_v1  ;;  %v284_v3 = vld [vmem:[%s2709_s15 + $0x28] sm:$0xff] (%p113_p3) }
  0x13   : > { %283 = vst [vmem:[%s2714_s16 + $0x10] sm:$0xff] (%p113_p3), %v282_v2  ;;  %v286_v4 = vld [vmem:[%s2709_s15 + $0x40] sm:$0xff] (%p113_p3)  ;;  %v288_v5 = vld [vmem:[%s2709_s15 + $0x48] sm:$0xff] (%p113_p3)  ;;  %285 = vst [vmem:[%s2714_s16 + $0x18] sm:$0xff] (%p113_p3), %v284_v3 }
  0x14   : > { %287 = vst [vmem:[%s2714_s16 + $0x20] sm:$0xff] (%p113_p3), %v286_v4  ;;  %289 = vst [vmem:[%s2714_s16 + $0x28] sm:$0xff] (%p113_p3), %v288_v5  ;;  %v290_v6 = vld [vmem:[%s2709_s15 + $0x60] sm:$0xff] (%p113_p3)  ;;  %v292_v7 = vld [vmem:[%s2709_s15 + $0x68] sm:$0xff] (%p113_p3) }
  0x15   : > { %v294_v8 = vld [vmem:[%s2709_s15 + $0x80] sm:$0xff]  ;;  %291 = vst [vmem:[%s2714_s16 + $0x30] sm:$0xff] %v290_v6  ;;  %293 = vst [vmem:[%s2714_s16 + $0x38] sm:$0xff] %v292_v7  ;;  %v296_v9 = vld [vmem:[%s2709_s15 + $0x88] sm:$0xff] }
  0x16   : > { %295 = vst [vmem:[%s2714_s16 + $0x40] sm:$0xff] %v294_v8  ;;  %v298_v10 = vld [vmem:[%s2709_s15 + $0xa0] sm:$0xff]  ;;  %v300_v11 = vld [vmem:[%s2709_s15 + $0xa8] sm:$0xff]  ;;  %297 = vst [vmem:[%s2714_s16 + $0x48] sm:$0xff] %v296_v9 }
  0x17   : > { %299 = vst [vmem:[%s2714_s16 + $0x50] sm:$0xff] %v298_v10  ;;  %301 = vst [vmem:[%s2714_s16 + $0x58] sm:$0xff] %v300_v11  ;;  %v302_v12 = vld [vmem:[%s2709_s15 + $0xc0] sm:$0xff]  ;;  %v304_v13 = vld [vmem:[%s2709_s15 + $0xc8] sm:$0xff] }
  0x18   : > { %v306_v14 = vld [vmem:[%s2709_s15 + $0xe0] sm:$0xff]  ;;  %303 = vst [vmem:[%s2714_s16 + $0x60] sm:$0xff] %v302_v12  ;;  %305 = vst [vmem:[%s2714_s16 + $0x68] sm:$0xff] %v304_v13  ;;  %v308_v15 = vld [vmem:[%s2709_s15 + $0xe8] sm:$0xff] }
  0x19   : > { %307 = vst [vmem:[%s2714_s16 + $0x70] sm:$0xff] %v306_v14  ;;  %v310_v16 = vld [vmem:[%s2709_s15 + $0x100] sm:$0xff]  ;;  %v312_v17 = vld [vmem:[%s2709_s15 + $0x108] sm:$0xff]  ;;  %309 = vst [vmem:[%s2714_s16 + $0x78] sm:$0xff] %v308_v15 }
  0x1a   : > { %311 = vst [vmem:[%s2714_s16 + $0x80] sm:$0xff] %v310_v16  ;;  %313 = vst [vmem:[%s2714_s16 + $0x88] sm:$0xff] %v312_v17  ;;  %v314_v18 = vld [vmem:[%s2709_s15 + $0x120] sm:$0xff]  ;;  %v316_v19 = vld [vmem:[%s2709_s15 + $0x128] sm:$0xff] }
  0x1b   : > { %v318_v20 = vld [vmem:[%s2709_s15 + $0x140] sm:$0xff]  ;;  %315 = vst [vmem:[%s2714_s16 + $0x90] sm:$0xff] %v314_v18  ;;  %317 = vst [vmem:[%s2714_s16 + $0x98] sm:$0xff] %v316_v19  ;;  %v320_v21 = vld [vmem:[%s2709_s15 + $0x148] sm:$0xff] }
  0x1c   : > { %319 = vst [vmem:[%s2714_s16 + $0xa0] sm:$0xff] %v318_v20  ;;  %v322_v22 = vld [vmem:[%s2709_s15 + $0x160] sm:$0xff]  ;;  %v324_v23 = vld [vmem:[%s2709_s15 + $0x168] sm:$0xff]  ;;  %321 = vst [vmem:[%s2714_s16 + $0xa8] sm:$0xff] %v320_v21 }
  0x1d   : > { %323 = vst [vmem:[%s2714_s16 + $0xb0] sm:$0xff] %v322_v22  ;;  %325 = vst [vmem:[%s2714_s16 + $0xb8] sm:$0xff] %v324_v23  ;;  %v326_v24 = vld [vmem:[%s2709_s15 + $0x180] sm:$0xff]  ;;  %v328_v25 = vld [vmem:[%s2709_s15 + $0x188] sm:$0xff] }
  0x1e   : > { %v330_v26 = vld [vmem:[%s2709_s15 + $0x1a0] sm:$0xff]  ;;  %327 = vst [vmem:[%s2714_s16 + $0xc0] sm:$0xff] %v326_v24  ;;  %329 = vst [vmem:[%s2714_s16 + $0xc8] sm:$0xff] %v328_v25  ;;  %v332_v27 = vld [vmem:[%s2709_s15 + $0x1a8] sm:$0xff] }
  0x1f   : > { %331 = vst [vmem:[%s2714_s16 + $0xd0] sm:$0xff] %v330_v26  ;;  %v334_v28 = vld [vmem:[%s2709_s15 + $0x1c0] sm:$0xff]  ;;  %v336_v29 = vld [vmem:[%s2709_s15 + $0x1c8] sm:$0xff]  ;;  %333 = vst [vmem:[%s2714_s16 + $0xd8] sm:$0xff] %v332_v27 }
  0x20   : > { %335 = vst [vmem:[%s2714_s16 + $0xe0] sm:$0xff] %v334_v28  ;;  %337 = vst [vmem:[%s2714_s16 + $0xe8] sm:$0xff] %v336_v29  ;;  %v338_v30 = vld [vmem:[%s2709_s15 + $0x1e0] sm:$0xff]  ;;  %v340_v31 = vld [vmem:[%s2709_s15 + $0x1e8] sm:$0xff] }
  0x21   : > { %v342_v32 = vld [vmem:[%s2709_s15 + $0x200] sm:$0xff]  ;;  %339 = vst [vmem:[%s2714_s16 + $0xf0] sm:$0xff] %v338_v30  ;;  %341 = vst [vmem:[%s2714_s16 + $0xf8] sm:$0xff] %v340_v31  ;;  %v344_v33 = vld [vmem:[%s2709_s15 + $0x208] sm:$0xff] }
  0x22   : > { %343 = vst [vmem:[%s2714_s16 + $0x100] sm:$0xff] %v342_v32  ;;  %v346_v34 = vld [vmem:[%s2709_s15 + $0x220] sm:$0xff]  ;;  %v348_v35 = vld [vmem:[%s2709_s15 + $0x228] sm:$0xff]  ;;  %345 = vst [vmem:[%s2714_s16 + $0x108] sm:$0xff] %v344_v33 }
  0x23   : > { %347 = vst [vmem:[%s2714_s16 + $0x110] sm:$0xff] %v346_v34  ;;  %349 = vst [vmem:[%s2714_s16 + $0x118] sm:$0xff] %v348_v35  ;;  %v350_v36 = vld [vmem:[%s2709_s15 + $0x240] sm:$0xff]  ;;  %v352_v37 = vld [vmem:[%s2709_s15 + $0x248] sm:$0xff] }
  0x24   : > { %v354_v38 = vld [vmem:[%s2709_s15 + $0x260] sm:$0xff]  ;;  %351 = vst [vmem:[%s2714_s16 + $0x120] sm:$0xff] %v350_v36  ;;  %353 = vst [vmem:[%s2714_s16 + $0x128] sm:$0xff] %v352_v37  ;;  %v356_v39 = vld [vmem:[%s2709_s15 + $0x268] sm:$0xff] }
  0x25   : > { %355 = vst [vmem:[%s2714_s16 + $0x130] sm:$0xff] %v354_v38  ;;  %v358_v40 = vld [vmem:[%s2709_s15 + $0x280] sm:$0xff]  ;;  %v360_v41 = vld [vmem:[%s2709_s15 + $0x288] sm:$0xff]  ;;  %357 = vst [vmem:[%s2714_s16 + $0x138] sm:$0xff] %v356_v39 }
  0x26   : > { %359 = vst [vmem:[%s2714_s16 + $0x140] sm:$0xff] %v358_v40  ;;  %361 = vst [vmem:[%s2714_s16 + $0x148] sm:$0xff] %v360_v41  ;;  %v362_v42 = vld [vmem:[%s2709_s15 + $0x2a0] sm:$0xff]  ;;  %v364_v43 = vld [vmem:[%s2709_s15 + $0x2a8] sm:$0xff] }
  0x27   : > { %v366_v44 = vld [vmem:[%s2709_s15 + $0x2c0] sm:$0xff]  ;;  %363 = vst [vmem:[%s2714_s16 + $0x150] sm:$0xff] %v362_v42  ;;  %365 = vst [vmem:[%s2714_s16 + $0x158] sm:$0xff] %v364_v43  ;;  %v368_v45 = vld [vmem:[%s2709_s15 + $0x2c8] sm:$0xff] }
  0x28   : > { %367 = vst [vmem:[%s2714_s16 + $0x160] sm:$0xff] %v366_v44  ;;  %v370_v46 = vld [vmem:[%s2709_s15 + $0x2e0] sm:$0xff]  ;;  %v372_v47 = vld [vmem:[%s2709_s15 + $0x2e8] sm:$0xff]  ;;  %369 = vst [vmem:[%s2714_s16 + $0x168] sm:$0xff] %v368_v45 }
  0x29   : > { %371 = vst [vmem:[%s2714_s16 + $0x170] sm:$0xff] %v370_v46  ;;  %373 = vst [vmem:[%s2714_s16 + $0x178] sm:$0xff] %v372_v47  ;;  %v374_v48 = vld [vmem:[%s2709_s15 + $0x300] sm:$0xff]  ;;  %v376_v49 = vld [vmem:[%s2709_s15 + $0x308] sm:$0xff] }
  0x2a   : > { %v378_v50 = vld [vmem:[%s2709_s15 + $0x320] sm:$0xff]  ;;  %375 = vst [vmem:[%s2714_s16 + $0x180] sm:$0xff] %v374_v48  ;;  %377 = vst [vmem:[%s2714_s16 + $0x188] sm:$0xff] %v376_v49  ;;  %v380_v51 = vld [vmem:[%s2709_s15 + $0x328] sm:$0xff] }
  0x2b   : > { %379 = vst [vmem:[%s2714_s16 + $0x190] sm:$0xff] %v378_v50  ;;  %v382_v52 = vld [vmem:[%s2709_s15 + $0x340] sm:$0xff]  ;;  %v384_v53 = vld [vmem:[%s2709_s15 + $0x348] sm:$0xff]  ;;  %381 = vst [vmem:[%s2714_s16 + $0x198] sm:$0xff] %v380_v51 }
  0x2c   : > { %383 = vst [vmem:[%s2714_s16 + $0x1a0] sm:$0xff] %v382_v52  ;;  %385 = vst [vmem:[%s2714_s16 + $0x1a8] sm:$0xff] %v384_v53  ;;  %v386_v54 = vld [vmem:[%s2709_s15 + $0x360] sm:$0xff]  ;;  %v388_v55 = vld [vmem:[%s2709_s15 + $0x368] sm:$0xff] }
  0x2d   : > { %v390_v56 = vld [vmem:[%s2709_s15 + $0x380] sm:$0xff]  ;;  %387 = vst [vmem:[%s2714_s16 + $0x1b0] sm:$0xff] %v386_v54  ;;  %389 = vst [vmem:[%s2714_s16 + $0x1b8] sm:$0xff] %v388_v55  ;;  %v392_v57 = vld [vmem:[%s2709_s15 + $0x388] sm:$0xff] }
  0x2e   : > { %391 = vst [vmem:[%s2714_s16 + $0x1c0] sm:$0xff] %v390_v56  ;;  %v394_v58 = vld [vmem:[%s2709_s15 + $0x3a0] sm:$0xff]  ;;  %v396_v59 = vld [vmem:[%s2709_s15 + $0x3a8] sm:$0xff]  ;;  %393 = vst [vmem:[%s2714_s16 + $0x1c8] sm:$0xff] %v392_v57 }
  0x2f   : > { %395 = vst [vmem:[%s2714_s16 + $0x1d0] sm:$0xff] %v394_v58  ;;  %397 = vst [vmem:[%s2714_s16 + $0x1d8] sm:$0xff] %v396_v59  ;;  %v398_v60 = vld [vmem:[%s2709_s15 + $0x3c0] sm:$0xff]  ;;  %v400_v61 = vld [vmem:[%s2709_s15 + $0x3c8] sm:$0xff] }
  0x30   : > { %v402_v62 = vld [vmem:[%s2709_s15 + $0x3e0] sm:$0xff]  ;;  %399 = vst [vmem:[%s2714_s16 + $0x1e0] sm:$0xff] %v398_v60  ;;  %401 = vst [vmem:[%s2714_s16 + $0x1e8] sm:$0xff] %v400_v61  ;;  %v404_v63 = vld [vmem:[%s2709_s15 + $0x3e8] sm:$0xff] }
  0x31   : > { %403 = vst [vmem:[%s2714_s16 + $0x1f0] sm:$0xff] %v402_v62  ;;  %405 = vst [vmem:[%s2714_s16 + $0x1f8] sm:$0xff] %v404_v63 }
  0x32 PF: > { %p2142_p6 = scmp.ge.s32.totalorder %s2623_s28, 1  ;;  %p428_p7 = scmp.lt.s32.totalorder %s2623_s28, 3 }
  0x34   : > { %p429_p8 = pnand %p2142_p6, %p428_p7 }
  0x35   : > { %s435_s17 = sand.u32 (!%p429_p8), 1, %s2607_s24   ;;  %s2144_s18 = sshll.u32 (!%p429_p8), %s2615_s26, 2 }
  0x36   : > { %432 = sbr.rel (%p429_p8) target bundleno = 952 (0x3b8), region = 67  ;;  %s2143_s19 = sshll.u32 (!%p429_p8), %s435_s17, 9 }
  0x37   : > { %p492_p9 = scmp.lt.s32.totalorder (!%p429_p8), %s2144_s18, 7  ;;  %s2145_s20 = sshll.u32 (!%p429_p8), %s2615_s26, 6 }
  0x38   : > { %p497_p10 = scmp.lt.s32.totalorder (!%p429_p8), %s2145_s20, 127  ;;  %s2857_s24 = scalar_lea.vmem (!%p429_p8), [#allocation3], %s2143_s19 }
  0x39   : > { %p2148_p11 = scmp.ne.s32.totalorder (!%p429_p8), %s2615_s26, 0 }
  0x3d   : > { %s3382_s18 = smov (!%p492_p9, %s2144_s18), 7  ;;  %s3384_s20 = smov (!%p497_p10, %s2145_s20), 127 }
  0x3e   : > { %s494_s23 = scalar_lea.vmem %s3371_s4, %s3382_s18  ;;  %s2288_s30 = sshll.u32 %s3384_s20, 3  ;;  %v2625_v0 = vmov (!%p2148_p11), 0.0  }
  0x3f   : > { %s2855_s11 = scalar_lea.vmem %s3372_s5, %s2288_s30  ;;  %513 = sbr.rel (%p2148_p11) target bundleno = 70 (0x46), region = 75  ;;  %514 = vst [vmem:[#allocation2] sm:$0xff] (!%p2148_p11), %v2625_v0  ;;  %515 = vst [vmem:[#allocation2 + $0x8] sm:$0xff] (!%p2148_p11), %v2625_v0 }
  0x40   : > { %516 = vst [vmem:[#allocation2 + $0x10] sm:$0xff] (!%p2148_p11), %v2625_v0  ;;  %517 = vst [vmem:[#allocation2 + $0x18] sm:$0xff] (!%p2148_p11), %v2625_v0 }
  0x41   : > { %518 = vst [vmem:[#allocation2 + $0x20] sm:$0xff] (!%p2148_p11), %v2625_v0  ;;  %519 = vst [vmem:[#allocation2 + $0x28] sm:$0xff] (!%p2148_p11), %v2625_v0 }
  0x42   : > { %520 = vst [vmem:[#allocation2 + $0x30] sm:$0xff] (!%p2148_p11), %v2625_v0  ;;  %521 = vst [vmem:[#allocation2 + $0x38] sm:$0xff] (!%p2148_p11), %v2625_v0 }
  0x43   : > { %522 = vst [vmem:[#allocation2 + $0x40] sm:$0x3] (!%p2148_p11), %v2625_v0  ;;  %523 = vst [vmem:[#allocation2 + $0x48] sm:$0x3] (!%p2148_p11), %v2625_v0 }
  0x46 PF: > { %v2863_v1 = vld [vmem:[%s3367_s0] sm:$0xff]  ;;  %v2868_v2 = vld [vmem:[%s3367_s0 + $0x10] sm:$0xff]  ;;  %v2873_v3 = vld [vmem:[%s3367_s0 + $0x8] sm:$0xff]  ;;  %vm551_vm0 = vcmask 1041408   ;;  %p2277_p12 = scmp.ne.s32.totalorder %s2615_s26, 1 }
  0x47   : > { %v529_v4 = vunpack.c.l.bf16 %v2863_v1  ;;  %v530_v5 = vunpack.c.h.bf16 %v2863_v1  ;;  %v533_v6 = vunpack.c.l.bf16 %v2868_v2  ;;  %v534_v7 = vunpack.c.h.bf16 %v2868_v2  ;;  %v2882_v8 = vld [vmem:[%s3367_s0 + $0x18] sm:$0xff]  ;;  %v2887_v9 = vld [vmem:[%s3367_s0 + $0x20] sm:$0x11] }
  0x48   : > { %v531_v10 = vunpack.c.l.bf16 %v2873_v3  ;;  %v532_v11 = vunpack.c.h.bf16 %v2873_v3  ;;  %v535_v12 = vunpack.c.l.bf16 %v2882_v8  ;;  %v536_v13 = vunpack.c.h.bf16 %v2882_v8  ;;  %v2343_v23 = vld [vmem:[%s2857_s24 + $0x4] ss:$16 sps:$4 sm:$0xff]   ;;  %v2345_v24 = vld [vmem:[%s2857_s24] ss:$16 sps:$4 sm:$0xff]  }
  0x49   : > { %v539_v14 = vadd.f32 %v530_v5, %v529_v4  ;;  %v545_v15 = vadd.f32 %v534_v7, %v533_v6  ;;  %v537_v16 = vunpack.c.l.bf16 %v2887_v9  ;;  %v538_v17 = vunpack.c.h.bf16 %v2887_v9  ;;  %v2346_v25 = vld [vmem:[%s2857_s24 + $0x24] ss:$16 sps:$4 sm:$0xff]   ;;  %1081 = vmatprep.subr.bf16.mxu1 %v2343_v23  ;;  %v2348_v26 = vld [vmem:[%s2857_s24 + $0x20] ss:$16 sps:$4 sm:$0xff]  }
  0x4a   : > { %v542_v18 = vadd.f32 %v532_v11, %v531_v10  ;;  %v548_v19 = vadd.f32 %v536_v13, %v535_v12  ;;  %1082 = vmatpush1.bf16.msra.mxu1 %v2345_v24  ;;  %v2349_v27 = vld [vmem:[%s2857_s24 + $0x44] ss:$16 sps:$4 sm:$0xff]   ;;  %v2351_v28 = vld [vmem:[%s2857_s24 + $0x40] ss:$16 sps:$4 sm:$0xff]  }
  0x4b   : > { %540 = vadd.xlane.f32.xlu0 %v539_v14  ;;  %546 = vadd.xlane.f32.xlu1 %v545_v15  ;;  %v552_v20 = vsel %vm551_vm0, %v537_v16, 0.0  ;;  %v553_v21 = vsel %vm551_vm0, %v538_v17, 0.0  ;;  %v2352_v29 = vld [vmem:[%s2857_s24 + $0x64] ss:$16 sps:$4 sm:$0xff]   ;;  %v2354_v30 = vld [vmem:[%s2857_s24 + $0x60] ss:$16 sps:$4 sm:$0xff]  }
  0x4c   : > { %v554_v22 = vadd.f32 %v553_v21, %v552_v20  ;;  %1083 = vmatprep.subr.bf16.mxu1 %v2346_v25  ;;  %v2355_v31 = vld [vmem:[%s2857_s24 + $0x84] ss:$16 sps:$4 sm:$0xff]   ;;  %v2357_v32 = vld [vmem:[%s2857_s24 + $0x80] ss:$16 sps:$4 sm:$0xff]  }
  0x4d   : > { %v2358_v33 = vld [vmem:[%s2857_s24 + $0xa4] ss:$16 sps:$4 sm:$0xff]   ;;  %v2360_v34 = vld [vmem:[%s2857_s24 + $0xa0] ss:$16 sps:$4 sm:$0xff]  }
  0x4e   : > { %1084 = vmatpush1.bf16.msra.mxu1 %v2348_v26  ;;  %v2361_v35 = vld [vmem:[%s2857_s24 + $0xc4] ss:$16 sps:$4 sm:$0xff]   ;;  %v2363_v36 = vld [vmem:[%s2857_s24 + $0xc0] ss:$16 sps:$4 sm:$0xff]  }
  0x4f   : > { %543 = vadd.xlane.f32.xlu0 %v542_v18  ;;  %549 = vadd.xlane.f32.xlu1 %v548_v19  ;;  %v2364_v37 = vld [vmem:[%s2857_s24 + $0xe4] ss:$16 sps:$4 sm:$0xff]   ;;  %v2366_v38 = vld [vmem:[%s2857_s24 + $0xe0] ss:$16 sps:$4 sm:$0xff]  }
  0x50   : > { %1085 = vmatprep.subr.bf16.mxu1 %v2349_v27  ;;  %v2367_v39 = vld [vmem:[%s2857_s24 + $0x104] ss:$16 sps:$4 sm:$0xff]   ;;  %v2369_v40 = vld [vmem:[%s2857_s24 + $0x100] ss:$16 sps:$4 sm:$0xff]  }
  0x51   : > { %v2370_v41 = vld [vmem:[%s2857_s24 + $0x124] ss:$16 sps:$4 sm:$0xff]   ;;  %v2372_v15 = vld [vmem:[%s2857_s24 + $0x120] ss:$16 sps:$4 sm:$0xff]  }
  0x52   : > { %1086 = vmatpush1.bf16.msra.mxu1 %v2351_v28  ;;  %v2376_v18 = vld [vmem:[%s2857_s24 + $0x164] ss:$16 sps:$4 sm:$0xff]   ;;  %v2378_v19 = vld [vmem:[%s2857_s24 + $0x160] ss:$16 sps:$4 sm:$0xff]   ;;  %v2393_v28 = vld [vmem:[%s2857_s24 + $0xc] ss:$16 sps:$4 sm:$0xff]  }
  0x53   : > { %555 = vadd.xlane.f32.xlu0 %v554_v22  ;;  %1087 = vmatprep.subr.bf16.mxu1 %v2352_v29  ;;  %v2379_v20 = vld [vmem:[%s2857_s24 + $0x184] ss:$16 sps:$4 sm:$0xff]   ;;  %v2381_v21 = vld [vmem:[%s2857_s24 + $0x180] ss:$16 sps:$4 sm:$0xff]  }
  0x54   : > { %v2382_v22 = vld [vmem:[%s2857_s24 + $0x1a4] ss:$16 sps:$4 sm:$0xff]   ;;  %v2384_v23 = vld [vmem:[%s2857_s24 + $0x1a0] ss:$16 sps:$4 sm:$0xff]  }
  0x55   : > { %v2385_v24 = vld [vmem:[%s2857_s24 + $0x1c4] ss:$16 sps:$4 sm:$0xff]   ;;  %v2387_v25 = vld [vmem:[%s2857_s24 + $0x1c0] ss:$16 sps:$4 sm:$0xff]  }
  0x56   : > { %1088 = vmatpush1.bf16.msra.mxu1 %v2354_v30  ;;  %v2388_v26 = vld [vmem:[%s2857_s24 + $0x1e4] ss:$16 sps:$4 sm:$0xff]   ;;  %v2390_v27 = vld [vmem:[%s2857_s24 + $0x1e0] ss:$16 sps:$4 sm:$0xff]  }
  0x57   : > { %1089 = vmatprep.subr.bf16.mxu1 %v2355_v31  ;;  %v2439_v29 = vld [vmem:[%s2855_s11 + $0x4] ss:$8 sps:$4 sm:$0xff]   ;;  %v2441_v30 = vld [vmem:[%s2855_s11] ss:$8 sps:$4 sm:$0xff]   ;;  %v2442_v31 = vld [vmem:[%s2855_s11 + $0x14] ss:$8 sps:$4 sm:$0xff]  }
  0x58   : > { %1789 = vmatprep.subr.bf16.mxu0 %v2439_v29 }
  0x59   : > { %1790 = vmatpush1.bf16.msra.mxu0 %v2441_v30 }
  0x5a   : > { %1090 = vmatpush1.bf16.msra.mxu1 %v2357_v32  ;;  %v2444_v32 = vld [vmem:[%s2855_s11 + $0x10] ss:$8 sps:$4 sm:$0xff]   ;;  %1791 = vmatprep.subr.bf16.mxu0 %v2442_v31 }
  0x5b   : > { %1091 = vmatprep.subr.bf16.mxu1 %v2358_v33  ;;  %v2445_v33 = vld [vmem:[%s2855_s11 + $0x24] ss:$8 sps:$4 sm:$0xff]  }
  0x5d   : > { %1792 = vmatpush1.bf16.msra.mxu0 %v2444_v32 }
  0x5e   : > { %1092 = vmatpush1.bf16.msra.mxu1 %v2360_v34  ;;  %v2447_v34 = vld [vmem:[%s2855_s11 + $0x20] ss:$8 sps:$4 sm:$0xff]   ;;  %1793 = vmatprep.subr.bf16.mxu0 %v2445_v33 }
  0x5f   : > { %1093 = vmatprep.subr.bf16.mxu1 %v2361_v35  ;;  %v2448_v35 = vld [vmem:[%s2855_s11 + $0x34] ss:$8 sps:$4 sm:$0xff]  }
  0x61   : > { %1794 = vmatpush1.bf16.msra.mxu0 %v2447_v34 }
  0x62   : > { %1094 = vmatpush1.bf16.msra.mxu1 %v2363_v36  ;;  %v2450_v36 = vld [vmem:[%s2855_s11 + $0x30] ss:$8 sps:$4 sm:$0xff]   ;;  %1795 = vmatprep.subr.bf16.mxu0 %v2448_v35 }
  0x63   : > { %1095 = vmatprep.subr.bf16.mxu1 %v2364_v37  ;;  %v2451_v37 = vld [vmem:[%s2855_s11 + $0x44] ss:$8 sps:$4 sm:$0xff]   ;;  %v2391_v35 = vld [vmem:[%s2857_s24 + $0x8] ss:$16 sps:$4 sm:$0xff]  }
  0x65   : > { %1796 = vmatpush1.bf16.msra.mxu0 %v2450_v36 }
  0x66   : > { %1096 = vmatpush1.bf16.msra.mxu1 %v2366_v38  ;;  %v2453_v38 = vld [vmem:[%s2855_s11 + $0x40] ss:$8 sps:$4 sm:$0xff]   ;;  %1797 = vmatprep.subr.bf16.mxu0 %v2451_v37 }
  0x67   : > { %1097 = vmatprep.subr.bf16.mxu1 %v2367_v39  ;;  %v2454_v39 = vld [vmem:[%s2855_s11 + $0x54] ss:$8 sps:$4 sm:$0xff]  }
  0x69   : > { %1798 = vmatpush1.bf16.msra.mxu0 %v2453_v38  ;;  %v2396_v38 = vld [vmem:[%s2857_s24 + $0x2c] ss:$16 sps:$4 sm:$0xff]  }
  0x6a   : > { %1098 = vmatpush1.bf16.msra.mxu1 %v2369_v40  ;;  %v2456_v40 = vld [vmem:[%s2855_s11 + $0x50] ss:$8 sps:$4 sm:$0xff]   ;;  %1799 = vmatprep.subr.bf16.mxu0 %v2454_v39 }
  0x6b   : > { %1099 = vmatprep.subr.bf16.mxu1 %v2370_v41 }
  0x6d   : > { %1800 = vmatpush1.bf16.msra.mxu0 %v2456_v40 }
  0x6e   : > { %1100 = vmatpush1.bf16.msra.mxu1 %v2372_v15 }
  0xd8   : > { %v541_v42 = vpop.xlane.xlu0 %540  ;;  %v547_v43 = vpop.xlane.xlu1 %546 }
  0xd9   : > { %v558_v44 = vmul.f32 0.00390625, %v541_v42  ;;  %v560_v45 = vmul.f32 0.00390625, %v547_v43  ;;  %v2457_v42 = vld [vmem:[%s2855_s11 + $0x64] ss:$8 sps:$4 sm:$0xff]  }
  0xda   : > { %1801 = vmatprep.subr.bf16.mxu0 %v2457_v42  ;;  %v2399_v42 = vld [vmem:[%s2857_s24 + $0x4c] ss:$16 sps:$4 sm:$0xff]  }
  0xdb   : > { %v2938_v46 = vsub.f32 %v529_v4, %v558_v44  ;;  %v2942_v47 = vsub.f32 %v530_v5, %v558_v44  ;;  %v2946_v48 = vsub.f32 %v533_v6, %v560_v45  ;;  %v2950_v49 = vsub.f32 %v534_v7, %v560_v45 }
  0xdc   : > { %v544_v50 = vpop.xlane.xlu0 %543  ;;  %v550_v51 = vpop.xlane.xlu1 %549  ;;  %v627_v44 = vlaneseq }
  0xdd   : > { %v559_v52 = vmul.f32 0.00390625, %v544_v50  ;;  %v561_v53 = vmul.f32 0.00390625, %v550_v51  ;;  %v573_v54 = vmul.f32 %v2938_v46, %v2938_v46  ;;  %v574_v55 = vmul.f32 %v2942_v47, %v2942_v47  ;;  %v2459_v51 = vld [vmem:[%s2855_s11 + $0x60] ss:$8 sps:$4 sm:$0xff]  }
  0xde   : > { %v577_v56 = vmul.f32 %v2946_v48, %v2946_v48  ;;  %v578_v57 = vmul.f32 %v2950_v49, %v2950_v49  ;;  %1802 = vmatpush1.bf16.msra.mxu0 %v2459_v51  ;;  %v2397_v51 = vld [vmem:[%s2857_s24 + $0x48] ss:$16 sps:$4 sm:$0xff]  }
  0xdf   : > { %v2962_v58 = vsub.f32 %v531_v10, %v559_v52  ;;  %v2966_v59 = vsub.f32 %v532_v11, %v559_v52  ;;  %v2970_v60 = vsub.f32 %v535_v12, %v561_v53  ;;  %v2974_v61 = vsub.f32 %v536_v13, %v561_v53 }
  0xe0   : > { %v556_v62 = vpop.xlane.xlu0 %555  ;;  %v583_v63 = vadd.f32 %v574_v55, %v573_v54  ;;  %v589_v4 = vadd.f32 %v578_v57, %v577_v56  ;;  %v2460_v54 = vld [vmem:[%s2855_s11 + $0x74] ss:$8 sps:$4 sm:$0xff]   ;;  %v3027_v57 = vshrl.u32 %v627_v44, 7 }
  0xe1   : > { %v562_v0 = vmul.f32 0.00390625, %v556_v62  ;;  %v575_v1 = vmul.f32 %v2962_v58, %v2962_v58  ;;  %v576_v2 = vmul.f32 %v2966_v59, %v2966_v59  ;;  %v579_v3 = vmul.f32 %v2970_v60, %v2970_v60  ;;  %1803 = vmatprep.subr.bf16.mxu0 %v2460_v54 }
  0xe2   : > { %584 = vadd.xlane.f32.xlu1 %v583_v63  ;;  %v580_v5 = vmul.f32 %v2974_v61, %v2974_v61 }
  0xe3   : > { %v2986_v6 = vsub.f32 %v537_v16, %v562_v0  ;;  %v2990_v7 = vsub.f32 %v538_v17, %v562_v0  ;;  %v586_v8 = vadd.f32 %v576_v2, %v575_v1  ;;  %v2373_v16 = vld [vmem:[%s2857_s24 + $0x144] ss:$16 sps:$4 sm:$0xff]   ;;  %v2375_v17 = vld [vmem:[%s2857_s24 + $0x140] ss:$16 sps:$4 sm:$0xff]  }
  0xe4   : > { %v592_v10 = vadd.f32 %v580_v5, %v579_v3  ;;  %1101 = vmatprep.subr.bf16.mxu1 %v2373_v16  ;;  %v2462_v0 = vld [vmem:[%s2855_s11 + $0x70] ss:$8 sps:$4 sm:$0xff]   ;;  %v3031_v5 = vsub.s32 0, %v3027_v57 }
  0xe5   : > { %587 = vadd.xlane.f32.xlu0 %v586_v8  ;;  %v581_v11 = vmul.f32 %v2986_v6, %v2986_v6  ;;  %v582_v12 = vmul.f32 %v2990_v7, %v2990_v7  ;;  %1102 = vmatpush1.bf16.msra.mxu1 %v2375_v17  ;;  %v3034_v8 = vsub.s32 1, %v3027_v57 }
  0xe6   : > { %590 = vadd.xlane.f32.xlu1 %v589_v4  ;;  %1103 = vmatprep.subr.bf16.mxu1 %v2376_v18 }
  0xe7   : > { %v595_v13 = vsel %vm551_vm0, %v581_v11, 0.0  ;;  %v596_v9 = vsel %vm551_vm0, %v582_v12, 0.0  ;;  %v625_v11 = vld [vmem:[%s3368_s1] sm:$0x3]  ;;  %1804 = vmatpush1.bf16.msra.mxu0 %v2462_v0 }
  0xe8   : > { %v597_v14 = vadd.f32 %v596_v9, %v595_v13  ;;  %v630_v12 = vrot.slane %v625_v11, %v3031_v5  ;;  %v634_v13 = vrot.slane %v625_v11, %v3034_v8  ;;  %v2412_v11 = vld [vmem:[%s2857_s24 + $0xe8] ss:$16 sps:$4 sm:$0xff]  }
  0xe9   : > { %593 = vadd.xlane.f32.xlu0 %v592_v10  ;;  %1104 = vmatpush1.bf16.msra.mxu1 %v2378_v19 }
  0xea   : > { %598 = vadd.xlane.f32.xlu1 %v597_v14  ;;  %1105 = vmatprep.subr.bf16.mxu1 %v2379_v20  ;;  %v647_v14 = vld [vmem:[%s3369_s2] sm:$0x3] }
  0xeb   : > { %v652_v19 = vrot.slane %v647_v14, %v3031_v5  ;;  %v656_v20 = vrot.slane %v647_v14, %v3034_v8  ;;  %v2418_v14 = vld [vmem:[%s2857_s24 + $0x128] ss:$16 sps:$4 sm:$0xff]  }
  0xed   : > { %1106 = vmatpush1.bf16.msra.mxu1 %v2381_v21 }
  0xee   : > { %1107 = vmatprep.subr.bf16.mxu1 %v2382_v22 }
  0xf1   : > { %1108 = vmatpush1.bf16.msra.mxu1 %v2384_v23 }
  0xf2   : > { %1109 = vmatprep.subr.bf16.mxu1 %v2385_v24 }
  0xf5   : > { %1110 = vmatpush1.bf16.msra.mxu1 %v2387_v25 }
  0xf6   : > { %1111 = vmatprep.subr.bf16.mxu1 %v2388_v26 }
  0xf9   : > { %1112 = vmatpush1.bf16.msra.mxu1 %v2390_v27 }
  0xfa   : > { %1142 = vmatprep.subr.bf16.mxu1 %v2393_v28 }
 0x16f   : > { %v585_v41 = vpop.xlane.xlu1 %584 }
 0x170   : > { %v600_v43 = vmul.f32 0.00390625, %v585_v41 }
 0x172   : > { %v605_v45 = vadd.f32 1e-06, %v600_v43  ;;  %v588_v50 = vpop.xlane.xlu0 %587 }
 0x173   : > { %v591_v52 = vpop.xlane.xlu1 %590  ;;  %v601_v53 = vmul.f32 0.00390625, %v588_v50 }
 0x174   : > { %2535 = vrsqrt.f32 %v605_v45  ;;  %v602_v55 = vmul.f32 0.00390625, %v591_v52 }
 0x175   : > { %v606_v56 = vadd.f32 1e-06, %v601_v53  ;;  %v2402_v53 = vld [vmem:[%s2857_s24 + $0x6c] ss:$16 sps:$4 sm:$0xff]  }
 0x176   : > { %v607_v62 = vadd.f32 1e-06, %v602_v55  ;;  %v594_v63 = vpop.xlane.xlu0 %593 }
 0x177   : > { %2537 = vrsqrt.f32 %v606_v56  ;;  %v603_v1 = vmul.f32 0.00390625, %v594_v63  ;;  %v599_v2 = vpop.xlane.xlu1 %598  ;;  %v2405_v56 = vld [vmem:[%s2857_s24 + $0x8c] ss:$16 sps:$4 sm:$0xff]   ;;  %v2403_v63 = vld [vmem:[%s2857_s24 + $0x88] ss:$16 sps:$4 sm:$0xff]  }
 0x178   : > { %2539 = vrsqrt.f32 %v607_v62  ;;  %v604_v3 = vmul.f32 0.00390625, %v599_v2  ;;  %v2406_v2 = vld [vmem:[%s2857_s24 + $0xa8] ss:$16 sps:$4 sm:$0xff]  }
 0x179   : > { %v608_v4 = vadd.f32 1e-06, %v603_v1  ;;  %v2408_v1 = vld [vmem:[%s2857_s24 + $0xac] ss:$16 sps:$4 sm:$0xff]  }
 0x17a   : > { %v609_v10 = vadd.f32 1e-06, %v604_v3  ;;  %v2411_v3 = vld [vmem:[%s2857_s24 + $0xcc] ss:$16 sps:$4 sm:$0xff]  }
 0x17b   : > { %2541 = vrsqrt.f32 %v608_v4  ;;  %v2409_v4 = vld [vmem:[%s2857_s24 + $0xc8] ss:$16 sps:$4 sm:$0xff]  }
 0x17c   : > { %2543 = vrsqrt.f32 %v609_v10  ;;  %v2414_v10 = vld [vmem:[%s2857_s24 + $0xec] ss:$16 sps:$4 sm:$0xff]  }
 0x17e   : > { %v2536_v9 = vpop.eup %2535 }
 0x17f   : > { %v616_v15 = vmul.f32 %v2536_v9, %v2942_v47  ;;  %v615_v16 = vmul.f32 %v2536_v9, %v2938_v46  ;;  %v2420_v9 = vld [vmem:[%s2857_s24 + $0x12c] ss:$16 sps:$4 sm:$0xff]  }
 0x181   : > { %v2538_v17 = vpop.eup %2537  ;;  %v638_v18 = vmul.f32 %v634_v13, %v616_v15  ;;  %v637_v21 = vmul.f32 %v630_v12, %v615_v16  ;;  %v2423_v15 = vld [vmem:[%s2857_s24 + $0x14c] ss:$16 sps:$4 sm:$0xff]   ;;  %v2421_v16 = vld [vmem:[%s2857_s24 + $0x148] ss:$16 sps:$4 sm:$0xff]  }
 0x182   : > { %v2540_v22 = vpop.eup %2539  ;;  %v618_v23 = vmul.f32 %v2538_v17, %v2966_v59  ;;  %v617_v24 = vmul.f32 %v2538_v17, %v2962_v58  ;;  %v2426_v17 = vld [vmem:[%s2857_s24 + $0x16c] ss:$16 sps:$4 sm:$0xff]  }
 0x183   : > { %v620_v25 = vmul.f32 %v2540_v22, %v2950_v49  ;;  %v660_v46 = vadd.f32 %v656_v20, %v638_v18  ;;  %v659_v28 = vadd.f32 %v652_v19, %v637_v21  ;;  %v619_v59 = vmul.f32 %v2540_v22, %v2946_v48  ;;  %v2424_v18 = vld [vmem:[%s2857_s24 + $0x168] ss:$16 sps:$4 sm:$0xff]   ;;  %v2432_v21 = vld [vmem:[%s2857_s24 + $0x1ac] ss:$16 sps:$4 sm:$0xff]  }
 0x184   : > { %v640_v26 = vmul.f32 %v634_v13, %v618_v23  ;;  %v639_v27 = vmul.f32 %v630_v12, %v617_v24  ;;  %v2430_v22 = vld [vmem:[%s2857_s24 + $0x1a8] ss:$16 sps:$4 sm:$0xff]   ;;  %v2435_v23 = vld [vmem:[%s2857_s24 + $0x1cc] ss:$16 sps:$4 sm:$0xff]  }
 0x185   : > { %v2542_v47 = vpop.eup %2541  ;;  %v642_v29 = vmul.f32 %v634_v13, %v620_v25  ;;  %v641_v48 = vmul.f32 %v630_v12, %v619_v59  ;;  %v2433_v24 = vld [vmem:[%s2857_s24 + $0x1c8] ss:$16 sps:$4 sm:$0xff]   ;;  %v2438_v25 = vld [vmem:[%s2857_s24 + $0x1ec] ss:$16 sps:$4 sm:$0xff]  }
 0x186   : > { %v2544_v30 = vpop.eup %2543  ;;  %v662_v31 = vadd.f32 %v656_v20, %v640_v26  ;;  %v661_v32 = vadd.f32 %v652_v19, %v639_v27  ;;  %v622_v33 = vmul.f32 %v2542_v47, %v2974_v61  ;;  %v621_v34 = vmul.f32 %v2542_v47, %v2970_v60  ;;  %v2436_v26 = vld [vmem:[%s2857_s24 + $0x1e8] ss:$16 sps:$4 sm:$0xff]   ;;  %v2463_v27 = vld [vmem:[%s2855_s11 + $0x84] ss:$8 sps:$4 sm:$0xff]   ;;  %v2478_v59 = vld [vmem:[%s2855_s11 + $0xd4] ss:$8 sps:$4 sm:$0xff]  }
 0x187   : > { %v624_v58 = vmul.f32 %v2544_v30, %v2990_v7  ;;  %v664_v40 = vadd.f32 %v656_v20, %v642_v29  ;;  %v2394_v7 = vld [vmem:[%s2857_s24 + $0x28] ss:$16 sps:$4 sm:$0xff]   ;;  %v623_v44 = vmul.f32 %v2544_v30, %v2986_v6  ;;  %v663_v50 = vadd.f32 %v652_v19, %v641_v48  ;;  %1805 = vmatprep.subr.bf16.mxu0 %v2463_v27  ;;  %v2469_v29 = vld [vmem:[%s2855_s11 + $0xa4] ss:$8 sps:$4 sm:$0xff]  }
 0x188   : > { %v670_v49 = vpack.c.bf16 %v662_v31, %v660_v46  ;;  %v3056_v36 = vpack.c.bf16 %v661_v32, %v659_v28  ;;  %v644_v37 = vmul.f32 %v634_v13, %v622_v33  ;;  %v643_v39 = vmul.f32 %v630_v12, %v621_v34  ;;  %v2400_v6 = vld [vmem:[%s2857_s24 + $0x68] ss:$16 sps:$4 sm:$0xff]   ;;  %v2466_v46 = vld [vmem:[%s2855_s11 + $0x94] ss:$8 sps:$4 sm:$0xff]   ;;  %v2475_v33 = vld [vmem:[%s2855_s11 + $0xc4] ss:$8 sps:$4 sm:$0xff]  }
 0x189   : > { %v646_v61 = vmul.f32 %v634_v13, %v624_v58  ;;  %v645_v54 = vmul.f32 %v630_v12, %v623_v44  ;;  %v2417_v12 = vld [vmem:[%s2857_s24 + $0x10c] ss:$16 sps:$4 sm:$0xff]   ;;  %v2415_v13 = vld [vmem:[%s2857_s24 + $0x108] ss:$16 sps:$4 sm:$0xff]  }
 0x18a   : > { %1113 = vmatprep.mubr.bf16.mxu1 %v670_v49  ;;  %v666_v41 = vadd.f32 %v656_v20, %v644_v37  ;;  %v665_v43 = vadd.f32 %v652_v19, %v643_v39  ;;  %v2465_v47 = vld [vmem:[%s2855_s11 + $0x80] ss:$8 sps:$4 sm:$0xff]   ;;  %v2468_v28 = vld [vmem:[%s2855_s11 + $0x90] ss:$8 sps:$4 sm:$0xff]   ;;  %v2472_v31 = vld [vmem:[%s2855_s11 + $0xb4] ss:$8 sps:$4 sm:$0xff]  }
 0x18b   : > { %1114 = vmatmul.mubr.bf16.vlgmr.msra.gmra.mrb[0].mxu1 %v3056_v36  ;;  %v668_v45 = vadd.f32 %v656_v20, %v646_v61  ;;  %v667_v62 = vadd.f32 %v652_v19, %v645_v54  ;;  %v2429_v19 = vld [vmem:[%s2857_s24 + $0x18c] ss:$16 sps:$4 sm:$0xff]   ;;  %v2427_v20 = vld [vmem:[%s2857_s24 + $0x188] ss:$16 sps:$4 sm:$0xff]   ;;  %1806 = vmatpush1.bf16.msra.mxu0 %v2465_v47  ;;  %v3121_v39 = vld [vmem:[%s494_s23] sm:$0xf] }
 0x18c   : > { %1143 = vmatpush1.bf16.msra.mxu1 %v2391_v35  ;;  %v3060_v60 = vpack.c.bf16 %v666_v41, %v664_v40  ;;  %v3067_v52 = vpack.c.bf16 %v665_v43, %v663_v50  ;;  %1807 = vmatprep.subr.bf16.mxu0 %v2466_v46  ;;  %v2471_v30 = vld [vmem:[%s2855_s11 + $0xa0] ss:$8 sps:$4 sm:$0xff]   ;;  %v2474_v32 = vld [vmem:[%s2855_s11 + $0xb0] ss:$8 sps:$4 sm:$0xff]   ;;  %v744_v40 = vrot.slane %v3121_v39, %v3031_v5 }
 0x18d   : > { %1144 = vmatprep.subr.bf16.mxu1 %v2396_v38  ;;  %v674_v55 = vpack.c.bf16 %v668_v45, %v668_v45  ;;  %v673_v0 = vpack.c.bf16 %v667_v62, %v667_v62  ;;  %v2477_v34 = vld [vmem:[%s2855_s11 + $0xc0] ss:$8 sps:$4 sm:$0xff]   ;;  %v2480_v58 = vld [vmem:[%s2855_s11 + $0xd0] ss:$8 sps:$4 sm:$0xff]   ;;  %v2489_v38 = vld [vmem:[%s2855_s11 + $0x104] ss:$8 sps:$4 sm:$0xff]   ;;  %v748_v41 = vrot.slane %v3121_v39, %v3034_v8 }
 0x18e   : > { %1123 = vmatprep.mubr.bf16.mxu1 %v3060_v60  ;;  %v2483_v35 = vld [vmem:[%s2855_s11 + $0xe0] ss:$8 sps:$4 sm:$0xff]   ;;  %v2486_v37 = vld [vmem:[%s2855_s11 + $0xf0] ss:$8 sps:$4 sm:$0xff]  }
 0x18f   : > { %1808 = vmatpush1.bf16.msra.mxu0 %v2468_v28 }
 0x190   : > { %1145 = vmatpush1.bf16.msra.mxu1 %v2394_v7  ;;  %1809 = vmatprep.subr.bf16.mxu0 %v2469_v29 }
 0x191   : > { %1146 = vmatprep.subr.bf16.mxu1 %v2399_v42 }
 0x193   : > { %1124 = vmatmul.mubr.bf16.gmra.mrb[4].mxu1 %v3067_v52  ;;  %1810 = vmatpush1.bf16.msra.mxu0 %v2471_v30 }
 0x194   : > { %1147 = vmatpush1.bf16.msra.mxu1 %v2397_v51  ;;  %1133 = vmatprep.mubr.bf16.mxu1 %v674_v55 }
 0x195   : > { %1148 = vmatprep.subr.bf16.mxu1 %v2402_v53  ;;  %1811 = vmatprep.subr.bf16.mxu0 %v2472_v31 }
 0x197   : > { %1812 = vmatpush1.bf16.msra.mxu0 %v2474_v32 }
 0x198   : > { %1149 = vmatpush1.bf16.msra.mxu1 %v2400_v6  ;;  %1813 = vmatprep.subr.bf16.mxu0 %v2475_v33 }
 0x199   : > { %1150 = vmatprep.subr.bf16.mxu1 %v2405_v56 }
 0x19b   : > { %1134 = vmatmul.mubr.bf16.gmra.mrb[8].mxu1 %v673_v0  ;;  %1814 = vmatpush1.bf16.msra.mxu0 %v2477_v34 }
 0x19c   : > { %1151 = vmatpush1.bf16.msra.mxu1 %v2403_v63  ;;  %1174 = vmatprep.mubr.bf16.mxu1 %v670_v49  ;;  %v2481_v49 = vld [vmem:[%s2855_s11 + $0xe4] ss:$8 sps:$4 sm:$0xff]  }
 0x19d   : > { %1152 = vmatprep.subr.bf16.mxu1 %v2408_v1  ;;  %1815 = vmatprep.subr.bf16.mxu0 %v2478_v59 }
 0x19f   : > { %1816 = vmatpush1.bf16.msra.mxu0 %v2480_v58 }
 0x1a0   : > { %1153 = vmatpush1.bf16.msra.mxu1 %v2406_v2  ;;  %1817 = vmatprep.subr.bf16.mxu0 %v2481_v49 }
 0x1a1   : > { %1154 = vmatprep.subr.bf16.mxu1 %v2411_v3 }
 0x1a3   : > { %1818 = vmatpush1.bf16.msra.mxu0 %v2483_v35 }
 0x1a4   : > { %1155 = vmatpush1.bf16.msra.mxu1 %v2409_v4 }
 0x1a5   : > { %1156 = vmatprep.subr.bf16.mxu1 %v2414_v10 }
 0x1a8   : > { %1157 = vmatpush1.bf16.msra.mxu1 %v2412_v11 }
 0x1a9   : > { %1158 = vmatprep.subr.bf16.mxu1 %v2417_v12 }
 0x1ac   : > { %1159 = vmatpush1.bf16.msra.mxu1 %v2415_v13 }
 0x1ad   : > { %1160 = vmatprep.subr.bf16.mxu1 %v2420_v9 }
 0x1b0   : > { %1161 = vmatpush1.bf16.msra.mxu1 %v2418_v14 }
 0x1b1   : > { %1162 = vmatprep.subr.bf16.mxu1 %v2423_v15 }
 0x1b4   : > { %1163 = vmatpush1.bf16.msra.mxu1 %v2421_v16 }
 0x1b5   : > { %1164 = vmatprep.subr.bf16.mxu1 %v2426_v17 }
 0x1b8   : > { %1165 = vmatpush1.bf16.msra.mxu1 %v2424_v18 }
 0x1b9   : > { %1166 = vmatprep.subr.bf16.mxu1 %v2429_v19 }
 0x1bc   : > { %1167 = vmatpush1.bf16.msra.mxu1 %v2427_v20 }
 0x1bd   : > { %1168 = vmatprep.subr.bf16.mxu1 %v2432_v21 }
 0x1c0   : > { %1169 = vmatpush1.bf16.msra.mxu1 %v2430_v22 }
 0x1c1   : > { %1170 = vmatprep.subr.bf16.mxu1 %v2435_v23 }
 0x1c4   : > { %1171 = vmatpush1.bf16.msra.mxu1 %v2433_v24 }
 0x1c5   : > { %1172 = vmatprep.subr.bf16.mxu1 %v2438_v25 }
 0x1c8   : > { %1173 = vmatpush1.bf16.msra.mxu1 %v2436_v26 }
 0x1cb   : > { %1175 = vmatmul.mubr.bf16.vlgmr.msra.gmra.mrb[12].mxu1 %v3056_v36  ;;  %v2484_v36 = vld [vmem:[%s2855_s11 + $0xf4] ss:$8 sps:$4 sm:$0xff]  }
 0x1cc   : > { %1184 = vmatprep.mubr.bf16.mxu1 %v3060_v60  ;;  %1819 = vmatprep.subr.bf16.mxu0 %v2484_v36 }
 0x1cd   : > { %1820 = vmatpush1.bf16.msra.mxu0 %v2486_v37 }
 0x1ce   : > { %1850 = vmatprep.subr.bf16.mxu0 %v2489_v38 }
 0x1d3   : > { %1185 = vmatmul.mubr.bf16.gmra.mrb[16].mxu1 %v3067_v52 }
 0x1d4   : > { %1194 = vmatprep.mubr.bf16.mxu1 %v674_v55 }
 0x1db   : > { %1195 = vmatmul.mubr.bf16.gmra.mrb[20].mxu1 %v673_v0 }
 0x25e   : > { %v1115_v61 = vpop.f32.mrb[0].mxu1 }
 0x25f   : > { %v3127_v48 = vadd.f32 %v1115_v61, %v744_v40  ;;  %v1117_v60 = vpop.f32.mrb[1].mxu1 }
 0x260   : > { %v3129_v7 = vadd.f32 %v1117_v60, %v748_v41  ;;  %v1119_v42 = vpop.f32.mrb[2].mxu1 }
 0x261   : > { %v1223_v43 = vmul.f32 0.044715, %v3127_v48  ;;  %v3132_v44 = vadd.f32 %v1119_v42, %v744_v40  ;;  %v1121_v45 = vpop.f32.mrb[3].mxu1 }
 0x262   : > { %v1224_v50 = vmul.f32 0.044715, %v3129_v7  ;;  %v3135_v51 = vadd.f32 %v1121_v45, %v748_v41 }
 0x263   : > { %v1243_v52 = vmul.f32 %v1223_v43, %v3127_v48  ;;  %v1227_v53 = vmul.f32 0.044715, %v3132_v44 }
 0x264   : > { %v1228_v54 = vmul.f32 0.044715, %v3135_v51  ;;  %v1244_v55 = vmul.f32 %v1224_v50, %v3129_v7 }
 0x265   : > { %v1263_v6 = vmul.f32 %v1243_v52, %v3127_v48  ;;  %v1247_v56 = vmul.f32 %v1227_v53, %v3132_v44 }
 0x266   : > { %v1125_v62 = vpop.f32.mrb[4].mxu1  ;;  %v1248_v63 = vmul.f32 %v1228_v54, %v3135_v51  ;;  %v1264_v0 = vmul.f32 %v1244_v55, %v3129_v7 }
 0x267   : > { %v1267_v1 = vmul.f32 %v1247_v56, %v3132_v44  ;;  %v3146_v2 = vadd.f32 %v1125_v62, %v744_v40  ;;  %v1127_v3 = vpop.f32.mrb[5].mxu1  ;;  %v1283_v4 = vadd.f32 %v1263_v6, %v3127_v48 }
 0x268   : > { %v3149_v10 = vadd.f32 %v1127_v3, %v748_v41  ;;  %v1129_v11 = vpop.f32.mrb[6].mxu1  ;;  %v1268_v12 = vmul.f32 %v1248_v63, %v3135_v51  ;;  %v1284_v13 = vadd.f32 %v1264_v0, %v3129_v7  ;;  %v1207_v3 = vmul.f32 0.5, %v3132_v44 }
 0x269   : > { %v1231_v9 = vmul.f32 0.044715, %v3146_v2  ;;  %v3154_v14 = vadd.f32 %v1129_v11, %v744_v40  ;;  %v1131_v15 = vpop.f32.mrb[7].mxu1  ;;  %v1287_v16 = vadd.f32 %v1267_v1, %v3132_v44  ;;  %v1303_v17 = vmul.f32 0.7978846, %v1283_v4 }
 0x26a   : > { %v1232_v18 = vmul.f32 0.044715, %v3149_v10  ;;  %v3158_v19 = vadd.f32 %v1131_v15, %v748_v41  ;;  %v1288_v20 = vadd.f32 %v1268_v12, %v3135_v51  ;;  %v1304_v21 = vmul.f32 0.7978846, %v1284_v13 }
 0x26b   : > { %v1251_v22 = vmul.f32 %v1231_v9, %v3146_v2  ;;  %v1235_v23 = vmul.f32 0.044715, %v3154_v14  ;;  %v1307_v24 = vmul.f32 0.7978846, %v1287_v16  ;;  %2545 = vtanh.f32 %v1303_v17 }
 0x26c   : > { %v1252_v25 = vmul.f32 %v1232_v18, %v3149_v10  ;;  %v1236_v26 = vmul.f32 0.044715, %v3158_v19  ;;  %v1308_v27 = vmul.f32 0.7978846, %v1288_v20  ;;  %2547 = vtanh.f32 %v1304_v21 }
 0x26d   : > { %v1271_v47 = vmul.f32 %v1251_v22, %v3146_v2  ;;  %v1255_v46 = vmul.f32 %v1235_v23, %v3154_v14  ;;  %2549 = vtanh.f32 %v1307_v24  ;;  %v1203_v1 = vmul.f32 0.5, %v3127_v48  ;;  %v2487_v22 = vld [vmem:[%s2855_s11 + $0x100] ss:$8 sps:$4 sm:$0xff]   ;;  %v2492_v24 = vld [vmem:[%s2855_s11 + $0x114] ss:$8 sps:$4 sm:$0xff]  }
 0x26e   : > { %v1272_v28 = vmul.f32 %v1252_v25, %v3149_v10  ;;  %v1256_v29 = vmul.f32 %v1236_v26, %v3158_v19  ;;  %v1135_v30 = vpop.f32.mrb[8].mxu1  ;;  %2551 = vtanh.f32 %v1308_v27  ;;  %v1204_v12 = vmul.f32 0.5, %v3129_v7 }
 0x26f   : > { %v1275_v31 = vmul.f32 %v1255_v46, %v3154_v14  ;;  %v3170_v32 = vadd.f32 %v1135_v30, %v744_v40  ;;  %v1137_v33 = vpop.f32.mrb[9].mxu1  ;;  %v1291_v35 = vadd.f32 %v1271_v47, %v3146_v2  ;;  %v1208_v13 = vmul.f32 0.5, %v3135_v51  ;;  %v2490_v47 = vld [vmem:[%s2855_s11 + $0x110] ss:$8 sps:$4 sm:$0xff]   ;;  %v2495_v30 = vld [vmem:[%s2855_s11 + $0x124] ss:$8 sps:$4 sm:$0xff]  }
 0x270   : > { %v1276_v34 = vmul.f32 %v1256_v29, %v3158_v19  ;;  %v3173_v59 = vadd.f32 %v1137_v33, %v748_v41  ;;  %v1139_v58 = vpop.f32.mrb[10].mxu1  ;;  %v1292_v49 = vadd.f32 %v1272_v28, %v3149_v10  ;;  %v1212_v46 = vmul.f32 0.5, %v3149_v10  ;;  %v2493_v10 = vld [vmem:[%s2855_s11 + $0x120] ss:$8 sps:$4 sm:$0xff]  }
 0x271   : > { %v1239_v36 = vmul.f32 0.044715, %v3170_v32  ;;  %v1140_v37 = vpop.f32.mrb[11].mxu1  ;;  %v1295_v38 = vadd.f32 %v1275_v31, %v3154_v14  ;;  %v1311_v42 = vmul.f32 0.7978846, %v1291_v35  ;;  %v1216_v28 = vmul.f32 0.5, %v3158_v19 }
 0x272   : > { %v1240_v61 = vmul.f32 0.044715, %v3173_v59  ;;  %v1296_v40 = vadd.f32 %v1276_v34, %v3158_v19  ;;  %v1312_v60 = vmul.f32 0.7978846, %v1292_v49  ;;  %v1211_v31 = vmul.f32 0.5, %v3146_v2 }
 0x273   : > { %v1259_v43 = vmul.f32 %v1239_v36, %v3170_v32  ;;  %v1315_v41 = vmul.f32 0.7978846, %v1295_v38  ;;  %v1215_v33 = vmul.f32 0.5, %v3154_v14  ;;  %v1220_v2 = vmul.f32 0.5, %v3173_v59 }
 0x274   : > { %v1260_v45 = vmul.f32 %v1240_v61, %v3173_v59  ;;  %v1316_v50 = vmul.f32 0.7978846, %v1296_v40  ;;  %2553 = vtanh.f32 %v1312_v60  ;;  %v2498_v40 = vld [vmem:[%s2855_s11 + $0x134] ss:$8 sps:$4 sm:$0xff]  }
 0x275   : > { %v2546_v52 = vpop.eup %2545  ;;  %2555 = vtanh.f32 %v1311_v42  ;;  %v1279_v53 = vmul.f32 %v1259_v43, %v3170_v32  ;;  %v1219_v42 = vmul.f32 0.5, %v3170_v32  ;;  %v2496_v43 = vld [vmem:[%s2855_s11 + $0x130] ss:$8 sps:$4 sm:$0xff]  }
 0x276   : > { %v2548_v54 = vpop.eup %2547  ;;  %v1343_v55 = vadd.f32 1.0, %v2546_v52  ;;  %2557 = vtanh.f32 %v1316_v50  ;;  %v1280_v6 = vmul.f32 %v1260_v45, %v3173_v59  ;;  %v2501_v45 = vld [vmem:[%s2855_s11 + $0x144] ss:$8 sps:$4 sm:$0xff]  }
 0x277   : > { %v2550_v56 = vpop.eup %2549  ;;  %v1344_v62 = vadd.f32 1.0, %v2548_v54  ;;  %2559 = vtanh.f32 %v1315_v41  ;;  %v1299_v63 = vadd.f32 %v1279_v53, %v3170_v32  ;;  %v2499_v53 = vld [vmem:[%s2855_s11 + $0x140] ss:$8 sps:$4 sm:$0xff]   ;;  %v2504_v54 = vld [vmem:[%s2855_s11 + $0x154] ss:$8 sps:$4 sm:$0xff]  }
 0x278   : > { %v2552_v0 = vpop.eup %2551  ;;  %v1347_v4 = vadd.f32 1.0, %v2550_v56  ;;  %v1300_v11 = vadd.f32 %v1280_v6, %v3173_v59  ;;  %v1363_v16 = vmul.f32 %v1343_v55, %v1203_v1  ;;  %v2502_v32 = vld [vmem:[%s2855_s11 + $0x150] ss:$8 sps:$4 sm:$0xff]   ;;  %v2507_v55 = vld [vmem:[%s2855_s11 + $0x164] ss:$8 sps:$4 sm:$0xff]  }
 0x279   : > { %v1348_v9 = vadd.f32 1.0, %v2552_v0  ;;  %v1319_v15 = vmul.f32 0.7978846, %v1299_v63  ;;  %v1364_v20 = vmul.f32 %v1344_v62, %v1204_v12  ;;  %v2505_v6 = vld [vmem:[%s2855_s11 + $0x160] ss:$8 sps:$4 sm:$0xff]   ;;  %v751_v62 = vsub.s32 2, %v3027_v57 }
 0x27a   : > { %v1367_v17 = vmul.f32 %v1347_v4, %v1207_v3  ;;  %v1320_v18 = vmul.f32 0.7978846, %v1300_v11  ;;  %v2510_v56 = vld [vmem:[%s2855_s11 + $0x174] ss:$8 sps:$4 sm:$0xff]   ;;  %v755_v63 = vsub.s32 3, %v3027_v57 }
 0x27b   : > { %v1368_v21 = vmul.f32 %v1348_v9, %v1208_v13  ;;  %2561 = vtanh.f32 %v1319_v15  ;;  %v2508_v0 = vld [vmem:[%s2855_s11 + $0x170] ss:$8 sps:$4 sm:$0xff]   ;;  %v2513_v1 = vld [vmem:[%s2855_s11 + $0x184] ss:$8 sps:$4 sm:$0xff]   ;;  %v3216_v3 = vrot.slane %v3121_v39, %v751_v62  ;;  %v2511_v11 = vld [vmem:[%s2855_s11 + $0x180] ss:$8 sps:$4 sm:$0xff]  }
 0x27c   : > { %v1383_v48 = vpack.c.bf16 %v1367_v17, %v1363_v16  ;;  %2563 = vtanh.f32 %v1320_v18  ;;  %v3219_v4 = vrot.slane %v3121_v39, %v755_v63  ;;  %v2516_v13 = vld [vmem:[%s2855_s11 + $0x194] ss:$8 sps:$4 sm:$0xff]  }
 0x27d   : > { %v1384_v44 = vpack.c.bf16 %v1368_v21, %v1364_v20  ;;  %v2514_v20 = vld [vmem:[%s2855_s11 + $0x190] ss:$8 sps:$4 sm:$0xff]   ;;  %v2528_v62 = vld [vmem:[%s2855_s11 + $0x1d4] ss:$8 sps:$4 sm:$0xff]  }
 0x27e   : > { %v2554_v23 = vpop.eup %2553 }
 0x27f   : > { %v2556_v25 = vpop.eup %2555  ;;  %1821 = vmatprep.mubr.bf16.mxu0 %v1384_v44  ;;  %v1352_v7 = vadd.f32 1.0, %v2554_v23  ;;  %v2519_v44 = vld [vmem:[%s2855_s11 + $0x1a4] ss:$8 sps:$4 sm:$0xff]  }
 0x280   : > { %v2558_v51 = vpop.eup %2557  ;;  %1822 = vmatmul.mubr.bf16.vlgmr.msra.gmra.mrb[0].mxu0 %v1383_v48  ;;  %v1351_v26 = vadd.f32 1.0, %v2556_v25 }
 0x281   : > { %v2560_v27 = vpop.eup %2559  ;;  %1851 = vmatpush1.bf16.msra.mxu0 %v2487_v22  ;;  %v1356_v29 = vadd.f32 1.0, %v2558_v51  ;;  %v1372_v58 = vmul.f32 %v1352_v7, %v1212_v46 }
 0x282   : > { %1852 = vmatprep.subr.bf16.mxu0 %v2492_v24  ;;  %v1355_v34 = vadd.f32 1.0, %v2560_v27  ;;  %v1371_v35 = vmul.f32 %v1351_v26, %v1211_v31  ;;  %v2517_v26 = vld [vmem:[%s2855_s11 + $0x1a0] ss:$8 sps:$4 sm:$0xff]  }
 0x283   : > { %v1376_v49 = vmul.f32 %v1356_v29, %v1216_v28  ;;  %v2522_v28 = vld [vmem:[%s2855_s11 + $0x1b4] ss:$8 sps:$4 sm:$0xff]  }
 0x284   : > { %v1375_v36 = vmul.f32 %v1355_v34, %v1215_v33 }
 0x285   : > { %v2562_v37 = vpop.eup %2561  ;;  %1853 = vmatpush1.bf16.msra.mxu0 %v2490_v47  ;;  %v1388_v38 = vpack.c.bf16 %v1376_v49, %v1372_v58 }
 0x286   : > { %v2564_v19 = vpop.eup %2563  ;;  %1854 = vmatprep.subr.bf16.mxu0 %v2495_v30  ;;  %v1387_v61 = vpack.c.bf16 %v1375_v36, %v1371_v35  ;;  %v1359_v60 = vadd.f32 1.0, %v2562_v37  ;;  %v2520_v35 = vld [vmem:[%s2855_s11 + $0x1b0] ss:$8 sps:$4 sm:$0xff]  }
 0x287   : > { %1831 = vmatprep.mubr.bf16.mxu0 %v1388_v38  ;;  %v1360_v14 = vadd.f32 1.0, %v2564_v19 }
 0x288   : > { %1832 = vmatmul.mubr.bf16.gmra.mrb[4].mxu0 %v1387_v61  ;;  %v1379_v50 = vmul.f32 %v1359_v60, %v1219_v42 }
 0x289   : > { %1855 = vmatpush1.bf16.msra.mxu0 %v2493_v10  ;;  %v1380_v41 = vmul.f32 %v1360_v14, %v1220_v2  ;;  %v2525_v2 = vld [vmem:[%s2855_s11 + $0x1c4] ss:$8 sps:$4 sm:$0xff]  }
 0x28a   : > { %1856 = vmatprep.subr.bf16.mxu0 %v2498_v40  ;;  %v1391_v59 = vpack.c.bf16 %v1379_v50, %v1379_v50 }
 0x28b   : > { %v1392_v52 = vpack.c.bf16 %v1380_v41, %v1380_v41 }
 0x28d   : > { %1857 = vmatpush1.bf16.msra.mxu0 %v2496_v43  ;;  %1841 = vmatprep.mubr.bf16.mxu0 %v1392_v52 }
 0x28e   : > { %1858 = vmatprep.subr.bf16.mxu0 %v2501_v45 }
 0x290   : > { %1842 = vmatmul.mubr.bf16.gmra.mrb[8].mxu0 %v1391_v59 }
 0x291   : > { %1859 = vmatpush1.bf16.msra.mxu0 %v2499_v53 }
 0x292   : > { %1860 = vmatprep.subr.bf16.mxu0 %v2504_v54 }
 0x295   : > { %1861 = vmatpush1.bf16.msra.mxu0 %v2502_v32  ;;  %v2523_v32 = vld [vmem:[%s2855_s11 + $0x1c0] ss:$8 sps:$4 sm:$0xff]  }
 0x296   : > { %1862 = vmatprep.subr.bf16.mxu0 %v2507_v55 }
 0x299   : > { %1863 = vmatpush1.bf16.msra.mxu0 %v2505_v6 }
 0x29a   : > { %1864 = vmatprep.subr.bf16.mxu0 %v2510_v56 }
 0x29d   : > { %1865 = vmatpush1.bf16.msra.mxu0 %v2508_v0 }
 0x29e   : > { %v1176_v12 = vpop.f32.mrb[12].mxu1  ;;  %1866 = vmatprep.subr.bf16.mxu0 %v2513_v1 }
 0x29f   : > { %v3224_v9 = vadd.f32 %v1176_v12, %v3216_v3  ;;  %v1178_v57 = vpop.f32.mrb[13].mxu1 }
 0x2a0   : > { %v3227_v15 = vadd.f32 %v1178_v57, %v3219_v4  ;;  %v1180_v16 = vpop.f32.mrb[14].mxu1  ;;  %v2526_v57 = vld [vmem:[%s2855_s11 + $0x1d0] ss:$8 sps:$4 sm:$0xff]  }
 0x2a1   : > { %v1225_v17 = vmul.f32 0.044715, %v3224_v9  ;;  %v3231_v39 = vadd.f32 %v1180_v16, %v3216_v3  ;;  %v1182_v18 = vpop.f32.mrb[15].mxu1  ;;  %1867 = vmatpush1.bf16.msra.mxu0 %v2511_v11 }
 0x2a2   : > { %v1226_v21 = vmul.f32 0.044715, %v3227_v15  ;;  %v3236_v48 = vadd.f32 %v1182_v18, %v3219_v4  ;;  %1868 = vmatprep.subr.bf16.mxu0 %v2516_v13 }
 0x2a3   : > { %v1245_v22 = vmul.f32 %v1225_v17, %v3224_v9  ;;  %v1229_v23 = vmul.f32 0.044715, %v3231_v39 }
 0x2a4   : > { %v1246_v24 = vmul.f32 %v1226_v21, %v3227_v15  ;;  %v1230_v25 = vmul.f32 0.044715, %v3236_v48  ;;  %v2531_v21 = vld [vmem:[%s2855_s11 + $0x1e4] ss:$8 sps:$4 sm:$0xff]  }
 0x2a5   : > { %v1265_v7 = vmul.f32 %v1245_v22, %v3224_v9  ;;  %v1249_v51 = vmul.f32 %v1229_v23, %v3231_v39  ;;  %1869 = vmatpush1.bf16.msra.mxu0 %v2514_v20 }
 0x2a6   : > { %v1266_v27 = vmul.f32 %v1246_v24, %v3227_v15  ;;  %v1250_v47 = vmul.f32 %v1230_v25, %v3236_v48  ;;  %v1186_v46 = vpop.f32.mrb[16].mxu1  ;;  %1870 = vmatprep.subr.bf16.mxu0 %v2519_v44 }
 0x2a7   : > { %v1285_v29 = vadd.f32 %v1265_v7, %v3224_v9  ;;  %v1269_v30 = vmul.f32 %v1249_v51, %v3231_v39  ;;  %v3252_v31 = vadd.f32 %v1186_v46, %v3216_v3  ;;  %v1188_v33 = vpop.f32.mrb[17].mxu1 }
 0x2a8   : > { %v1270_v34 = vmul.f32 %v1250_v47, %v3236_v48  ;;  %v3256_v58 = vadd.f32 %v1188_v33, %v3219_v4  ;;  %v1190_v49 = vpop.f32.mrb[18].mxu1  ;;  %v1286_v36 = vadd.f32 %v1266_v27, %v3227_v15  ;;  %v2529_v27 = vld [vmem:[%s2855_s11 + $0x1e0] ss:$8 sps:$4 sm:$0xff]  }
 0x2a9   : > { %v1305_v37 = vmul.f32 0.7978846, %v1285_v29  ;;  %v1289_v38 = vadd.f32 %v1269_v30, %v3231_v39  ;;  %v1233_v10 = vmul.f32 0.044715, %v3252_v31  ;;  %v3263_v19 = vadd.f32 %v1190_v49, %v3216_v3  ;;  %v1192_v61 = vpop.f32.mrb[19].mxu1  ;;  %1871 = vmatpush1.bf16.msra.mxu0 %v2517_v26 }
 0x2aa   : > { %v1234_v40 = vmul.f32 0.044715, %v3256_v58  ;;  %v3267_v60 = vadd.f32 %v1192_v61, %v3219_v4  ;;  %1872 = vmatprep.subr.bf16.mxu0 %v2522_v28  ;;  %v1290_v14 = vadd.f32 %v1270_v34, %v3236_v48  ;;  %v1306_v42 = vmul.f32 0.7978846, %v1286_v36  ;;  %v2534_v28 = vld [vmem:[%s2855_s11 + $0x1f4] ss:$8 sps:$4 sm:$0xff]  }
 0x2ab   : > { %2565 = vtanh.f32 %v1305_v37  ;;  %v1309_v43 = vmul.f32 0.7978846, %v1289_v38  ;;  %v1253_v41 = vmul.f32 %v1233_v10, %v3252_v31  ;;  %v1237_v45 = vmul.f32 0.044715, %v3263_v19  ;;  %v2532_v38 = vld [vmem:[%s2855_s11 + $0x1f0] ss:$8 sps:$4 sm:$0xff]  }
 0x2ac   : > { %v1254_v50 = vmul.f32 %v1234_v40, %v3256_v58  ;;  %v1238_v52 = vmul.f32 0.044715, %v3267_v60  ;;  %v1310_v53 = vmul.f32 0.7978846, %v1290_v14  ;;  %2567 = vtanh.f32 %v1306_v42 }
 0x2ad   : > { %2569 = vtanh.f32 %v1309_v43  ;;  %v1273_v59 = vmul.f32 %v1253_v41, %v3252_v31  ;;  %v1257_v54 = vmul.f32 %v1237_v45, %v3263_v19  ;;  %1873 = vmatpush1.bf16.msra.mxu0 %v2520_v35  ;;  %v1205_v36 = vmul.f32 0.5, %v3224_v9 }
 0x2ae   : > { %v1274_v55 = vmul.f32 %v1254_v50, %v3256_v58  ;;  %v1258_v6 = vmul.f32 %v1238_v52, %v3267_v60  ;;  %v1196_v56 = vpop.f32.mrb[20].mxu1  ;;  %1874 = vmatprep.subr.bf16.mxu0 %v2525_v2  ;;  %2571 = vtanh.f32 %v1310_v53  ;;  %v1209_v37 = vmul.f32 0.5, %v3231_v39 }
 0x2af   : > { %v1277_v63 = vmul.f32 %v1257_v54, %v3263_v19  ;;  %v3283_v0 = vadd.f32 %v1196_v56, %v3216_v3  ;;  %v1198_v1 = vpop.f32.mrb[21].mxu1  ;;  %v1293_v17 = vadd.f32 %v1273_v59, %v3252_v31  ;;  %v1206_v40 = vmul.f32 0.5, %v3227_v15 }
 0x2b0   : > { %v1278_v11 = vmul.f32 %v1258_v6, %v3267_v60  ;;  %v3287_v12 = vadd.f32 %v1198_v1, %v3219_v4  ;;  %v1200_v13 = vpop.f32.mrb[22].mxu1  ;;  %v1294_v16 = vadd.f32 %v1274_v55, %v3256_v58  ;;  %v1210_v2 = vmul.f32 0.5, %v3236_v48 }
 0x2b1   : > { %v1241_v18 = vmul.f32 0.044715, %v3283_v0  ;;  %v1201_v20 = vpop.f32.mrb[23].mxu1  ;;  %1875 = vmatpush1.bf16.msra.mxu0 %v2523_v32  ;;  %v1297_v3 = vadd.f32 %v1277_v63, %v3263_v19  ;;  %v1313_v23 = vmul.f32 0.7978846, %v1293_v17  ;;  %v1214_v55 = vmul.f32 0.5, %v3256_v58 }
 0x2b2   : > { %v1242_v44 = vmul.f32 0.044715, %v3287_v12  ;;  %1876 = vmatprep.subr.bf16.mxu0 %v2528_v62  ;;  %v1298_v4 = vadd.f32 %v1278_v11, %v3267_v60  ;;  %v1314_v22 = vmul.f32 0.7978846, %v1294_v16  ;;  %v1218_v6 = vmul.f32 0.5, %v3267_v60 }
 0x2b3   : > { %v1261_v24 = vmul.f32 %v1241_v18, %v3283_v0  ;;  %v1317_v25 = vmul.f32 0.7978846, %v1297_v3  ;;  %v1213_v62 = vmul.f32 0.5, %v3252_v31  ;;  %v1217_v63 = vmul.f32 0.5, %v3263_v19 }
 0x2b4   : > { %v1262_v7 = vmul.f32 %v1242_v44, %v3287_v12  ;;  %v1318_v51 = vmul.f32 0.7978846, %v1298_v4  ;;  %2573 = vtanh.f32 %v1314_v22  ;;  %v1222_v58 = vmul.f32 0.5, %v3287_v12 }
 0x2b5   : > { %v2566_v26 = vpop.eup %2565  ;;  %1877 = vmatpush1.bf16.msra.mxu0 %v2526_v57  ;;  %2575 = vtanh.f32 %v1313_v23  ;;  %v1281_v47 = vmul.f32 %v1261_v24, %v3283_v0  ;;  %v1221_v60 = vmul.f32 0.5, %v3283_v0 }
 0x2b6   : > { %v2568_v46 = vpop.eup %2567  ;;  %1878 = vmatprep.subr.bf16.mxu0 %v2531_v21  ;;  %v1345_v29 = vadd.f32 1.0, %v2566_v26  ;;  %2577 = vtanh.f32 %v1318_v51  ;;  %v1282_v30 = vmul.f32 %v1262_v7, %v3287_v12  ;;  %v1395_v51 = vld [vmem:[#allocation2] sm:$0xff]  ;;  %v1396_v26 = vld [vmem:[#allocation2 + $0x8] sm:$0xff] }
 0x2b7   : > { %v2570_v33 = vpop.eup %2569  ;;  %v1346_v34 = vadd.f32 1.0, %v2568_v46  ;;  %2579 = vtanh.f32 %v1317_v25  ;;  %v1301_v49 = vadd.f32 %v1281_v47, %v3283_v0  ;;  %v1397_v47 = vld [vmem:[#allocation2 + $0x10] sm:$0xff] }
 0x2b8   : > { %v2572_v35 = vpop.eup %2571  ;;  %v1349_v10 = vadd.f32 1.0, %v2570_v33  ;;  %v1302_v61 = vadd.f32 %v1282_v30, %v3287_v12  ;;  %v1365_v43 = vmul.f32 %v1345_v29, %v1205_v36 }
 0x2b9   : > { %1879 = vmatpush1.bf16.msra.mxu0 %v2529_v27  ;;  %v1350_v14 = vadd.f32 1.0, %v2572_v35  ;;  %v1321_v42 = vmul.f32 0.7978846, %v1301_v49  ;;  %v1366_v50 = vmul.f32 %v1346_v34, %v1206_v40  ;;  %v1399_v49 = vld [vmem:[#allocation2 + $0x20] sm:$0xff]  ;;  %v1400_v35 = vld [vmem:[#allocation2 + $0x28] sm:$0xff] }
 0x2ba   : > { %1880 = vmatprep.subr.bf16.mxu0 %v2534_v28  ;;  %v1369_v41 = vmul.f32 %v1349_v10, %v1209_v37  ;;  %v1322_v45 = vmul.f32 0.7978846, %v1302_v61  ;;  %v1398_v28 = vld [vmem:[#allocation2 + $0x18] sm:$0xff]  ;;  %v1401_v37 = vld [vmem:[#allocation2 + $0x30] sm:$0xff] }
 0x2bb   : > { %v1370_v52 = vmul.f32 %v1350_v14, %v1210_v2  ;;  %2581 = vtanh.f32 %v1321_v42  ;;  %v1402_v61 = vld [vmem:[#allocation2 + $0x38] sm:$0xff] }
 0x2bc   : > { %v1385_v9 = vpack.c.bf16 %v1369_v41, %v1365_v43  ;;  %2583 = vtanh.f32 %v1322_v45  ;;  %v1403_v41 = vld [vmem:[#allocation2 + $0x40] sm:$0x3] }
 0x2bd   : > { %1881 = vmatpush1.bf16.msra.mxu0 %v2532_v38  ;;  %v1386_v39 = vpack.c.bf16 %v1370_v52, %v1366_v50  ;;  %v1404_v52 = vld [vmem:[#allocation2 + $0x48] sm:$0x3] }
 0x2be   : > { %v2574_v53 = vpop.eup %2573 }
 0x2bf   : > { %v2576_v59 = vpop.eup %2575  ;;  %1882 = vmatprep.mubr.bf16.mxu0 %v1386_v39  ;;  %v1354_v54 = vadd.f32 1.0, %v2574_v53 }
 0x2c0   : > { %v2578_v15 = vpop.eup %2577  ;;  %1883 = vmatmul.mubr.bf16.vlgmr.msra.gmra.mrb[0].mxu0 %v1385_v9  ;;  %v1353_v48 = vadd.f32 1.0, %v2576_v59 }
 0x2c1   : > { %v2580_v32 = vpop.eup %2579  ;;  %v1358_v56 = vadd.f32 1.0, %v2578_v15  ;;  %v1374_v11 = vmul.f32 %v1354_v54, %v1214_v55  ;;  %v1945_v55 = vld [vmem:[%s3373_s6] sm:$0x3] (!%p2277_p12) }
 0x2c2   : > { %v1357_v1 = vadd.f32 1.0, %v2580_v32  ;;  %v1373_v57 = vmul.f32 %v1353_v48, %v1213_v62  ;;  %v1967_v62 = vld [vmem:[%s3367_s0] sm:$0xff] (!%p2277_p12) }
 0x2c3   : > { %v1378_v13 = vmul.f32 %v1358_v56, %v1218_v6  ;;  %v1950_v6 = vrot.slane (!%p2277_p12), %v1945_v55, %v3031_v5  ;;  %v1954_v56 = vrot.slane (!%p2277_p12), %v1945_v55, %v3034_v8  ;;  %v1969_v8 = vld [vmem:[%s3367_s0 + $0x10] sm:$0xff] (!%p2277_p12) }
 0x2c4   : > { %v1377_v16 = vmul.f32 %v1357_v1, %v1217_v63 }
 0x2c5   : > { %v2582_v17 = vpop.eup %2581  ;;  %v1390_v18 = vpack.c.bf16 %v1378_v13, %v1374_v11  ;;  %v1972_v11 = vunpack.c.l.bf16 (!%p2277_p12), %v1967_v62  ;;  %v1973_v13 = vunpack.c.h.bf16 (!%p2277_p12), %v1967_v62 }
 0x2c6   : > { %v2584_v20 = vpop.eup %2583  ;;  %v1389_v21 = vpack.c.bf16 %v1377_v16, %v1373_v57  ;;  %v1361_v3 = vadd.f32 1.0, %v2582_v17  ;;  %v1968_v57 = vld [vmem:[%s3367_s0 + $0x8] sm:$0xff] (!%p2277_p12) }
 0x2c7   : > { %1892 = vmatprep.mubr.bf16.mxu0 %v1390_v18  ;;  %v1362_v44 = vadd.f32 1.0, %v2584_v20 }
 0x2c8   : > { %1893 = vmatmul.mubr.bf16.gmra.mrb[4].mxu0 %v1389_v21  ;;  %v1381_v4 = vmul.f32 %v1361_v3, %v1221_v60  ;;  %v1975_v60 = vunpack.c.h.bf16 (!%p2277_p12), %v1968_v57 }
 0x2c9   : > { %v1382_v31 = vmul.f32 %v1362_v44, %v1222_v58  ;;  %v1974_v44 = vunpack.c.l.bf16 (!%p2277_p12), %v1968_v57 }
 0x2ca   : > { %v1393_v22 = vpack.c.bf16 %v1381_v4, %v1381_v4 }
 0x2cb   : > { %v1394_v19 = vpack.c.bf16 %v1382_v31, %v1382_v31 }
 0x2cd   : > { %1902 = vmatprep.mubr.bf16.mxu0 %v1394_v19  ;;  %v1970_v19 = vld [vmem:[%s3367_s0 + $0x18] sm:$0xff] (!%p2277_p12) }
 0x2d0   : > { %1903 = vmatmul.mubr.bf16.gmra.mrb[12].mxu0 %v1393_v22 }
 0x363   : > { %v1843_v23 = vpop.f32.mrb[8].mxu0 }
 0x364   : > { %v1845_v24 = vpop.f32.mrb[9].mxu0 }
 0x365   : > { %v1847_v25 = vpop.f32.mrb[10].mxu0 }
 0x366   : > { %v1848_v7 = vpop.f32.mrb[11].mxu0  ;;  %v1977_v25 = vunpack.c.h.bf16 (!%p2277_p12), %v1969_v8 }
 0x393   : > { %v1884_v27 = vpop.f32.mrb[0].mxu0 }
 0x394   : > { %v1911_v46 = vadd.f32 %v1884_v27, %v1395_v51  ;;  %v1886_v12 = vpop.f32.mrb[1].mxu0 }
 0x395   : > { %v1912_v29 = vadd.f32 %v1886_v12, %v1396_v26  ;;  %v1888_v30 = vpop.f32.mrb[2].mxu0  ;;  %v1971_v12 = vld [vmem:[%s3367_s0 + $0x20] sm:$0x11] (!%p2277_p12) }
 0x396   : > { %1921 = vst [vmem:[#allocation2] sm:$0xff] %v1911_v46  ;;  %v1913_v0 = vadd.f32 %v1888_v30, %v1397_v47  ;;  %v1890_v33 = vpop.f32.mrb[3].mxu0 }
 0x397   : > { %1922 = vst [vmem:[#allocation2 + $0x8] sm:$0xff] %v1912_v29  ;;  %v1914_v34 = vadd.f32 %v1890_v33, %v1398_v28 }
 0x398   : > { %1923 = vst [vmem:[#allocation2 + $0x10] sm:$0xff] %v1913_v0  ;;  %v1978_v0 = vunpack.c.l.bf16 (!%p2277_p12), %v1970_v19 }
 0x399   : > { %1924 = vst [vmem:[#allocation2 + $0x18] sm:$0xff] %v1914_v34  ;;  %v1979_v34 = vunpack.c.h.bf16 (!%p2277_p12), %v1970_v19 }
 0x39b   : > { %v1894_v36 = vpop.f32.mrb[4].mxu0 }
 0x39c   : > { %v1915_v38 = vadd.f32 %v1894_v36, %v1399_v49  ;;  %v1896_v10 = vpop.f32.mrb[5].mxu0 }
 0x39d   : > { %v1916_v40 = vadd.f32 %v1896_v10, %v1400_v35  ;;  %v1898_v2 = vpop.f32.mrb[6].mxu0  ;;  %v1935_v48 = vld [vmem:[#allocation2] sm:$0xff] (!%p2277_p12)  ;;  %v1981_v10 = vunpack.c.h.bf16 (!%p2277_p12), %v1971_v12 }
 0x39e   : > { %1925 = vst [vmem:[#allocation2 + $0x20] sm:$0xff] %v1915_v38  ;;  %v1917_v14 = vadd.f32 %v1898_v2, %v1401_v37  ;;  %v1900_v42 = vpop.f32.mrb[7].mxu0  ;;  %v1936_v32 = vld [vmem:[#allocation2 + $0x8] sm:$0xff] (!%p2277_p12)  ;;  %v1957_v18 = vadd.f32 (!%p2277_p12), %v1950_v6, %v1935_v48  ;;  %v1980_v38 = vunpack.c.l.bf16 (!%p2277_p12), %v1971_v12 }
 0x39f   : > { %1926 = vst [vmem:[#allocation2 + $0x28] sm:$0xff] %v1916_v40  ;;  %v1918_v43 = vadd.f32 %v1900_v42, %v1402_v61  ;;  %v1937_v63 = vld [vmem:[#allocation2 + $0x10] sm:$0xff] (!%p2277_p12)  ;;  %v1958_v20 = vadd.f32 (!%p2277_p12), %v1954_v56, %v1936_v32 }
 0x3a0   : > { %1927 = vst [vmem:[#allocation2 + $0x30] sm:$0xff] %v1917_v14  ;;  %v1938_v1 = vld [vmem:[#allocation2 + $0x18] sm:$0xff] (!%p2277_p12)  ;;  %v1959_v21 = vadd.f32 (!%p2277_p12), %v1950_v6, %v1937_v63  ;;  %v1982_v22 = vadd.f32 (!%p2277_p12), %v1972_v11, %v1957_v18 }
 0x3a1   : > { %1928 = vst [vmem:[#allocation2 + $0x38] sm:$0xff] %v1918_v43  ;;  %v1960_v5 = vadd.f32 (!%p2277_p12), %v1954_v56, %v1938_v1 }
 0x3a2   : > { %v1984_v26 = vadd.f32 (!%p2277_p12), %v1974_v44, %v1959_v21 }
 0x3a3   : > { %v1904_v45 = vpop.f32.mrb[12].mxu0  ;;  %1934 = sbr.rel (%p2277_p12) target bundleno = 952 (0x3b8), region = 79  ;;  %v1985_v27 = vadd.f32 (!%p2277_p12), %v1975_v60, %v1960_v5 }
 0x3a4   : > { %v1905_v50 = vadd.f32 %v1904_v45, %v1843_v23  ;;  %v1906_v9 = vpop.f32.mrb[13].mxu0  ;;  %v1983_v23 = vadd.f32 (!%p2277_p12), %v1973_v13, %v1958_v20 }
 0x3a5   : > { %v1907_v39 = vadd.f32 %v1906_v9, %v1845_v24  ;;  %v1908_v53 = vpop.f32.mrb[14].mxu0  ;;  %v1939_v16 = vld [vmem:[#allocation2 + $0x20] sm:$0xff] (!%p2277_p12)  ;;  %v1976_v24 = vunpack.c.l.bf16 (!%p2277_p12), %v1969_v8  ;;  %v2290_v33 = vpack.c.bf16 (!%p2277_p12), %v1985_v27, %v1984_v26 }
 0x3a6   : > { %v1919_v59 = vadd.f32 %v1905_v50, %v1403_v41  ;;  %v1909_v54 = vpop.f32.mrb[15].mxu0  ;;  %v1940_v17 = vld [vmem:[#allocation2 + $0x28] sm:$0xff] (!%p2277_p12)  ;;  %v1961_v31 = vadd.f32 (!%p2277_p12), %v1950_v6, %v1939_v16  ;;  %v2289_v28 = vpack.c.bf16 (!%p2277_p12), %v1983_v23, %v1982_v22 }
 0x3a7   : > { %v1920_v15 = vadd.f32 %v1907_v39, %v1404_v52  ;;  %v1941_v3 = vld [vmem:[#allocation2 + $0x30] sm:$0xff] (!%p2277_p12)  ;;  %v1962_v4 = vadd.f32 (!%p2277_p12), %v1954_v56, %v1940_v17  ;;  %2025 = vst [vmem:[%s3374_s7 + $0x8] sm:$0xff] (!%p2277_p12), %v2290_v33 }
 0x3a8   : > { %1929 = vst [vmem:[#allocation2 + $0x40] sm:$0x3] %v1919_v59  ;;  %v1942_v58 = vld [vmem:[#allocation2 + $0x38] sm:$0xff] (!%p2277_p12)  ;;  %v1963_v47 = vadd.f32 (!%p2277_p12), %v1950_v6, %v1941_v3  ;;  %v1986_v29 = vadd.f32 (!%p2277_p12), %v1976_v24, %v1961_v31  ;;  %2024 = vst [vmem:[%s3374_s7] sm:$0xff] (!%p2277_p12), %v2289_v28 }
 0x3a9   : > { %1930 = vst [vmem:[#allocation2 + $0x48] sm:$0x3] %v1920_v15  ;;  %v1964_v46 = vadd.f32 (!%p2277_p12), %v1954_v56, %v1942_v58  ;;  %v1987_v30 = vadd.f32 (!%p2277_p12), %v1977_v25, %v1962_v4 }
 0x3aa   : > { %v1988_v37 = vadd.f32 %v1978_v0, %v1963_v47 }
 0x3ab   : > { %v2291_v36 = vpack.c.bf16 %v1987_v30, %v1986_v29  ;;  %v1989_v61 = vadd.f32 %v1979_v34, %v1964_v46 }
 0x3ad   : > { %2026 = vst [vmem:[%s3374_s7 + $0x10] sm:$0xff] %v2291_v36  ;;  %v2292_v14 = vpack.c.bf16 %v1989_v61, %v1988_v37 }
 0x3af   : > { %v1943_v7 = vld [vmem:[#allocation2 + $0x40] sm:$0x3]  ;;  %2027 = vst [vmem:[%s3374_s7 + $0x18] sm:$0xff] %v2292_v14 }
 0x3b0   : > { %v1944_v51 = vld [vmem:[#allocation2 + $0x48] sm:$0x3]  ;;  %v1965_v49 = vadd.f32 %v1950_v6, %v1943_v7 }
 0x3b1   : > { %v1966_v35 = vadd.f32 %v1954_v56, %v1944_v51 }
 0x3b2   : > { %v1990_v40 = vadd.f32 %v1980_v38, %v1965_v49 }
 0x3b3   : > { %v1991_v2 = vadd.f32 %v1981_v10, %v1966_v35 }
 0x3b5   : > { %v2293_v42 = vpack.c.bf16 %v1991_v2, %v1990_v40 }
 0x3b7   : > { %2028 = vst [vmem:[%s3374_s7 + $0x20] sm:$0x11] %v2293_v42 }
 0x3b8 PF: > { %s17_s28 = sadd.s32 1, %s2623_s28   ;;  %s3375_s24 = smov %s2611_s25 }
 0x3b9   : > { %p14_p13 = scmp.ge.s32.totalorder %s17_s28, 4   ;;  %s3376_s25 = smov %s2701_s9 }
 0x3ba   : > { %s3377_s26 = smov %s2619_s27  ;;  %s3378_s27 = smov %s3380_s29 }
 0x3bb   :  { %16 = sbr.rel (!%p14_p13) target bundleno = 3 (0x3), region = 123 }

// kernel: vit_block_forward.21
= control target key start
LH: loop header
LB: loop body
LE: loop exit
PB: predicated region body
PF: predicated region fallthrough
CT: control target
= control target key end

     0   :  { %vm41_vm0 = vcmask 1041408   ;;  %v117_v63 = vlaneseq  ;;  %s308_s0 = inlined_call_operand.vmem [shape: bf16[34,256], index: 0, kind: input, shape index: {}]   ;;  %s309_s1 = inlined_call_operand.vmem [shape: f32[1,256], index: 1, kind: input, shape index: {}]   ;;  %s310_s2 = inlined_call_operand.vmem [shape: f32[1,256], index: 2, kind: input, shape index: {}]   ;;  %s311_s3 = inlined_call_operand.vmem [shape: f32[34,256], index: 3, kind: output, shape index: {}]  }
   0x1   :  { %v15_v0 = vld [vmem:[%s308_s0 + $0x8] sm:$0xff]  ;;  %v14_v1 = vld [vmem:[%s308_s0] sm:$0xff]  ;;  %v16_v2 = vld [vmem:[%s308_s0 + $0x10] sm:$0xff] }
   0x2   :  { %v21_v3 = vunpack.c.l.bf16 %v15_v0  ;;  %v22_v4 = vunpack.c.h.bf16 %v15_v0  ;;  %v19_v5 = vunpack.c.l.bf16 %v14_v1  ;;  %v20_v6 = vunpack.c.h.bf16 %v14_v1  ;;  %v18_v7 = vld [vmem:[%s308_s0 + $0x20] sm:$0x11]  ;;  %v17_v12 = vld [vmem:[%s308_s0 + $0x18] sm:$0xff] }
   0x3   :  { %v23_v8 = vunpack.c.l.bf16 %v16_v2  ;;  %v24_v9 = vunpack.c.h.bf16 %v16_v2  ;;  %v27_v10 = vunpack.c.l.bf16 %v18_v7  ;;  %v28_v11 = vunpack.c.h.bf16 %v18_v7 }
   0x4   :  { %v32_v13 = vadd.f32 %v22_v4, %v21_v3  ;;  %v29_v14 = vadd.f32 %v20_v6, %v19_v5  ;;  %v25_v19 = vunpack.c.l.bf16 %v17_v12  ;;  %v26_v20 = vunpack.c.h.bf16 %v17_v12 }
   0x5   :  { %v42_v15 = vsel %vm41_vm0, %v27_v10, 0.0  ;;  %v43_v16 = vsel %vm41_vm0, %v28_v11, 0.0  ;;  %v35_v17 = vadd.f32 %v24_v9, %v23_v8 }
   0x6   :  { %33 = vadd.xlane.f32.xlu1 %v32_v13  ;;  %30 = vadd.xlane.f32.xlu0 %v29_v14  ;;  %v44_v18 = vadd.f32 %v43_v16, %v42_v15  ;;  %v38_v21 = vadd.f32 %v26_v20, %v25_v19  ;;  %v115_v13 = vld [vmem:[%s309_s1] sm:$0x3] }
   0x7   :  { %v137_v15 = vld [vmem:[%s310_s2] sm:$0x3] }
   0xa   :  { %36 = vadd.xlane.f32.xlu1 %v35_v17  ;;  %45 = vadd.xlane.f32.xlu0 %v44_v18 }
   0xe   :  { %39 = vadd.xlane.f32.xlu0 %v38_v21 }
  0x93   :  { %v34_v22 = vpop.xlane.xlu1 %33  ;;  %v31_v23 = vpop.xlane.xlu0 %30 }
  0x94   :  { %v49_v24 = vmul.f32 0.00390625, %v34_v22  ;;  %v48_v25 = vmul.f32 0.00390625, %v31_v23 }
  0x96   :  { %v220_v26 = vsub.f32 %v21_v3, %v49_v24  ;;  %v222_v27 = vsub.f32 %v22_v4, %v49_v24  ;;  %v224_v28 = vsub.f32 %v19_v5, %v48_v25  ;;  %v226_v29 = vsub.f32 %v20_v6, %v48_v25 }
  0x97   :  { %v37_v30 = vpop.xlane.xlu1 %36  ;;  %v46_v31 = vpop.xlane.xlu0 %45  ;;  %v118_v4 = vshrl.u32 %v117_v63, 7 }
  0x98   :  { %v50_v32 = vmul.f32 0.00390625, %v37_v30  ;;  %v52_v33 = vmul.f32 0.00390625, %v46_v31  ;;  %v65_v34 = vmul.f32 %v220_v26, %v220_v26  ;;  %v66_v35 = vmul.f32 %v222_v27, %v222_v27 }
  0x99   :  { %v63_v36 = vmul.f32 %v224_v28, %v224_v28  ;;  %v64_v37 = vmul.f32 %v226_v29, %v226_v29 }
  0x9a   :  { %v236_v38 = vsub.f32 %v23_v8, %v50_v32  ;;  %v238_v39 = vsub.f32 %v24_v9, %v50_v32  ;;  %v240_v40 = vsub.f32 %v27_v10, %v52_v33  ;;  %v242_v41 = vsub.f32 %v28_v11, %v52_v33 }
  0x9b   :  { %v40_v42 = vpop.xlane.xlu0 %39  ;;  %v76_v43 = vadd.f32 %v66_v35, %v65_v34  ;;  %v73_v44 = vadd.f32 %v64_v37, %v63_v36  ;;  %v119_v10 = vsub.s32 0, %v118_v4  ;;  %v123_v11 = vsub.s32 1, %v118_v4 }
  0x9c   :  { %v51_v45 = vmul.f32 0.00390625, %v40_v42  ;;  %v67_v46 = vmul.f32 %v236_v38, %v236_v38  ;;  %v68_v47 = vmul.f32 %v238_v39, %v238_v39  ;;  %v71_v48 = vmul.f32 %v240_v40, %v240_v40 }
  0x9d   :  { %77 = vadd.xlane.f32.xlu0 %v76_v43  ;;  %74 = vadd.xlane.f32.xlu1 %v73_v44  ;;  %v72_v49 = vmul.f32 %v242_v41, %v242_v41  ;;  %v120_v16 = vrot.slane %v115_v13, %v119_v10  ;;  %v124_v17 = vrot.slane %v115_v13, %v123_v11 }
  0x9e   :  { %v252_v50 = vsub.f32 %v25_v19, %v51_v45  ;;  %v254_v51 = vsub.f32 %v26_v20, %v51_v45  ;;  %v79_v52 = vadd.f32 %v68_v47, %v67_v46  ;;  %v85_v53 = vsel %vm41_vm0, %v71_v48, 0.0 }
  0x9f   :  { %v86_v54 = vsel %vm41_vm0, %v72_v49, 0.0  ;;  %v142_v20 = vrot.slane %v137_v15, %v119_v10  ;;  %v146_v21 = vrot.slane %v137_v15, %v123_v11 }
  0xa0   :  { %v69_v55 = vmul.f32 %v252_v50, %v252_v50  ;;  %v70_v56 = vmul.f32 %v254_v51, %v254_v51  ;;  %v87_v58 = vadd.f32 %v86_v54, %v85_v53 }
  0xa1   :  { %80 = vadd.xlane.f32.xlu1 %v79_v52 }
  0xa2   :  { %v82_v57 = vadd.f32 %v70_v56, %v69_v55 }
  0xa4   :  { %83 = vadd.xlane.f32.xlu0 %v82_v57 }
  0xa5   :  { %88 = vadd.xlane.f32.xlu1 %v87_v58 }
 0x12a   :  { %v75_v59 = vpop.xlane.xlu1 %74  ;;  %v78_v60 = vpop.xlane.xlu0 %77 }
 0x12b   :  { %v90_v61 = vmul.f32 0.00390625, %v75_v59  ;;  %v91_v62 = vmul.f32 0.00390625, %v78_v60 }
 0x12d   :  { %v95_v0 = vadd.f32 1e-06, %v90_v61  ;;  %v96_v1 = vadd.f32 1e-06, %v91_v62 }
 0x12e   :  { %v81_v2 = vpop.xlane.xlu1 %80 }
 0x12f   :  { %173 = vrsqrt.f32 %v95_v0  ;;  %v92_v3 = vmul.f32 0.00390625, %v81_v2 }
 0x130   :  { %175 = vrsqrt.f32 %v96_v1 }
 0x131   :  { %v97_v5 = vadd.f32 1e-06, %v92_v3  ;;  %v84_v6 = vpop.xlane.xlu0 %83 }
 0x132   :  { %v89_v7 = vpop.xlane.xlu1 %88  ;;  %v93_v8 = vmul.f32 0.00390625, %v84_v6 }
 0x133   :  { %177 = vrsqrt.f32 %v97_v5  ;;  %v94_v9 = vmul.f32 0.00390625, %v89_v7 }
 0x134   :  { %v98_v12 = vadd.f32 1e-06, %v93_v8 }
 0x135   :  { %v99_v14 = vadd.f32 1e-06, %v94_v9 }
 0x136   :  { %179 = vrsqrt.f32 %v98_v12 }
 0x137   :  { %181 = vrsqrt.f32 %v99_v14 }
 0x139   :  { %v174_v18 = vpop.eup %173 }
 0x13a   :  { %v176_v19 = vpop.eup %175  ;;  %v105_v22 = vmul.f32 %v174_v18, %v224_v28  ;;  %v106_v23 = vmul.f32 %v174_v18, %v226_v29 }
 0x13b   :  { %v107_v24 = vmul.f32 %v176_v19, %v220_v26  ;;  %v108_v25 = vmul.f32 %v176_v19, %v222_v27 }
 0x13c   :  { %v127_v30 = vmul.f32 %v120_v16, %v105_v22  ;;  %v128_v31 = vmul.f32 %v124_v17, %v106_v23 }
 0x13d   :  { %v178_v32 = vpop.eup %177  ;;  %v129_v33 = vmul.f32 %v120_v16, %v107_v24  ;;  %v130_v34 = vmul.f32 %v124_v17, %v108_v25 }
 0x13e   :  { %v149_v35 = vadd.f32 %v142_v20, %v127_v30  ;;  %v150_v36 = vadd.f32 %v146_v21, %v128_v31  ;;  %v109_v37 = vmul.f32 %v178_v32, %v236_v38  ;;  %v110_v42 = vmul.f32 %v178_v32, %v238_v39 }
 0x13f   :  { %v151_v43 = vadd.f32 %v142_v20, %v129_v33  ;;  %v152_v44 = vadd.f32 %v146_v21, %v130_v34 }
 0x140   :  { %v180_v28 = vpop.eup %179  ;;  %159 = vst [vmem:[%s311_s3] sm:$0xff] %v149_v35  ;;  %160 = vst [vmem:[%s311_s3 + $0x8] sm:$0xff] %v150_v36  ;;  %v131_v26 = vmul.f32 %v120_v16, %v109_v37  ;;  %v132_v27 = vmul.f32 %v124_v17, %v110_v42 }
 0x141   :  { %v182_v29 = vpop.eup %181  ;;  %161 = vst [vmem:[%s311_s3 + $0x10] sm:$0xff] %v151_v43  ;;  %162 = vst [vmem:[%s311_s3 + $0x18] sm:$0xff] %v152_v44  ;;  %v111_v38 = vmul.f32 %v180_v28, %v252_v50  ;;  %v112_v39 = vmul.f32 %v180_v28, %v254_v51 }
 0x142   :  { %v153_v45 = vadd.f32 %v142_v20, %v131_v26  ;;  %v154_v46 = vadd.f32 %v146_v21, %v132_v27  ;;  %v113_v47 = vmul.f32 %v182_v29, %v240_v40  ;;  %v114_v48 = vmul.f32 %v182_v29, %v242_v41 }
 0x143   :  { %v133_v49 = vmul.f32 %v120_v16, %v111_v38  ;;  %v134_v52 = vmul.f32 %v124_v17, %v112_v39 }
 0x144   :  { %163 = vst [vmem:[%s311_s3 + $0x20] sm:$0xff] %v153_v45  ;;  %164 = vst [vmem:[%s311_s3 + $0x28] sm:$0xff] %v154_v46  ;;  %v135_v53 = vmul.f32 %v120_v16, %v113_v47  ;;  %v136_v50 = vmul.f32 %v124_v17, %v114_v48 }
 0x145   :  { %v155_v54 = vadd.f32 %v142_v20, %v133_v49  ;;  %v156_v51 = vadd.f32 %v146_v21, %v134_v52 }
 0x146   :  { %v157_v55 = vadd.f32 %v142_v20, %v135_v53  ;;  %v158_v56 = vadd.f32 %v146_v21, %v136_v50 }
 0x147   :  { %165 = vst [vmem:[%s311_s3 + $0x30] sm:$0xff] %v155_v54  ;;  %166 = vst [vmem:[%s311_s3 + $0x38] sm:$0xff] %v156_v51 }
 0x148   :  { %167 = vst [vmem:[%s311_s3 + $0x40] sm:$0x3] %v157_v55  ;;  %168 = vst [vmem:[%s311_s3 + $0x48] sm:$0x3] %v158_v56 }

</bundles_post_ra>
